<compile_context>
chip_gen: v6e
topology: v6e:2x2x1
jax: 0.10.0
libtpu: 0.0.40
codegen_flags: <defaults>
</compile_context>

<pallas_src>
import jax
import jax.numpy as jnp
from jax.experimental import pallas as pl
from jax.experimental.pallas import tpu as pltpu

LEAKY_SLOPE = 0.2
BN_EPS = 1e-5
LANE = 128  # pad layer-3 output columns to a multiple of this


def _leaky_relu(x):
    return jnp.where(x > 0, x, LEAKY_SLOPE * x)


def decoder_kernel(z_ref,
                   w1_ref, b1_ref,
                   w2_ref, b2_ref,
                   gamma_ref, beta_ref,
                   w3_ref, b3_ref,
                   out_ref):
    """Single-shot Decoder forward: all operands resident in VMEM."""
    z = z_ref[...]                                          # (B, latent) bf16

    # Linear(latent, 1024) + LeakyReLU(0.2)   (bf16 x bf16 -> f32 acc)
    h1 = jnp.dot(z, w1_ref[...], preferred_element_type=jnp.float32)
    h1 = _leaky_relu(h1 + b1_ref[...])                      # (B, 1024) f32

    # Linear(1024, 1024)
    h2 = jnp.dot(h1.astype(jnp.bfloat16), w2_ref[...],
                 preferred_element_type=jnp.float32)
    h2 = h2 + b2_ref[...]                                   # (B, 1024) f32

    # BatchNorm1d(1024), training mode (batch stats, biased variance), f32.
    # Affine folded: h2n = h2 * scale + shift.
    mean = jnp.mean(h2, axis=0, keepdims=True)              # (1, 1024)
    var = jnp.mean(jnp.square(h2 - mean), axis=0, keepdims=True)
    inv_std = jax.lax.rsqrt(var + BN_EPS)
    scale = inv_std * gamma_ref[...]                        # (1, 1024)
    shift = beta_ref[...] - mean * scale                    # (1, 1024)
    h3 = _leaky_relu(h2 * scale + shift).astype(jnp.bfloat16)

    # Linear(1024, out_dim_pad) + Tanh, full width in one MXU pass.
    out = jnp.dot(h3, w3_ref[...], preferred_element_type=jnp.float32)
    out_ref[...] = jnp.tanh(out + b3_ref[...])              # (B, out_dim_pad)


def decoder_forward(z, params):
    """Run the full Decoder forward in a single Pallas kernel invocation."""
    B, latent = z.shape
    hidden = params["w2"].shape[0]
    out_dim = params["w3"].shape[1]

    # Pad layer-3 columns to a multiple of 128 for lane-dense stores / MXU.
    out_dim_pad = pl.cdiv(out_dim, LANE) * LANE
    pad_n = out_dim_pad - out_dim
    w3 = jnp.pad(params["w3"], ((0, 0), (0, pad_n)))
    b3 = jnp.pad(params["b3"], ((0, 0), (0, pad_n)))

    z_bf16 = z.astype(jnp.bfloat16)

    args = (z_bf16,
            params["w1"], params["b1"],
            params["w2"], params["b2"],
            params["gamma"], params["beta"],
            w3, b3)

    # Advisory cost hint so XLA can overlap surrounding ops with the DMA
    # prologue of this latency-dominated call.
    flops = 2 * B * (latent * hidden + hidden * hidden + hidden * out_dim_pad)
    bytes_accessed = sum(int(a.size) * a.dtype.itemsize for a in args)
    bytes_accessed += B * out_dim_pad * 4
    transcendentals = B * out_dim_pad + hidden  # tanh + rsqrt

    out_padded = pl.pallas_call(
        decoder_kernel,
        out_shape=jax.ShapeDtypeStruct((B, out_dim_pad), jnp.float32),
        compiler_params=pltpu.CompilerParams(
            vmem_limit_bytes=32 << 20,
        ),
        cost_estimate=pl.CostEstimate(
            flops=flops,
            transcendentals=transcendentals,
            bytes_accessed=bytes_accessed,
        ),
    )(*args)

    return out_padded[:, :out_dim]


def init_params(key, latent_dim, hidden, out_dim):
    """Deterministic synthetic parameters with PyTorch-like shapes/init.

    Linear weights are pre-transposed to (in_features, out_features) and stored
    in bf16 (the kernel's MXU input dtype); biases / BN params stay f32.
    """
    k1, k2, k3, k4, k5, k6 = jax.random.split(key, 6)

    def linear(kw, kb, fan_in, fan_out):
        bound = 1.0 / jnp.sqrt(fan_in)
        w = jax.random.uniform(kw, (fan_in, fan_out), jnp.float32, -bound, bound)
        b = jax.random.uniform(kb, (1, fan_out), jnp.float32, -bound, bound)
        return w.astype(jnp.bfloat16), b

    w1, b1 = linear(k1, k2, latent_dim, hidden)
    w2, b2 = linear(k3, k4, hidden, hidden)
    w3, b3 = linear(k5, k6, hidden, out_dim)

    return {
        "w1": w1, "b1": b1,
        "w2": w2, "b2": b2,
        "gamma": jnp.ones((1, hidden), jnp.float32),   # BatchNorm1d weight init
        "beta": jnp.zeros((1, hidden), jnp.float32),   # BatchNorm1d bias init
        "w3": w3, "b3": b3,
    }


def reference_forward(z, p):
    """Pure-JAX reference of the same math (bf16 operands, f32 accumulation)."""
    zb = z.astype(jnp.bfloat16)
    h1 = jnp.dot(zb, p["w1"], preferred_element_type=jnp.float32) + p["b1"]
    h1 = _leaky_relu(h1)
    h2 = jnp.dot(h1.astype(jnp.bfloat16), p["w2"],
                 preferred_element_type=jnp.float32) + p["b2"]
    mean = jnp.mean(h2, axis=0, keepdims=True)
    var = jnp.mean((h2 - mean) ** 2, axis=0, keepdims=True)
    h2n = (h2 - mean) * jax.lax.rsqrt(var + BN_EPS) * p["gamma"] + p["beta"]
    h3 = _leaky_relu(h2n).astype(jnp.bfloat16)
    out = jnp.dot(h3, p["w3"], preferred_element_type=jnp.float32) + p["b3"]
    return jnp.tanh(out)


if __name__ == "__main__":
    # opt.latent_dim -> 32 ; img_shape = (channels=1, data_len=2, 257) -> 514
    B = 8
    LATENT = 32
    HIDDEN = 1024
    CHANNELS, DATA_LEN, LAST = 1, 2, 257
    OUT_DIM = CHANNELS * DATA_LEN * LAST  # np.prod(img_shape)

    key = jax.random.PRNGKey(0)
    kz, kp = jax.random.split(key)
    z = jax.random.normal(kz, (B, LATENT), jnp.float32)
    params = init_params(kp, LATENT, HIDDEN, OUT_DIM)

    out = decoder_forward(z, params)
    out = jax.block_until_ready(out)

    ref = reference_forward(z, params)
    assert out.shape == (B, OUT_DIM)
    assert jnp.allclose(out, ref, atol=2e-3, rtol=2e-3), "mismatch vs JAX reference"

    print("KERNEL_OK")
</pallas_src>

<mosaic_0001>
module attributes {stable_mosaic.version = 11 : i64} {
  func.func @decoder_kernel(%arg0: memref<8x32xbf16, #tpu.memory_space<vmem>>, %arg1: memref<32x1024xbf16, #tpu.memory_space<vmem>>, %arg2: memref<1x1024xf32, #tpu.memory_space<vmem>>, %arg3: memref<1024x1024xbf16, #tpu.memory_space<vmem>>, %arg4: memref<1x1024xf32, #tpu.memory_space<vmem>>, %arg5: memref<1x1024xf32, #tpu.memory_space<vmem>>, %arg6: memref<1x1024xf32, #tpu.memory_space<vmem>>, %arg7: memref<1024x640xbf16, #tpu.memory_space<vmem>>, %arg8: memref<1x640xf32, #tpu.memory_space<vmem>>, %arg9: memref<8x640xf32, #tpu.memory_space<vmem>>) attributes {dimension_semantics = [], scalar_prefetch = 0 : i64, scratch_operands = 0 : i64, tpu.core_type = #tpu.core_type<tc>} {
    %c0 = arith.constant 0 : index
    %c0_0 = arith.constant 0 : index
    %0 = vector.load %arg0[%c0, %c0_0] : memref<8x32xbf16, #tpu.memory_space<vmem>>, vector<8x32xbf16>
    %c0_1 = arith.constant 0 : index
    %c0_2 = arith.constant 0 : index
    %1 = vector.load %arg1[%c0_1, %c0_2] : memref<32x1024xbf16, #tpu.memory_space<vmem>>, vector<32x1024xbf16>
    %cst = arith.constant dense<0.000000e+00> : vector<8x1024xf32>
    %2 = tpu.matmul %0, %1, %cst {dimension_numbers = #tpu.dot_dimension_numbers<[1], [0], [0], [1], [0, 0, 1, 1], [], []>} : vector<8x32xbf16>, vector<32x1024xbf16>, vector<8x1024xf32> -> vector<8x1024xf32>
    %c0_3 = arith.constant 0 : index
    %c0_4 = arith.constant 0 : index
    %3 = vector.load %arg2[%c0_3, %c0_4] : memref<1x1024xf32, #tpu.memory_space<vmem>>, vector<1x1024xf32>
    %4 = vector.broadcast %3 : vector<1x1024xf32> to vector<8x1024xf32>
    %5 = arith.addf %2, %4 : vector<8x1024xf32>
    %cst_5 = arith.constant 0.000000e+00 : f32
    %6 = vector.broadcast %cst_5 : f32 to vector<8x1024xf32>
    %7 = arith.cmpf ogt, %5, %6 : vector<8x1024xf32>
    %cst_6 = arith.constant 2.000000e-01 : f32
    %8 = vector.broadcast %cst_6 : f32 to vector<8x1024xf32>
    %9 = arith.mulf %8, %5 : vector<8x1024xf32>
    %10 = arith.select %7, %5, %9 : vector<8x1024xi1>, vector<8x1024xf32>
    %11 = arith.truncf %10 : vector<8x1024xf32> to vector<8x1024xbf16>
    %c0_7 = arith.constant 0 : index
    %c0_8 = arith.constant 0 : index
    %12 = vector.load %arg3[%c0_7, %c0_8] : memref<1024x1024xbf16, #tpu.memory_space<vmem>>, vector<1024x1024xbf16>
    %cst_9 = arith.constant dense<0.000000e+00> : vector<8x1024xf32>
    %13 = tpu.matmul %11, %12, %cst_9 {dimension_numbers = #tpu.dot_dimension_numbers<[1], [0], [0], [1], [0, 0, 1, 1], [], []>} : vector<8x1024xbf16>, vector<1024x1024xbf16>, vector<8x1024xf32> -> vector<8x1024xf32>
    %c0_10 = arith.constant 0 : index
    %c0_11 = arith.constant 0 : index
    %14 = vector.load %arg4[%c0_10, %c0_11] : memref<1x1024xf32, #tpu.memory_space<vmem>>, vector<1x1024xf32>
    %15 = vector.broadcast %14 : vector<1x1024xf32> to vector<8x1024xf32>
    %16 = arith.addf %13, %15 : vector<8x1024xf32>
    %cst_12 = arith.constant dense<0.000000e+00> : vector<1024xf32>
    %17 = vector.multi_reduction <add>, %16, %cst_12 [0] : vector<8x1024xf32> to vector<1024xf32>
    %18 = vector.shape_cast %17 : vector<1024xf32> to vector<1x1024xf32>
    %cst_13 = arith.constant 8.000000e+00 : f32
    %19 = vector.broadcast %cst_13 : f32 to vector<1x1024xf32>
    %20 = arith.divf %18, %19 : vector<1x1024xf32>
    %21 = vector.broadcast %20 : vector<1x1024xf32> to vector<8x1024xf32>
    %22 = arith.subf %16, %21 : vector<8x1024xf32>
    %23 = arith.mulf %22, %22 : vector<8x1024xf32>
    %cst_14 = arith.constant dense<0.000000e+00> : vector<1024xf32>
    %24 = vector.multi_reduction <add>, %23, %cst_14 [0] : vector<8x1024xf32> to vector<1024xf32>
    %25 = vector.shape_cast %24 : vector<1024xf32> to vector<1x1024xf32>
    %cst_15 = arith.constant 8.000000e+00 : f32
    %26 = vector.broadcast %cst_15 : f32 to vector<1x1024xf32>
    %27 = arith.divf %25, %26 : vector<1x1024xf32>
    %cst_16 = arith.constant 9.99999974E-6 : f32
    %28 = vector.broadcast %cst_16 : f32 to vector<1x1024xf32>
    %29 = arith.addf %27, %28 : vector<1x1024xf32>
    %30 = math.rsqrt %29 : vector<1x1024xf32>
    %c0_17 = arith.constant 0 : index
    %c0_18 = arith.constant 0 : index
    %31 = vector.load %arg5[%c0_17, %c0_18] : memref<1x1024xf32, #tpu.memory_space<vmem>>, vector<1x1024xf32>
    %32 = arith.mulf %30, %31 : vector<1x1024xf32>
    %c0_19 = arith.constant 0 : index
    %c0_20 = arith.constant 0 : index
    %33 = vector.load %arg6[%c0_19, %c0_20] : memref<1x1024xf32, #tpu.memory_space<vmem>>, vector<1x1024xf32>
    %34 = arith.mulf %20, %32 : vector<1x1024xf32>
    %35 = arith.subf %33, %34 : vector<1x1024xf32>
    %36 = vector.broadcast %32 : vector<1x1024xf32> to vector<8x1024xf32>
    %37 = arith.mulf %16, %36 : vector<8x1024xf32>
    %38 = vector.broadcast %35 : vector<1x1024xf32> to vector<8x1024xf32>
    %39 = arith.addf %37, %38 : vector<8x1024xf32>
    %cst_21 = arith.constant 0.000000e+00 : f32
    %40 = vector.broadcast %cst_21 : f32 to vector<8x1024xf32>
    %41 = arith.cmpf ogt, %39, %40 : vector<8x1024xf32>
    %cst_22 = arith.constant 2.000000e-01 : f32
    %42 = vector.broadcast %cst_22 : f32 to vector<8x1024xf32>
    %43 = arith.mulf %42, %39 : vector<8x1024xf32>
    %44 = arith.select %41, %39, %43 : vector<8x1024xi1>, vector<8x1024xf32>
    %45 = arith.truncf %44 : vector<8x1024xf32> to vector<8x1024xbf16>
    %c0_23 = arith.constant 0 : index
    %c0_24 = arith.constant 0 : index
    %46 = vector.load %arg7[%c0_23, %c0_24] : memref<1024x640xbf16, #tpu.memory_space<vmem>>, vector<1024x640xbf16>
    %cst_25 = arith.constant dense<0.000000e+00> : vector<8x640xf32>
    %47 = tpu.matmul %45, %46, %cst_25 {dimension_numbers = #tpu.dot_dimension_numbers<[1], [0], [0], [1], [0, 0, 1, 1], [], []>} : vector<8x1024xbf16>, vector<1024x640xbf16>, vector<8x640xf32> -> vector<8x640xf32>
    %c0_26 = arith.constant 0 : index
    %c0_27 = arith.constant 0 : index
    %48 = vector.load %arg8[%c0_26, %c0_27] : memref<1x640xf32, #tpu.memory_space<vmem>>, vector<1x640xf32>
    %49 = vector.broadcast %48 : vector<1x640xf32> to vector<8x640xf32>
    %50 = arith.addf %47, %49 : vector<8x640xf32>
    %51 = math.tanh %50 : vector<8x640xf32>
    %c0_28 = arith.constant 0 : index
    %c0_29 = arith.constant 0 : index
    %52 = vector.load %arg9[%c0_28, %c0_29] : memref<8x640xf32, #tpu.memory_space<vmem>>, vector<8x640xf32>
    tpu.vector_store %arg9[%c0_28, %c0_29], %51 {strides = array<i32>} : memref<8x640xf32, #tpu.memory_space<vmem>>, vector<8x640xf32>,
    return
  }
}

</mosaic_0001>

<bundles_post_ra>
// kernel: tpu_custom_call.1
= control target key start
LH: loop header
LB: loop body
LE: loop exit
PB: predicated region body
PF: predicated region fallthrough
CT: control target
= control target key end

     0   :  { %14 = vsyncpa [#allocation3], 0  ;;  %s9360_s0 = inlined_call_operand.hbm [shape: bf16[8,32], index: 0, kind: input, shape index: {}]   ;;  %s9361_s1 = inlined_call_operand.hbm [shape: bf16[32,1024], index: 1, kind: input, shape index: {}]   ;;  %s9362_s2 = inlined_call_operand.hbm [shape: f32[1,1024], index: 2, kind: input, shape index: {}]   ;;  %s9363_s3 = inlined_call_operand.hbm [shape: bf16[1024,1024], index: 3, kind: input, shape index: {}]   ;;  %s9364_s4 = inlined_call_operand.hbm [shape: f32[1,1024], index: 4, kind: input, shape index: {}]   ;;  %s9365_s5 = inlined_call_operand.hbm [shape: f32[1,1024], index: 5, kind: input, shape index: {}]   ;;  %s9366_s6 = inlined_call_operand.hbm [shape: f32[1,1024], index: 6, kind: input, shape index: {}]   ;;  %s9367_s7 = inlined_call_operand.hbm [shape: bf16[1024,640], index: 7, kind: input, shape index: {}]   ;;  %s9368_s8 = inlined_call_operand.hbm [shape: f32[1,640], index: 8, kind: input, shape index: {}]   ;;  %s9369_s9 = inlined_call_operand.hbm [shape: f32[8,640], index: 9, kind: output, shape index: {}]  }
   0x1   :  { %15 = vsyncpa [#allocation6], 0 }
   0x2   :  { %16 = vsyncpa [#allocation9], 0 }
   0x3   :  { %17 = vsyncpa [#allocation12], 0 }
   0x4   :  { %18 = vsyncpa [#allocation15], 0 }
   0x5   :  { %19 = vsyncpa [#allocation4], 0  ;;  %s8873_s30 = smov [#allocation5]  }
   0x6   :  { %s35_s10 = sshll.u32 %s8873_s30, 4  ;;  %s36_s10 = int_to_ptr.vmem [resolvable:$true] %s35_s10 }
   0x7   :  { %s8669_s11 = scalar_lea.vmem %s36_s10, 2048  ;;  %p8674_p1 = scmp.lt.s32.totalorder %s36_s10, %s36_s10 }
   0x8   :  { %p8670_p0 = scmp.ne.s32.totalorder %s36_s10, %s8669_s11  ;;  %p8675_p2 = scmp.lt.s32.totalorder %s8669_s11, %s8669_s11 }
   0xa   :  { %p8676_p3 = por %p8675_p2, %p8674_p1 }
   0xc   :  { %p8677_p4 = pnand %p8676_p3, %p8670_p0 }
   0xe   :  { %8680 = shalt.err (!%p8677_p4)
}
   0xf   :  { %s8874_s12 = smov 512   ;;  %s8875_s13 = smov 32  }
  0x10   :  { %41 = dma.hbm_to_vmem [thread:$0]  %s9361_s1, 2048, %s36_s10, [#allocation6], %s8874_s12, %s8874_s12, %s8875_s13  }
  0x11   :  { %s8876_s16 = smov [#allocation8]   ;;  %s8877_s18 = smov [#allocation11]  }
  0x12   :  { %s57_s17 = sshll.u32 %s8876_s16, 4  ;;  %s80_s19 = sshll.u32 %s8877_s18, 4  ;;  %s58_s17 = int_to_ptr.vmem [resolvable:$true] %s57_s17  ;;  %s81_s19 = int_to_ptr.vmem [resolvable:$true] %s80_s19 }
  0x13   :  { %s8689_s20 = scalar_lea.vmem %s58_s17, 65536  ;;  %p8694_p6 = scmp.lt.s32.totalorder %s58_s17, %s58_s17 }
  0x14   :  { %p8690_p5 = scmp.ne.s32.totalorder %s58_s17, %s8689_s20  ;;  %p8695_p7 = scmp.lt.s32.totalorder %s8689_s20, %s8689_s20 }
  0x16   :  { %p8696_p8 = por %p8695_p7, %p8694_p6 }
  0x18   :  { %p8697_p9 = pnand %p8696_p8, %p8690_p5 }
  0x1a   :  { %8700 = shalt.err (!%p8697_p9)
}
  0x1b   :  { %63 = dma.hbm_to_vmem [thread:$0]  %s9363_s3, 65536, %s58_s17, [#allocation9], %s8874_s12, %s8874_s12, %s8875_s13  }
  0x1c   :  { %s8709_s23 = scalar_lea.vmem %s81_s19, 128  ;;  %p8714_p11 = scmp.lt.s32.totalorder %s81_s19, %s81_s19 }
  0x1d   :  { %p8710_p10 = scmp.ne.s32.totalorder %s81_s19, %s8709_s23  ;;  %p8715_p12 = scmp.lt.s32.totalorder %s8709_s23, %s8709_s23 }
  0x1f   :  { %p8716_p13 = por %p8715_p12, %p8714_p11 }
  0x21   :  { %p8717_p0 = pnand %p8716_p13, %p8710_p10 }
  0x23   :  { %8720 = shalt.err (!%p8717_p0)
}
  0x24   :  { %83 = dma.hbm_to_vmem [thread:$0]  %s9365_s5, 128, %s81_s19, [#allocation12]  }
  0x25   :  { %s8878_s25 = smov [#allocation14]  }
  0x26   :  { %s99_s26 = sshll.u32 %s8878_s25, 4  ;;  %s100_s26 = int_to_ptr.vmem [resolvable:$true] %s99_s26 }
  0x27   :  { %s8729_s27 = scalar_lea.vmem %s100_s26, 40960  ;;  %p8734_p2 = scmp.lt.s32.totalorder %s100_s26, %s100_s26 }
  0x28   :  { %p8730_p1 = scmp.ne.s32.totalorder %s100_s26, %s8729_s27  ;;  %p8735_p3 = scmp.lt.s32.totalorder %s8729_s27, %s8729_s27 }
  0x2a   :  { %p8736_p4 = por %p8735_p3, %p8734_p2 }
  0x2c   :  { %p8737_p5 = pnand %p8736_p4, %p8730_p1 }
  0x2e   :  { %8740 = shalt.err (!%p8737_p5)
}
  0x2f   :  { %s8879_s3 = smov 320   ;;  %s8880_s28 = smov 20  }
  0x30   :  { %105 = dma.hbm_to_vmem [thread:$0]  %s9367_s7, 40960, %s100_s26, [#allocation15], %s8879_s3, %s8879_s3, %s8880_s28  }
  0x31   :  { %s8881_s10 = smov [#allocation2]   ;;  %s8882_s12 = smov [#allocation7]  }
  0x32   :  { %s26_s11 = sshll.u32 %s8881_s10, 4  ;;  %s48_s5 = sshll.u32 %s8882_s12, 4  ;;  %s27_s11 = int_to_ptr.vmem [resolvable:$true] %s26_s11  ;;  %s49_s5 = int_to_ptr.vmem [resolvable:$true] %s48_s5 }
  0x33   :  { %s8749_s13 = scalar_lea.vmem %s27_s11, 64  ;;  %p8754_p7 = scmp.lt.s32.totalorder %s27_s11, %s27_s11 }
  0x34   :  { %p8750_p6 = scmp.ne.s32.totalorder %s27_s11, %s8749_s13  ;;  %p8755_p8 = scmp.lt.s32.totalorder %s8749_s13, %s8749_s13 }
  0x36   :  { %p8756_p9 = por %p8755_p8, %p8754_p7 }
  0x38   :  { %p8757_p10 = pnand %p8756_p9, %p8750_p6 }
  0x3a   :  { %8760 = shalt.err (!%p8757_p10)
}
  0x3b   :  { %29 = dma.hbm_to_vmem [thread:$0]  %s9360_s0, 64, %s27_s11, [#allocation3]  }
  0x3c   :  { %s8769_s16 = scalar_lea.vmem %s49_s5, 128  ;;  %p8774_p12 = scmp.lt.s32.totalorder %s49_s5, %s49_s5 }
  0x3d   :  { %p8770_p11 = scmp.ne.s32.totalorder %s49_s5, %s8769_s16  ;;  %p8775_p13 = scmp.lt.s32.totalorder %s8769_s16, %s8769_s16 }
  0x3f   :  { %p8776_p0 = por %p8775_p13, %p8774_p12 }
  0x41   :  { %p8777_p1 = pnand %p8776_p0, %p8770_p11 }
  0x43   :  { %8780 = shalt.err (!%p8777_p1)
}
  0x44   :  { %51 = dma.hbm_to_vmem [thread:$0]  %s9362_s2, 128, %s49_s5, [#allocation6]  }
  0x45   :  { %s8883_s18 = smov [#allocation10]   ;;  %s8884_s20 = smov [#allocation13]  }
  0x46   :  { %s70_s19 = sshll.u32 %s8883_s18, 4  ;;  %s90_s21 = sshll.u32 %s8884_s20, 4  ;;  %s71_s19 = int_to_ptr.vmem [resolvable:$true] %s70_s19  ;;  %s91_s21 = int_to_ptr.vmem [resolvable:$true] %s90_s21 }
  0x47   :  { %s8789_s22 = scalar_lea.vmem %s71_s19, 128  ;;  %p8794_p3 = scmp.lt.s32.totalorder %s71_s19, %s71_s19 }
  0x48   :  { %p8790_p2 = scmp.ne.s32.totalorder %s71_s19, %s8789_s22  ;;  %p8795_p4 = scmp.lt.s32.totalorder %s8789_s22, %s8789_s22 }
  0x4a   :  { %p8796_p5 = por %p8795_p4, %p8794_p3 }
  0x4c   :  { %p8797_p6 = pnand %p8796_p5, %p8790_p2 }
  0x4e   :  { %8800 = shalt.err (!%p8797_p6)
}
  0x4f   :  { %73 = dma.hbm_to_vmem [thread:$0]  %s9364_s4, 128, %s71_s19, [#allocation9]  }
  0x50   :  { %s8809_s1 = scalar_lea.vmem %s91_s21, 128  ;;  %p8814_p8 = scmp.lt.s32.totalorder %s91_s21, %s91_s21 }
  0x51   :  { %p8810_p7 = scmp.ne.s32.totalorder %s91_s21, %s8809_s1  ;;  %p8815_p9 = scmp.lt.s32.totalorder %s8809_s1, %s8809_s1 }
  0x53   :  { %p8816_p10 = por %p8815_p9, %p8814_p8 }
  0x55   :  { %p8817_p11 = pnand %p8816_p10, %p8810_p7 }
  0x57   :  { %8820 = shalt.err (!%p8817_p11)
}
  0x58   :  { %93 = dma.hbm_to_vmem [thread:$0]  %s9366_s6, 128, %s91_s21, [#allocation12]  }
  0x59   :  { %s8885_s25 = smov [#allocation16]  }
  0x5a   :  { %s112_s26 = sshll.u32 %s8885_s25, 4  ;;  %s113_s26 = int_to_ptr.vmem [resolvable:$true] %s112_s26 }
  0x5b   :  { %s8829_s27 = scalar_lea.vmem %s113_s26, 80  ;;  %s8833_s3 = scalar_lea.vmem %s113_s26, 96 }
  0x5c   :  { %p8830_p12 = scmp.ne.s32.totalorder %s113_s26, %s8829_s27  ;;  %p8834_p13 = scmp.lt.s32.totalorder %s113_s26, %s113_s26 }
  0x5d   :  { %p8835_p0 = scmp.lt.s32.totalorder %s8833_s3, %s8829_s27 }
  0x5f   :  { %p8836_p1 = por %p8835_p0, %p8834_p13 }
  0x61   :  { %p8837_p2 = pnand %p8836_p1, %p8830_p12 }
  0x63   :  { %8840 = shalt.err (!%p8837_p2)
}
  0x64   :  { %115 = dma.hbm_to_vmem [thread:$0]  %s9368_s8, 80, %s113_s26, [#allocation15]  }
  0x65   :  { %8861 = dma.done.wait [#allocation3], 64  }
  0x66   :  { %8862 = vsyncadd [#allocation3], 4294967232 }
  0x67   :  { %8863 = dma.done.wait [#allocation6], 2176  }
  0x68   :  { %8864 = vsyncadd [#allocation6], 4294965120 }
  0x69   :  { %8865 = dma.done.wait [#allocation9], 65664  }
  0x6a   :  { %8866 = vsyncadd [#allocation9], 4294901632 }
  0x6b   :  { %8867 = dma.done.wait [#allocation12], 256  }
  0x6c   :  { %8868 = vsyncadd [#allocation12], 4294967040 }
  0x6d   :  { %8869 = dma.done.wait [#allocation15], 41040  }
  0x6e   :  { %8870 = vsyncadd [#allocation15], 4294926256  ;;  %v8886_v0 = vmov 0   ;;  %v153_v1 = vld [vmem:[#allocation5 + $0x40] sm:$0xff]  ;;  %v154_v3 = vld [vmem:[#allocation5 + $0x48] sm:$0xff]  ;;  %vm283_vm0 = vcmask 261120  }
  0x6f   :  { %319 = vmatprep.mubr.bf16.mxu0 %v8886_v0  ;;  %360 = vmatprep.mubr.bf16.mxu1 %v8886_v0  ;;  %v157_v2 = vld [vmem:[#allocation5 + $0x60] sm:$0xff]  ;;  %v158_v5 = vld [vmem:[#allocation5 + $0x68] sm:$0xff]  ;;  %v155_v15 = vld [vmem:[#allocation5 + $0x50] sm:$0xff]  ;;  %s8888_s6 = smov [#allocation17]  }
  0x70   :  { %v7238_v4 = vcombine.high %v153_v1, %v157_v2  ;;  %v7237_v6 = vcombine.low %v153_v1, %v157_v2  ;;  %v145_v7 = vld [vmem:[#allocation5] sm:$0xff]  ;;  %v7240_v9 = vcombine.high %v154_v3, %v158_v5  ;;  %v7239_v10 = vcombine.low %v154_v3, %v158_v5  ;;  %v146_v12 = vld [vmem:[#allocation5 + $0x8] sm:$0xff]  ;;  %v159_v16 = vld [vmem:[#allocation5 + $0x70] sm:$0xff]  ;;  %s7216_s8 = sshll.u32 %s8888_s6, 4  ;;  %s7217_s8 = int_to_ptr.vmem [resolvable:$true] %s7216_s8 }
  0x71   :  { %v149_v8 = vld [vmem:[#allocation5 + $0x20] sm:$0xff]  ;;  %v150_v13 = vld [vmem:[#allocation5 + $0x28] sm:$0xff]  ;;  %v156_v17 = vld [vmem:[#allocation5 + $0x58] sm:$0xff]  ;;  %v7242_v21 = vcombine.high %v155_v15, %v159_v16  ;;  %v7241_v28 = vcombine.low %v155_v15, %v159_v16  ;;  %s8841_s29 = scalar_lea.vmem %s7217_s8, 640  ;;  %p8846_p4 = scmp.lt.s32.totalorder %s7217_s8, %s7217_s8 }
  0x72   :  { %v7230_v11 = vcombine.high %v145_v7, %v149_v8  ;;  %299 = vmatprep.subr.bf16.mxu0 %v7238_v4  ;;  %v7232_v14 = vcombine.high %v146_v12, %v150_v13  ;;  %340 = vmatprep.subr.bf16.mxu1 %v7240_v9  ;;  %v7229_v18 = vcombine.low %v145_v7, %v149_v8  ;;  %v160_v19 = vld [vmem:[#allocation5 + $0x78] sm:$0xff]  ;;  %v147_v23 = vld [vmem:[#allocation5 + $0x10] sm:$0xff]  ;;  %v539_v32 = vld [vmem:[#allocation8 + $0x1c0] sm:$0xff]  ;;  %p8842_p3 = scmp.ne.s32.totalorder %s7217_s8, %s8841_s29  ;;  %p8847_p5 = scmp.lt.s32.totalorder %s8841_s29, %s8841_s29 }
  0x73   :  { %300 = vmatpush1.bf16.msra.mxu0 %v7237_v6  ;;  %341 = vmatpush1.bf16.msra.mxu1 %v7239_v10  ;;  %v7231_v20 = vcombine.low %v146_v12, %v150_v13  ;;  %v7244_v22 = vcombine.high %v156_v17, %v160_v19  ;;  %v151_v24 = vld [vmem:[#allocation5 + $0x30] sm:$0xff]  ;;  %v148_v25 = vld [vmem:[#allocation5 + $0x18] sm:$0xff]  ;;  %v7243_v29 = vcombine.low %v156_v17, %v160_v19  ;;  %v543_v33 = vld [vmem:[#allocation8 + $0x1e0] sm:$0xff] }
  0x74   :  { %301 = vmatprep.subr.bf16.mxu0 %v7230_v11  ;;  %342 = vmatprep.subr.bf16.mxu1 %v7232_v14  ;;  %v152_v26 = vld [vmem:[#allocation5 + $0x38] sm:$0xff]  ;;  %v7234_v30 = vcombine.high %v147_v23, %v151_v24  ;;  %v667_v34 = vld [vmem:[#allocation8 + $0x5c0] sm:$0xff]  ;;  %v7233_v36 = vcombine.low %v147_v23, %v151_v24  ;;  %v7306_v38 = vcombine.high %v539_v32, %v543_v33  ;;  %p8848_p6 = por %p8847_p5, %p8846_p4 }
  0x75   :  { %v144_v27 = vld [vmem:[#allocation2] sm:$0xf]  ;;  %v7236_v31 = vcombine.high %v148_v25, %v152_v26  ;;  %v671_v35 = vld [vmem:[#allocation8 + $0x5e0] sm:$0xff]  ;;  %v7235_v37 = vcombine.low %v148_v25, %v152_v26  ;;  %v7305_v44 = vcombine.low %v539_v32, %v543_v33 }
  0x76   :  { %v7434_v39 = vcombine.high %v667_v34, %v671_v35  ;;  %v531_v40 = vld [vmem:[#allocation8 + $0x180] sm:$0xff]  ;;  %v7433_v45 = vcombine.low %v667_v34, %v671_v35  ;;  %p8849_p7 = pnand %p8848_p6, %p8842_p3 }
  0x77   :  { %302 = vmatpush1.bf16.msra.mxu0 %v7229_v18  ;;  %343 = vmatpush1.bf16.msra.mxu1 %v7231_v20  ;;  %v535_v41 = vld [vmem:[#allocation8 + $0x1a0] sm:$0xff] }
  0x78   :  { %381 = vmatprep.subr.bf16.mxu0 %v7242_v21  ;;  %422 = vmatprep.subr.bf16.mxu1 %v7244_v22  ;;  %v659_v42 = vld [vmem:[#allocation8 + $0x580] sm:$0xff]  ;;  %v7298_v46 = vcombine.high %v531_v40, %v535_v41  ;;  %v7297_v52 = vcombine.low %v531_v40, %v535_v41 }
  0x79   :  { %v663_v43 = vld [vmem:[#allocation8 + $0x5a0] sm:$0xff] }
  0x7a   :  { %7245 = vmatmul.mubr.msk.bf16.vlgmr.msra.gmra.mxu0 %vm283_vm0, %v144_v27  ;;  %7246 = vmatmul.mubr.msk.bf16.vlgmr.msra.gmra.mxu1 %vm283_vm0, %v144_v27  ;;  %v7426_v47 = vcombine.high %v659_v42, %v663_v43  ;;  %v523_v48 = vld [vmem:[#allocation8 + $0x140] sm:$0xff]  ;;  %v7425_v53 = vcombine.low %v659_v42, %v663_v43 }
  0x7b   :  { %382 = vmatpush1.bf16.msra.mxu0 %v7241_v28  ;;  %423 = vmatpush1.bf16.msra.mxu1 %v7243_v29  ;;  %v527_v49 = vld [vmem:[#allocation8 + $0x160] sm:$0xff] }
  0x7c   :  { %383 = vmatprep.subr.bf16.mxu0 %v7234_v30  ;;  %424 = vmatprep.subr.bf16.mxu1 %v7236_v31  ;;  %v651_v50 = vld [vmem:[#allocation8 + $0x540] sm:$0xff]  ;;  %v7290_v54 = vcombine.high %v523_v48, %v527_v49  ;;  %v7289_v60 = vcombine.low %v523_v48, %v527_v49 }
  0x7d   :  { %401 = vmatprep.mubr.bf16.mxu0 %v8886_v0  ;;  %442 = vmatprep.mubr.bf16.mxu1 %v8886_v0  ;;  %v655_v51 = vld [vmem:[#allocation8 + $0x560] sm:$0xff] }
  0x7e   :  { %v7418_v55 = vcombine.high %v651_v50, %v655_v51  ;;  %v515_v56 = vld [vmem:[#allocation8 + $0x100] sm:$0xff]  ;;  %v7417_v63 = vcombine.low %v651_v50, %v655_v51 }
  0x7f   :  { %384 = vmatpush1.bf16.msra.mxu0 %v7233_v36  ;;  %425 = vmatpush1.bf16.msra.mxu1 %v7235_v37  ;;  %v519_v57 = vld [vmem:[#allocation8 + $0x120] sm:$0xff] }
  0x80   :  { %3597 = vmatprep.subr.bf16.mxu0 %v7306_v38  ;;  %3638 = vmatprep.subr.bf16.mxu1 %v7434_v39  ;;  %v643_v58 = vld [vmem:[#allocation8 + $0x500] sm:$0xff]  ;;  %v7282_v0 = vcombine.high %v515_v56, %v519_v57  ;;  %v7281_v4 = vcombine.low %v515_v56, %v519_v57 }
  0x81   :  { %v647_v59 = vld [vmem:[#allocation8 + $0x520] sm:$0xff] }
  0x82   :  { %7247 = vmatmul.mubr.msk.bf16.vlgmr.msra.gmra.mxu0 %vm283_vm0, %v144_v27  ;;  %7248 = vmatmul.mubr.msk.bf16.vlgmr.msra.gmra.mxu1 %vm283_vm0, %v144_v27  ;;  %v507_v61 = vld [vmem:[#allocation8 + $0xc0] sm:$0xff]  ;;  %v7410_v3 = vcombine.high %v643_v58, %v647_v59  ;;  %v7409_v7 = vcombine.low %v643_v58, %v647_v59 }
  0x83   :  { %3598 = vmatpush1.bf16.msra.mxu0 %v7305_v44  ;;  %3639 = vmatpush1.bf16.msra.mxu1 %v7433_v45  ;;  %v511_v62 = vld [vmem:[#allocation8 + $0xe0] sm:$0xff] }
  0x84   :  { %3599 = vmatprep.subr.bf16.mxu0 %v7298_v46  ;;  %3640 = vmatprep.subr.bf16.mxu1 %v7426_v47  ;;  %v635_v1 = vld [vmem:[#allocation8 + $0x4c0] sm:$0xff]  ;;  %v7274_v8 = vcombine.high %v507_v61, %v511_v62  ;;  %v7273_v12 = vcombine.low %v507_v61, %v511_v62 }
  0x85   :  { %v639_v2 = vld [vmem:[#allocation8 + $0x4e0] sm:$0xff] }
  0x86   :  { %v499_v5 = vld [vmem:[#allocation8 + $0x80] sm:$0xff]  ;;  %v7402_v11 = vcombine.high %v635_v1, %v639_v2  ;;  %v7401_v15 = vcombine.low %v635_v1, %v639_v2 }
  0x87   :  { %3600 = vmatpush1.bf16.msra.mxu0 %v7297_v52  ;;  %3641 = vmatpush1.bf16.msra.mxu1 %v7425_v53  ;;  %v503_v6 = vld [vmem:[#allocation8 + $0xa0] sm:$0xff] }
  0x88   :  { %3601 = vmatprep.subr.bf16.mxu0 %v7290_v54  ;;  %3642 = vmatprep.subr.bf16.mxu1 %v7418_v55  ;;  %v627_v9 = vld [vmem:[#allocation8 + $0x480] sm:$0xff]  ;;  %v7266_v16 = vcombine.high %v499_v5, %v503_v6  ;;  %v7265_v20 = vcombine.low %v499_v5, %v503_v6 }
  0x89   :  { %v631_v10 = vld [vmem:[#allocation8 + $0x4a0] sm:$0xff] }
  0x8a   :  { %v491_v13 = vld [vmem:[#allocation8 + $0x40] sm:$0xff]  ;;  %v7394_v19 = vcombine.high %v627_v9, %v631_v10  ;;  %v7393_v23 = vcombine.low %v627_v9, %v631_v10 }
  0x8b   :  { %3602 = vmatpush1.bf16.msra.mxu0 %v7289_v60  ;;  %3643 = vmatpush1.bf16.msra.mxu1 %v7417_v63  ;;  %v495_v14 = vld [vmem:[#allocation8 + $0x60] sm:$0xff] }
  0x8c   :  { %3603 = vmatprep.subr.bf16.mxu0 %v7282_v0  ;;  %3644 = vmatprep.subr.bf16.mxu1 %v7410_v3  ;;  %v619_v17 = vld [vmem:[#allocation8 + $0x440] sm:$0xff]  ;;  %v7258_v24 = vcombine.high %v491_v13, %v495_v14  ;;  %v7257_v28 = vcombine.low %v491_v13, %v495_v14 }
  0x8d   :  { %v623_v18 = vld [vmem:[#allocation8 + $0x460] sm:$0xff] }
  0x8e   :  { %v483_v21 = vld [vmem:[#allocation8] sm:$0xff]  ;;  %v7386_v27 = vcombine.high %v619_v17, %v623_v18  ;;  %v7385_v31 = vcombine.low %v619_v17, %v623_v18 }
  0x8f   :  { %3604 = vmatpush1.bf16.msra.mxu0 %v7281_v4  ;;  %3645 = vmatpush1.bf16.msra.mxu1 %v7409_v7  ;;  %v487_v22 = vld [vmem:[#allocation8 + $0x20] sm:$0xff] }
  0x90   :  { %3605 = vmatprep.subr.bf16.mxu0 %v7274_v8  ;;  %3646 = vmatprep.subr.bf16.mxu1 %v7402_v11  ;;  %v611_v25 = vld [vmem:[#allocation8 + $0x400] sm:$0xff]  ;;  %v7250_v32 = vcombine.high %v483_v21, %v487_v22  ;;  %v7249_v36 = vcombine.low %v483_v21, %v487_v22 }
  0x91   :  { %v615_v26 = vld [vmem:[#allocation8 + $0x420] sm:$0xff] }
  0x92   :  { %v603_v29 = vld [vmem:[#allocation8 + $0x3c0] sm:$0xff]  ;;  %v7378_v35 = vcombine.high %v611_v25, %v615_v26  ;;  %v7377_v39 = vcombine.low %v611_v25, %v615_v26 }
  0x93   :  { %3606 = vmatpush1.bf16.msra.mxu0 %v7273_v12  ;;  %3647 = vmatpush1.bf16.msra.mxu1 %v7401_v15  ;;  %v607_v30 = vld [vmem:[#allocation8 + $0x3e0] sm:$0xff] }
  0x94   :  { %3607 = vmatprep.subr.bf16.mxu0 %v7266_v16  ;;  %3648 = vmatprep.subr.bf16.mxu1 %v7394_v19  ;;  %v731_v33 = vld [vmem:[#allocation8 + $0x7c0] sm:$0xff]  ;;  %v7370_v40 = vcombine.high %v603_v29, %v607_v30  ;;  %v7369_v44 = vcombine.low %v603_v29, %v607_v30 }
  0x95   :  { %v735_v34 = vld [vmem:[#allocation8 + $0x7e0] sm:$0xff] }
  0x96   :  { %v595_v37 = vld [vmem:[#allocation8 + $0x380] sm:$0xff]  ;;  %v7498_v43 = vcombine.high %v731_v33, %v735_v34  ;;  %v7497_v47 = vcombine.low %v731_v33, %v735_v34 }
  0x97   :  { %3608 = vmatpush1.bf16.msra.mxu0 %v7265_v20  ;;  %3649 = vmatpush1.bf16.msra.mxu1 %v7393_v23  ;;  %v599_v38 = vld [vmem:[#allocation8 + $0x3a0] sm:$0xff] }
  0x98   :  { %3609 = vmatprep.subr.bf16.mxu0 %v7258_v24  ;;  %3650 = vmatprep.subr.bf16.mxu1 %v7386_v27  ;;  %v723_v41 = vld [vmem:[#allocation8 + $0x780] sm:$0xff]  ;;  %v7362_v48 = vcombine.high %v595_v37, %v599_v38  ;;  %v7361_v52 = vcombine.low %v595_v37, %v599_v38 }
  0x99   :  { %v727_v42 = vld [vmem:[#allocation8 + $0x7a0] sm:$0xff] }
  0x9a   :  { %v587_v45 = vld [vmem:[#allocation8 + $0x340] sm:$0xff]  ;;  %v7490_v51 = vcombine.high %v723_v41, %v727_v42  ;;  %v7489_v55 = vcombine.low %v723_v41, %v727_v42  ;;  %v163_v42 = vlaneseq }
  0x9b   :  { %3610 = vmatpush1.bf16.msra.mxu0 %v7257_v28  ;;  %3651 = vmatpush1.bf16.msra.mxu1 %v7385_v31  ;;  %v591_v46 = vld [vmem:[#allocation8 + $0x360] sm:$0xff] }
  0x9c   :  { %3611 = vmatprep.subr.bf16.mxu0 %v7250_v32  ;;  %3652 = vmatprep.subr.bf16.mxu1 %v7378_v35  ;;  %v715_v49 = vld [vmem:[#allocation8 + $0x740] sm:$0xff]  ;;  %v7354_v56 = vcombine.high %v587_v45, %v591_v46  ;;  %v7353_v60 = vcombine.low %v587_v45, %v591_v46  ;;  %v8991_v45 = vld [vmem:[#allocation7] sm:$0xff] }
  0x9d   :  { %v719_v50 = vld [vmem:[#allocation8 + $0x760] sm:$0xff] }
  0x9e   :  { %v579_v53 = vld [vmem:[#allocation8 + $0x300] sm:$0xff]  ;;  %v7482_v59 = vcombine.high %v715_v49, %v719_v50  ;;  %v7481_v63 = vcombine.low %v715_v49, %v719_v50 }
  0x9f   :  { %3612 = vmatpush1.bf16.msra.mxu0 %v7249_v36  ;;  %3653 = vmatpush1.bf16.msra.mxu1 %v7377_v39  ;;  %v583_v54 = vld [vmem:[#allocation8 + $0x320] sm:$0xff] }
  0xa0   :  { %3613 = vmatprep.subr.bf16.mxu0 %v7370_v40  ;;  %3654 = vmatprep.subr.bf16.mxu1 %v7498_v43  ;;  %v707_v57 = vld [vmem:[#allocation8 + $0x700] sm:$0xff]  ;;  %v7346_v0 = vcombine.high %v579_v53, %v583_v54  ;;  %v7345_v4 = vcombine.low %v579_v53, %v583_v54  ;;  %v8986_v43 = vshrl.u32 %v163_v42, 7 }
  0xa1   :  { %v711_v58 = vld [vmem:[#allocation8 + $0x720] sm:$0xff] }
  0xa2   :  { %v571_v61 = vld [vmem:[#allocation8 + $0x2c0] sm:$0xff]  ;;  %v7474_v3 = vcombine.high %v707_v57, %v711_v58  ;;  %v7473_v7 = vcombine.low %v707_v57, %v711_v58  ;;  %v8994_v46 = vsub.s32 2, %v8986_v43 }
  0xa3   :  { %3614 = vmatpush2.bf16.msra.mxu0 %v7369_v44  ;;  %3655 = vmatpush2.bf16.msra.mxu1 %v7497_v47  ;;  %v575_v62 = vld [vmem:[#allocation8 + $0x2e0] sm:$0xff]  ;;  %v8989_v44 = vsub.s32 0, %v8986_v43  ;;  %v8997_v47 = vsub.s32 1, %v8986_v43 }
  0xa4   :  { %3615 = vmatprep.subr.bf16.mxu0 %v7362_v48  ;;  %3656 = vmatprep.subr.bf16.mxu1 %v7490_v51  ;;  %v699_v1 = vld [vmem:[#allocation8 + $0x6c0] sm:$0xff]  ;;  %v7338_v8 = vcombine.high %v571_v61, %v575_v62  ;;  %v7337_v12 = vcombine.low %v571_v61, %v575_v62  ;;  %v9000_v48 = vsub.s32 3, %v8986_v43  ;;  %v174_v50 = vrot.slane %v8991_v45, %v8994_v46 }
  0xa5   :  { %v703_v2 = vld [vmem:[#allocation8 + $0x6e0] sm:$0xff]  ;;  %v166_v49 = vrot.slane %v8991_v45, %v8989_v44  ;;  %v170_v51 = vrot.slane %v8991_v45, %v8997_v47  ;;  %v9011_v61 = vsub.s32 5, %v8986_v43 }
  0xa6   :  { %v563_v5 = vld [vmem:[#allocation8 + $0x280] sm:$0xff]  ;;  %v7466_v11 = vcombine.high %v699_v1, %v703_v2  ;;  %v7465_v13 = vcombine.low %v699_v1, %v703_v2  ;;  %v178_v53 = vrot.slane %v8991_v45, %v9000_v48  ;;  %v9014_v1 = vsub.s32 7, %v8986_v43 }
  0xa7   :  { %3616 = vmatpush2.bf16.msra.mxu0 %v7361_v52  ;;  %3657 = vmatpush2.bf16.msra.mxu1 %v7489_v55  ;;  %v567_v6 = vld [vmem:[#allocation8 + $0x2a0] sm:$0xff] }
  0xa8   :  { %3617 = vmatprep.subr.bf16.mxu0 %v7354_v56  ;;  %3658 = vmatprep.subr.bf16.mxu1 %v7482_v59  ;;  %v691_v9 = vld [vmem:[#allocation8 + $0x680] sm:$0xff]  ;;  %v7330_v14 = vcombine.high %v563_v5, %v567_v6  ;;  %v7329_v16 = vcombine.low %v563_v5, %v567_v6 }
  0xa9   :  { %v695_v10 = vld [vmem:[#allocation8 + $0x6a0] sm:$0xff] }
  0xaa   :  { %v7458_v15 = vcombine.high %v691_v9, %v695_v10  ;;  %v7457_v17 = vcombine.low %v691_v9, %v695_v10  ;;  %v555_v18 = vld [vmem:[#allocation8 + $0x240] sm:$0xff] }
  0xab   :  { %3618 = vmatpush2.bf16.msra.mxu0 %v7353_v60  ;;  %3659 = vmatpush2.bf16.msra.mxu1 %v7481_v63  ;;  %v559_v19 = vld [vmem:[#allocation8 + $0x260] sm:$0xff] }
  0xac   :  { %3619 = vmatprep.subr.bf16.mxu0 %v7346_v0  ;;  %3660 = vmatprep.subr.bf16.mxu1 %v7474_v3  ;;  %v683_v20 = vld [vmem:[#allocation8 + $0x640] sm:$0xff]  ;;  %v7322_v21 = vcombine.high %v555_v18, %v559_v19  ;;  %v7321_v23 = vcombine.low %v555_v18, %v559_v19  ;;  %v194_v18 = vrot.slane %v8991_v45, %v9014_v1 }
  0xad   :  { %v687_v22 = vld [vmem:[#allocation8 + $0x660] sm:$0xff] }
  0xae   :  { %v7449_v24 = vcombine.low %v683_v20, %v687_v22  ;;  %v7450_v25 = vcombine.high %v683_v20, %v687_v22  ;;  %v547_v26 = vld [vmem:[#allocation8 + $0x200] sm:$0xff] }
  0xaf   :  { %3620 = vmatpush2.bf16.msra.mxu0 %v7345_v4  ;;  %3661 = vmatpush2.bf16.msra.mxu1 %v7473_v7  ;;  %v551_v27 = vld [vmem:[#allocation8 + $0x220] sm:$0xff] }
  0xb0   :  { %3621 = vmatprep.subr.bf16.mxu0 %v7338_v8  ;;  %3662 = vmatprep.subr.bf16.mxu1 %v7466_v11  ;;  %v675_v28 = vld [vmem:[#allocation8 + $0x600] sm:$0xff]  ;;  %v7314_v29 = vcombine.high %v547_v26, %v551_v27  ;;  %v7313_v31 = vcombine.low %v547_v26, %v551_v27 }
  0xb1   :  { %v679_v30 = vld [vmem:[#allocation8 + $0x620] sm:$0xff] }
  0xb2   :  { %v7441_v32 = vcombine.low %v675_v28, %v679_v30  ;;  %v7442_v33 = vcombine.high %v675_v28, %v679_v30  ;;  %v8970_v34 = vld [vmem:[#allocation8 + $0x9c0] sm:$0xff] }
  0xb3   :  { %3622 = vmatpush2.bf16.msra.mxu0 %v7337_v12  ;;  %3663 = vmatpush2.bf16.msra.mxu1 %v7465_v13  ;;  %v8972_v35 = vld [vmem:[#allocation8 + $0x9e0] sm:$0xff] }
  0xb4   :  { %3623 = vmatprep.subr.bf16.mxu0 %v7330_v14  ;;  %3664 = vmatprep.subr.bf16.mxu1 %v7458_v15  ;;  %v8974_v36 = vld [vmem:[#allocation8 + $0xdc0] sm:$0xff]  ;;  %v7562_v37 = vcombine.high %v8970_v34, %v8972_v35  ;;  %v7561_v39 = vcombine.low %v8970_v34, %v8972_v35  ;;  %v186_v14 = vrot.slane %v8991_v45, %v9011_v61 }
  0xb5   :  { %v8978_v38 = vld [vmem:[#allocation8 + $0xde0] sm:$0xff] }
  0xb6   :  { %v7689_v40 = vcombine.low %v8974_v36, %v8978_v38  ;;  %v7690_v41 = vcombine.high %v8974_v36, %v8978_v38  ;;  %v787_v7 = vld [vmem:[#allocation8 + $0x980] sm:$0xff] }
  0xb7   :  { %3624 = vmatpush2.bf16.msra.mxu0 %v7329_v16  ;;  %3665 = vmatpush2.bf16.msra.mxu1 %v7457_v17  ;;  %v791_v8 = vld [vmem:[#allocation8 + $0x9a0] sm:$0xff] }
  0xb8   :  { %3625 = vmatprep.subr.bf16.mxu0 %v7322_v21  ;;  %3666 = vmatprep.subr.bf16.mxu1 %v7450_v25  ;;  %v915_v12 = vld [vmem:[#allocation8 + $0xd80] sm:$0xff]  ;;  %v7554_v21 = vcombine.high %v787_v7, %v791_v8 }
  0xb9   :  { %v919_v13 = vld [vmem:[#allocation8 + $0xda0] sm:$0xff] }
  0xba   :  { %v779_v25 = vld [vmem:[#allocation8 + $0x940] sm:$0xff] }
  0xbb   :  { %3626 = vmatpush2.bf16.msra.mxu0 %v7321_v23  ;;  %3667 = vmatpush2.bf16.msra.mxu1 %v7449_v24  ;;  %v7682_v24 = vcombine.high %v915_v12, %v919_v13  ;;  %v783_v26 = vld [vmem:[#allocation8 + $0x960] sm:$0xff] }
  0xbc   :  { %3627 = vmatprep.subr.bf16.mxu0 %v7314_v29  ;;  %3668 = vmatprep.subr.bf16.mxu1 %v7442_v33  ;;  %v907_v28 = vld [vmem:[#allocation8 + $0xd40] sm:$0xff]  ;;  %v7546_v42 = vcombine.high %v779_v25, %v783_v26  ;;  %v7545_v36 = vcombine.low %v779_v25, %v783_v26 }
  0xbd   :  { %v911_v29 = vld [vmem:[#allocation8 + $0xd60] sm:$0xff] }
  0xbf   :  { %3628 = vmatpush2.bf16.msra.mxu0 %v7313_v31  ;;  %3669 = vmatpush2.bf16.msra.mxu1 %v7441_v32  ;;  %v7553_v32 = vcombine.low %v787_v7, %v791_v8  ;;  %v755_v7 = vld [vmem:[#allocation8 + $0x880] sm:$0xff] }
  0xc0   :  { %3679 = vmatprep.subr.bf16.mxu0 %v7562_v37  ;;  %3720 = vmatprep.subr.bf16.mxu1 %v7690_v41  ;;  %v7681_v41 = vcombine.low %v915_v12, %v919_v13  ;;  %v759_v8 = vld [vmem:[#allocation8 + $0x8a0] sm:$0xff] }
  0xc1   :  { %v7522_v13 = vcombine.high %v755_v7, %v759_v8  ;;  %v7521_v25 = vcombine.low %v755_v7, %v759_v8  ;;  %v835_v7 = vld [vmem:[#allocation8 + $0xb00] sm:$0xff] }
  0xc2   :  { %v839_v8 = vld [vmem:[#allocation8 + $0xb20] sm:$0xff] }
 0x13a   :  { %v321_v52 = vpop.f32.mrf.mxu0  ;;  %v362_v55 = vpop.f32.mrf.mxu1 }
 0x13b   :  { %v322_v54 = vadd.f32 %v321_v52, %v166_v49  ;;  %v363_v56 = vadd.f32 %v362_v55, %v174_v50  ;;  %v771_v52 = vld [vmem:[#allocation8 + $0x900] sm:$0xff] }
 0x13c   :  { %v323_v57 = vpop.f32.mrf.mxu0  ;;  %v364_v60 = vpop.f32.mrf.mxu1 }
 0x13d   :  { %vm451_vm1 = vcmp.gt.f32.partialorder %v322_v54, 0.0  ;;  %v459_v58 = vmul.f32 0.2, %v322_v54  ;;  %v324_v59 = vadd.f32 %v323_v57, %v170_v51  ;;  %vm453_vm2 = vcmp.gt.f32.partialorder %v363_v56, 0.0 }
 0x13e   :  { %v461_v62 = vmul.f32 0.2, %v363_v56  ;;  %v365_v63 = vadd.f32 %v364_v60, %v178_v53  ;;  %v325_v0 = vpop.f32.mrf.mxu0  ;;  %v366_v3 = vpop.f32.mrf.mxu1  ;;  %v7674_v51 = vcombine.high %v907_v28, %v911_v29  ;;  %v775_v53 = vld [vmem:[#allocation8 + $0x920] sm:$0xff]  ;;  %v7673_v57 = vcombine.low %v907_v28, %v911_v29 }
 0x13f   :  { %vm452_vm3 = vcmp.gt.f32.partialorder %v324_v59, 0.0  ;;  %v460_v2 = vmul.f32 0.2, %v324_v59  ;;  %v467_v4 = vsel %vm451_vm1, %v322_v54, %v459_v58  ;;  %v903_v54 = vld [vmem:[#allocation8 + $0xd20] sm:$0xff]  ;;  %v7538_v58 = vcombine.high %v771_v52, %v775_v53 }
 0x140   :  { %vm454_vm4 = vcmp.gt.f32.partialorder %v365_v63, 0.0  ;;  %v462_v5 = vmul.f32 0.2, %v365_v63  ;;  %v326_v6 = vpop.f32.mrf.mxu0  ;;  %v469_v9 = vsel %vm453_vm2, %v363_v56, %v461_v62  ;;  %v367_v11 = vpop.f32.mrf.mxu1  ;;  %v9024_v19 = vpack.c.bf16 %v467_v4, %v467_v4  ;;  %v763_v62 = vld [vmem:[#allocation8 + $0x8c0] sm:$0xff] }
 0x141   :  { %v468_v10 = vsel %vm452_vm3, %v324_v59, %v460_v2  ;;  %v9030_v23 = vpack.c.bf16 %v469_v9, %v469_v9  ;;  %v891_v0 = vld [vmem:[#allocation8 + $0xcc0] sm:$0xff]  ;;  %v7537_v3 = vcombine.low %v771_v52, %v775_v53 }
 0x142   :  { %v9018_v15 = vpack.c.bf16 %v468_v10, %v468_v10  ;;  %v470_v16 = vsel %vm454_vm4, %v365_v63, %v462_v5  ;;  %v9020_v17 = vpop.f32.mrf.mxu0  ;;  %v9028_v22 = vpop.f32.mrf.mxu1  ;;  %v767_v63 = vld [vmem:[#allocation8 + $0x8e0] sm:$0xff] }
 0x143   :  { %v9026_v20 = vpack.c.bf16 %v470_v16, %v470_v16  ;;  %v895_v2 = vld [vmem:[#allocation8 + $0xce0] sm:$0xff]  ;;  %v7530_v5 = vcombine.high %v763_v62, %v767_v63  ;;  %v7529_v11 = vcombine.low %v763_v62, %v767_v63 }
 0x144   :  { %3629 = vmatprep.mubr.bf16.mxu0 %v9018_v15  ;;  %v405_v27 = vpop.f32.mrf.mxu0  ;;  %v446_v31 = vpop.f32.mrf.mxu1  ;;  %v7658_v6 = vcombine.high %v891_v0, %v895_v2  ;;  %v883_v9 = vld [vmem:[#allocation8 + $0xc80] sm:$0xff]  ;;  %v7657_v12 = vcombine.low %v891_v0, %v895_v2 }
 0x145   :  { %3670 = vmatprep.mubr.bf16.mxu1 %v9026_v20  ;;  %3630 = vmatmul.mubr.bf16.vlgmr.msra.gmra.mxu0 %v9024_v19  ;;  %v406_v30 = vadd.f32 %v405_v27, %v186_v14  ;;  %v447_v37 = vadd.f32 %v446_v31, %v194_v18  ;;  %v887_v10 = vld [vmem:[#allocation8 + $0xca0] sm:$0xff] }
 0x146   :  { %3671 = vmatmul.mubr.bf16.vlgmr.msra.gmra.mxu1 %v9030_v23  ;;  %3680 = vmatpush1.bf16.msra.mxu0 %v7561_v39  ;;  %v407_v33 = vpop.f32.mrf.mxu0  ;;  %v448_v50 = vpop.f32.mrf.mxu1  ;;  %v899_v39 = vld [vmem:[#allocation8 + $0xd00] sm:$0xff]  ;;  %v7650_v14 = vcombine.high %v883_v9, %v887_v10  ;;  %v7649_v26 = vcombine.low %v883_v9, %v887_v10 }
 0x147   :  { %3721 = vmatpush1.bf16.msra.mxu1 %v7689_v40  ;;  %3681 = vmatprep.subr.bf16.mxu0 %v7554_v21  ;;  %vm456_vm5 = vcmp.gt.f32.partialorder %v406_v30, 0.0  ;;  %v464_v49 = vmul.f32 0.2, %v406_v30  ;;  %vm458_vm6 = vcmp.gt.f32.partialorder %v447_v37, 0.0  ;;  %v466_v34 = vmul.f32 0.2, %v447_v37 }
 0x148   :  { %3722 = vmatprep.subr.bf16.mxu1 %v7682_v24  ;;  %v408_v35 = vpop.f32.mrf.mxu0  ;;  %v449_v56 = vpop.f32.mrf.mxu1  ;;  %v7666_v60 = vcombine.high %v899_v39, %v903_v54  ;;  %v7665_v4 = vcombine.low %v899_v39, %v903_v54  ;;  %v747_v16 = vld [vmem:[#allocation8 + $0x840] sm:$0xff] }
 0x149   :  { %v472_v55 = vsel %vm456_vm5, %v406_v30, %v464_v49  ;;  %v474_v40 = vsel %vm458_vm6, %v447_v37, %v466_v34  ;;  %v751_v18 = vld [vmem:[#allocation8 + $0x860] sm:$0xff] }
 0x14a   :  { %3682 = vmatpush1.bf16.msra.mxu0 %v7553_v32  ;;  %v9042_v38 = vpack.c.bf16 %v472_v55, %v472_v55  ;;  %v9044_v59 = vpack.c.bf16 %v474_v40, %v474_v40  ;;  %v875_v21 = vld [vmem:[#allocation8 + $0xc40] sm:$0xff]  ;;  %v7514_v27 = vcombine.high %v747_v16, %v751_v18  ;;  %v7513_v33 = vcombine.low %v747_v16, %v751_v18 }
 0x14b   :  { %3723 = vmatpush1.bf16.msra.mxu1 %v7681_v41  ;;  %3683 = vmatprep.subr.bf16.mxu0 %v7546_v42  ;;  %v879_v24 = vld [vmem:[#allocation8 + $0xc60] sm:$0xff] }
 0x14c   :  { %3724 = vmatprep.subr.bf16.mxu1 %v7674_v51  ;;  %3711 = vmatprep.mubr.bf16.mxu0 %v9042_v38  ;;  %v7642_v28 = vcombine.high %v875_v21, %v879_v24  ;;  %v739_v29 = vld [vmem:[#allocation8 + $0x800] sm:$0xff]  ;;  %v7641_v37 = vcombine.low %v875_v21, %v879_v24 }
 0x14d   :  { %3752 = vmatprep.mubr.bf16.mxu1 %v9044_v59  ;;  %v743_v30 = vld [vmem:[#allocation8 + $0x820] sm:$0xff] }
 0x14e   :  { %3684 = vmatpush1.bf16.msra.mxu0 %v7545_v36  ;;  %v867_v31 = vld [vmem:[#allocation8 + $0xc00] sm:$0xff]  ;;  %v7506_v41 = vcombine.high %v739_v29, %v743_v30  ;;  %v7505_v53 = vcombine.low %v739_v29, %v743_v30 }
 0x14f   :  { %3725 = vmatpush1.bf16.msra.mxu1 %v7673_v57  ;;  %3685 = vmatprep.subr.bf16.mxu0 %v7538_v58  ;;  %v871_v32 = vld [vmem:[#allocation8 + $0xc20] sm:$0xff] }
 0x150   :  { %3726 = vmatprep.subr.bf16.mxu1 %v7666_v60  ;;  %v7634_v42 = vcombine.high %v867_v31, %v871_v32  ;;  %v859_v49 = vld [vmem:[#allocation8 + $0xbc0] sm:$0xff]  ;;  %v7633_v34 = vcombine.low %v867_v31, %v871_v32  ;;  %v9052_v32 = vsub.s32 6, %v8986_v43 }
 0x151   :  { %v863_v50 = vld [vmem:[#allocation8 + $0xbe0] sm:$0xff] }
 0x152   :  { %3686 = vmatpush1.bf16.msra.mxu0 %v7537_v3  ;;  %v987_v51 = vld [vmem:[#allocation8 + $0xfc0] sm:$0xff]  ;;  %v7626_v35 = vcombine.high %v859_v49, %v863_v50  ;;  %v7625_v40 = vcombine.low %v859_v49, %v863_v50 }
 0x153   :  { %3727 = vmatpush1.bf16.msra.mxu1 %v7665_v4  ;;  %3687 = vmatprep.subr.bf16.mxu0 %v7530_v5  ;;  %v991_v52 = vld [vmem:[#allocation8 + $0xfe0] sm:$0xff] }
 0x154   :  { %3728 = vmatprep.subr.bf16.mxu1 %v7658_v6  ;;  %v7754_v39 = vcombine.high %v987_v51, %v991_v52  ;;  %v851_v54 = vld [vmem:[#allocation8 + $0xb80] sm:$0xff]  ;;  %v7753_v57 = vcombine.low %v987_v51, %v991_v52 }
 0x155   :  { %v855_v55 = vld [vmem:[#allocation8 + $0xba0] sm:$0xff] }
 0x156   :  { %3688 = vmatpush1.bf16.msra.mxu0 %v7529_v11  ;;  %v979_v56 = vld [vmem:[#allocation8 + $0xf80] sm:$0xff]  ;;  %v7618_v58 = vcombine.high %v851_v54, %v855_v55  ;;  %v7617_v3 = vcombine.low %v851_v54, %v855_v55 }
 0x157   :  { %3729 = vmatpush1.bf16.msra.mxu1 %v7657_v12  ;;  %3689 = vmatprep.subr.bf16.mxu0 %v7522_v13  ;;  %v983_v36 = vld [vmem:[#allocation8 + $0xfa0] sm:$0xff]  ;;  %v7602_v13 = vcombine.high %v835_v7, %v839_v8 }
 0x158   :  { %3730 = vmatprep.subr.bf16.mxu1 %v7650_v14  ;;  %v7746_v60 = vcombine.high %v979_v56, %v983_v36  ;;  %v843_v62 = vld [vmem:[#allocation8 + $0xb40] sm:$0xff]  ;;  %v7745_v4 = vcombine.low %v979_v56, %v983_v36 }
 0x159   :  { %v847_v63 = vld [vmem:[#allocation8 + $0xb60] sm:$0xff] }
 0x15a   :  { %3690 = vmatpush1.bf16.msra.mxu0 %v7521_v25  ;;  %v971_v0 = vld [vmem:[#allocation8 + $0xf40] sm:$0xff]  ;;  %v7610_v5 = vcombine.high %v843_v62, %v847_v63  ;;  %v7609_v11 = vcombine.low %v843_v62, %v847_v63  ;;  %v7601_v25 = vcombine.low %v835_v7, %v839_v8  ;;  %v668_v7 = vld [vmem:[#allocation8 + $0x5c8] sm:$0xff] }
 0x15b   :  { %3731 = vmatpush1.bf16.msra.mxu1 %v7649_v26  ;;  %3691 = vmatprep.subr.bf16.mxu0 %v7514_v27  ;;  %v975_v2 = vld [vmem:[#allocation8 + $0xf60] sm:$0xff]  ;;  %v672_v8 = vld [vmem:[#allocation8 + $0x5e8] sm:$0xff] }
 0x15c   :  { %3732 = vmatprep.subr.bf16.mxu1 %v7642_v28  ;;  %v7738_v6 = vcombine.high %v971_v0, %v975_v2  ;;  %v963_v9 = vld [vmem:[#allocation8 + $0xf00] sm:$0xff]  ;;  %v7737_v12 = vcombine.low %v971_v0, %v975_v2  ;;  %v9049_v28 = vsub.s32 4, %v8986_v43 }
 0x15d   :  { %v967_v10 = vld [vmem:[#allocation8 + $0xf20] sm:$0xff] }
 0x15e   :  { %3692 = vmatpush1.bf16.msra.mxu0 %v7513_v33  ;;  %v7730_v14 = vcombine.high %v963_v9, %v967_v10  ;;  %v827_v16 = vld [vmem:[#allocation8 + $0xac0] sm:$0xff]  ;;  %v7729_v26 = vcombine.low %v963_v9, %v967_v10  ;;  %v182_v50 = vrot.slane %v8991_v45, %v9049_v28 }
 0x15f   :  { %3733 = vmatpush1.bf16.msra.mxu1 %v7641_v37  ;;  %3693 = vmatprep.subr.bf16.mxu0 %v7506_v41  ;;  %v831_v18 = vld [vmem:[#allocation8 + $0xae0] sm:$0xff] }
 0x160   :  { %3734 = vmatprep.subr.bf16.mxu1 %v7634_v42  ;;  %v955_v21 = vld [vmem:[#allocation8 + $0xec0] sm:$0xff]  ;;  %v7594_v27 = vcombine.high %v827_v16, %v831_v18  ;;  %v7593_v41 = vcombine.low %v827_v16, %v831_v18  ;;  %v404_v36 = vadd.f32 %v9020_v17, %v182_v50  ;;  %v536_v16 = vld [vmem:[#allocation8 + $0x1a8] sm:$0xff] }
 0x161   :  { %v959_v24 = vld [vmem:[#allocation8 + $0xee0] sm:$0xff] }
 0x162   :  { %3694 = vmatpush1.bf16.msra.mxu0 %v7505_v53  ;;  %v7722_v29 = vcombine.high %v955_v21, %v959_v24  ;;  %v819_v30 = vld [vmem:[#allocation8 + $0xa80] sm:$0xff]  ;;  %v7721_v42 = vcombine.low %v955_v21, %v959_v24  ;;  %vm455_vm7 = vcmp.gt.f32.partialorder %v404_v36, 0.0  ;;  %v660_v21 = vld [vmem:[#allocation8 + $0x588] sm:$0xff] }
 0x163   :  { %3735 = vmatpush1.bf16.msra.mxu1 %v7633_v34  ;;  %3695 = vmatprep.subr.bf16.mxu0 %v7626_v35  ;;  %v823_v31 = vld [vmem:[#allocation8 + $0xaa0] sm:$0xff]  ;;  %v190_v34 = vrot.slane %v8991_v45, %v9052_v32  ;;  %v664_v24 = vld [vmem:[#allocation8 + $0x5a8] sm:$0xff] }
 0x164   :  { %3736 = vmatprep.subr.bf16.mxu1 %v7754_v39  ;;  %v947_v33 = vld [vmem:[#allocation8 + $0xe80] sm:$0xff]  ;;  %v7586_v49 = vcombine.high %v819_v30, %v823_v31  ;;  %v7585_v54 = vcombine.low %v819_v30, %v823_v31  ;;  %v524_v30 = vld [vmem:[#allocation8 + $0x148] sm:$0xff] }
 0x165   :  { %v951_v37 = vld [vmem:[#allocation8 + $0xea0] sm:$0xff]  ;;  %v528_v31 = vld [vmem:[#allocation8 + $0x168] sm:$0xff] }
 0x166   :  { %3696 = vmatpush2.bf16.msra.mxu0 %v7625_v40  ;;  %v7714_v51 = vcombine.high %v947_v33, %v951_v37  ;;  %v811_v52 = vld [vmem:[#allocation8 + $0xa40] sm:$0xff]  ;;  %v7713_v55 = vcombine.low %v947_v33, %v951_v37  ;;  %v7428_v33 = vcombine.high %v660_v21, %v664_v24  ;;  %v652_v37 = vld [vmem:[#allocation8 + $0x548] sm:$0xff]  ;;  %v7292_v50 = vcombine.high %v524_v30, %v528_v31 }
 0x167   :  { %3737 = vmatpush2.bf16.msra.mxu1 %v7753_v57  ;;  %3697 = vmatprep.subr.bf16.mxu0 %v7618_v58  ;;  %v815_v53 = vld [vmem:[#allocation8 + $0xa60] sm:$0xff] }
 0x168   :  { %3738 = vmatprep.subr.bf16.mxu1 %v7746_v60  ;;  %v939_v35 = vld [vmem:[#allocation8 + $0xe40] sm:$0xff]  ;;  %v7578_v56 = vcombine.high %v811_v52, %v815_v53  ;;  %v445_v60 = vadd.f32 %v9028_v22, %v190_v34  ;;  %v7577_v45 = vcombine.low %v811_v52, %v815_v53  ;;  %v516_v52 = vld [vmem:[#allocation8 + $0x108] sm:$0xff] }
 0x169   :  { %v943_v39 = vld [vmem:[#allocation8 + $0xe60] sm:$0xff]  ;;  %v520_v53 = vld [vmem:[#allocation8 + $0x128] sm:$0xff] }
 0x16a   :  { %3698 = vmatpush2.bf16.msra.mxu0 %v7617_v3  ;;  %v7706_v40 = vcombine.high %v939_v35, %v943_v39  ;;  %v803_v57 = vld [vmem:[#allocation8 + $0xa00] sm:$0xff]  ;;  %v7705_v0 = vcombine.low %v939_v35, %v943_v39  ;;  %v463_v3 = vmul.f32 0.2, %v404_v36  ;;  %v465_v17 = vmul.f32 0.2, %v445_v60  ;;  %v644_v34 = vld [vmem:[#allocation8 + $0x508] sm:$0xff] }
 0x16b   :  { %3739 = vmatpush2.bf16.msra.mxu1 %v7745_v4  ;;  %3699 = vmatprep.subr.bf16.mxu0 %v7610_v5  ;;  %v807_v58 = vld [vmem:[#allocation8 + $0xa20] sm:$0xff]  ;;  %v540_v5 = vld [vmem:[#allocation8 + $0x1c8] sm:$0xff]  ;;  %vm457_vm8 = vcmp.gt.f32.partialorder %v445_v60, 0.0  ;;  %v7291_v39 = vcombine.low %v524_v30, %v528_v31 }
 0x16c   :  { %3740 = vmatprep.subr.bf16.mxu1 %v7738_v6  ;;  %v931_v62 = vld [vmem:[#allocation8 + $0xe00] sm:$0xff]  ;;  %v7570_v2 = vcombine.high %v803_v57, %v807_v58  ;;  %v544_v6 = vld [vmem:[#allocation8 + $0x1e8] sm:$0xff]  ;;  %v7569_v22 = vcombine.low %v803_v57, %v807_v58 }
 0x16d   :  { %v935_v63 = vld [vmem:[#allocation8 + $0xe20] sm:$0xff]  ;;  %v7308_v10 = vcombine.high %v540_v5, %v544_v6  ;;  %v7307_v18 = vcombine.low %v540_v5, %v544_v6  ;;  %v648_v35 = vld [vmem:[#allocation8 + $0x528] sm:$0xff] }
 0x16e   :  { %3700 = vmatpush2.bf16.msra.mxu0 %v7609_v11  ;;  %v7698_v4 = vcombine.high %v931_v62, %v935_v63  ;;  %v7697_v9 = vcombine.low %v931_v62, %v935_v63  ;;  %v471_v11 = vsel %vm455_vm7, %v404_v36, %v463_v3  ;;  %v508_v36 = vld [vmem:[#allocation8 + $0xc8] sm:$0xff]  ;;  %v7411_v62 = vcombine.low %v644_v34, %v648_v35 }
 0x16f   :  { %3741 = vmatpush2.bf16.msra.mxu1 %v7737_v12  ;;  %3701 = vmatprep.subr.bf16.mxu0 %v7602_v13  ;;  %v7436_v12 = vcombine.high %v668_v7, %v672_v8  ;;  %v473_v13 = vsel %vm457_vm8, %v445_v60, %v465_v17  ;;  %v636_v57 = vld [vmem:[#allocation8 + $0x4c8] sm:$0xff]  ;;  %v7283_v60 = vcombine.low %v516_v52, %v520_v53 }
 0x170   :  { %3742 = vmatprep.subr.bf16.mxu1 %v7730_v14  ;;  %v532_v14 = vld [vmem:[#allocation8 + $0x188] sm:$0xff] }
 0x171   :  { %v640_v58 = vld [vmem:[#allocation8 + $0x4e8] sm:$0xff] }
 0x172   :  { %3702 = vmatpush2.bf16.msra.mxu0 %v7601_v25  ;;  %v9060_v25 = vpack.c.bf16 %v471_v11, %v471_v11  ;;  %v628_v3 = vld [vmem:[#allocation8 + $0x488] sm:$0xff]  ;;  %v7403_v6 = vcombine.low %v636_v57, %v640_v58 }
 0x173   :  { %3743 = vmatpush2.bf16.msra.mxu1 %v7729_v26  ;;  %3703 = vmatprep.subr.bf16.mxu0 %v7594_v27  ;;  %v7435_v26 = vcombine.low %v668_v7, %v672_v8  ;;  %v9062_v27 = vpack.c.bf16 %v473_v13, %v473_v13  ;;  %v492_v8 = vld [vmem:[#allocation8 + $0x48] sm:$0xff] }
 0x174   :  { %3744 = vmatprep.subr.bf16.mxu1 %v7722_v29  ;;  %v7300_v29 = vcombine.high %v532_v14, %v536_v16 }
 0x176   :  { %3704 = vmatpush2.bf16.msra.mxu0 %v7593_v41  ;;  %v656_v41 = vld [vmem:[#allocation8 + $0x568] sm:$0xff] }
 0x177   :  { %3745 = vmatpush2.bf16.msra.mxu1 %v7721_v42  ;;  %3705 = vmatprep.subr.bf16.mxu0 %v7586_v49  ;;  %v7299_v42 = vcombine.low %v532_v14, %v536_v16  ;;  %v7427_v49 = vcombine.low %v660_v21, %v664_v24  ;;  %v484_v16 = vld [vmem:[#allocation8 + $0x8] sm:$0xff] }
 0x178   :  { %3746 = vmatprep.subr.bf16.mxu1 %v7714_v51  ;;  %v7420_v51 = vcombine.high %v652_v37, %v656_v41  ;;  %v612_v21 = vld [vmem:[#allocation8 + $0x408] sm:$0xff] }
 0x179   :  { %v616_v24 = vld [vmem:[#allocation8 + $0x428] sm:$0xff] }
 0x17a   :  { %3706 = vmatpush2.bf16.msra.mxu0 %v7585_v54  ;;  %v7419_v54 = vcombine.low %v652_v37, %v656_v41  ;;  %v7380_v31 = vcombine.high %v612_v21, %v616_v24  ;;  %v608_v37 = vld [vmem:[#allocation8 + $0x3e8] sm:$0xff] }
 0x17b   :  { %3747 = vmatpush2.bf16.msra.mxu1 %v7713_v55  ;;  %3707 = vmatprep.subr.bf16.mxu0 %v7578_v56  ;;  %v7284_v55 = vcombine.high %v516_v52, %v520_v53  ;;  %v7412_v56 = vcombine.high %v644_v34, %v648_v35  ;;  %v732_v41 = vld [vmem:[#allocation8 + $0x7c8] sm:$0xff] }
 0x17c   :  { %3748 = vmatprep.subr.bf16.mxu1 %v7706_v40  ;;  %v512_v40 = vld [vmem:[#allocation8 + $0xe8] sm:$0xff] }
 0x17d   :  { %v7276_v63 = vcombine.high %v508_v36, %v512_v40  ;;  %v7275_v5 = vcombine.low %v508_v36, %v512_v40  ;;  %v596_v53 = vld [vmem:[#allocation8 + $0x388] sm:$0xff] }
 0x17e   :  { %3708 = vmatpush2.bf16.msra.mxu0 %v7577_v45  ;;  %v7404_v45 = vcombine.high %v636_v57, %v640_v58  ;;  %v600_v34 = vld [vmem:[#allocation8 + $0x3a8] sm:$0xff] }
 0x17f   :  { %3749 = vmatpush2.bf16.msra.mxu1 %v7705_v0  ;;  %3709 = vmatprep.subr.bf16.mxu0 %v7570_v2  ;;  %v500_v0 = vld [vmem:[#allocation8 + $0x88] sm:$0xff] }
 0x180   :  { %3750 = vmatprep.subr.bf16.mxu1 %v7698_v4  ;;  %v504_v2 = vld [vmem:[#allocation8 + $0xa8] sm:$0xff] }
 0x181   :  { %v632_v4 = vld [vmem:[#allocation8 + $0x4a8] sm:$0xff]  ;;  %v7268_v17 = vcombine.high %v500_v0, %v504_v2  ;;  %v7267_v11 = vcombine.low %v500_v0, %v504_v2 }
 0x182   :  { %3710 = vmatpush2.bf16.msra.mxu0 %v7569_v22  ;;  %v7396_v7 = vcombine.high %v628_v3, %v632_v4  ;;  %v496_v22 = vld [vmem:[#allocation8 + $0x68] sm:$0xff] }
 0x183   :  { %3751 = vmatpush2.bf16.msra.mxu1 %v7697_v9  ;;  %3761 = vmatprep.subr.bf16.mxu0 %v7308_v10  ;;  %v620_v9 = vld [vmem:[#allocation8 + $0x448] sm:$0xff]  ;;  %v7260_v13 = vcombine.high %v492_v8, %v496_v22 }
 0x184   :  { %3802 = vmatprep.subr.bf16.mxu1 %v7436_v12  ;;  %v624_v10 = vld [vmem:[#allocation8 + $0x468] sm:$0xff]  ;;  %v7395_v12 = vcombine.low %v628_v3, %v632_v4 }
 0x185   :  { %3712 = vmatmul.mubr.bf16.vlgmr.msra.gmra.mxu0 %v9060_v25  ;;  %v7388_v14 = vcombine.high %v620_v9, %v624_v10  ;;  %v724_v35 = vld [vmem:[#allocation8 + $0x788] sm:$0xff] }
 0x186   :  { %3753 = vmatmul.mubr.bf16.vlgmr.msra.gmra.mxu1 %v9062_v27  ;;  %3762 = vmatpush1.bf16.msra.mxu0 %v7307_v18  ;;  %v488_v18 = vld [vmem:[#allocation8 + $0x28] sm:$0xff] }
 0x187   :  { %3793 = vmatprep.mubr.bf16.mxu0 %v9018_v15  ;;  %3803 = vmatpush1.bf16.msra.mxu1 %v7435_v26  ;;  %v7259_v26 = vcombine.low %v492_v8, %v496_v22  ;;  %v7252_v30 = vcombine.high %v484_v16, %v488_v18  ;;  %v588_v40 = vld [vmem:[#allocation8 + $0x348] sm:$0xff] }
 0x188   :  { %3834 = vmatprep.mubr.bf16.mxu1 %v9026_v20  ;;  %3763 = vmatprep.subr.bf16.mxu0 %v7300_v29  ;;  %v7387_v29 = vcombine.low %v620_v9, %v624_v10  ;;  %v592_v57 = vld [vmem:[#allocation8 + $0x368] sm:$0xff] }
 0x189   :  { %3804 = vmatprep.subr.bf16.mxu1 %v7428_v33  ;;  %v604_v33 = vld [vmem:[#allocation8 + $0x3c8] sm:$0xff] }
 0x18a   :  { %3764 = vmatpush1.bf16.msra.mxu0 %v7299_v42  ;;  %v736_v42 = vld [vmem:[#allocation8 + $0x7e8] sm:$0xff] }
 0x18b   :  { %3805 = vmatpush1.bf16.msra.mxu1 %v7427_v49  ;;  %3765 = vmatprep.subr.bf16.mxu0 %v7292_v50  ;;  %v7251_v49 = vcombine.low %v484_v16, %v488_v18  ;;  %v7379_v50 = vcombine.low %v612_v21, %v616_v24  ;;  %v7500_v52 = vcombine.high %v732_v41, %v736_v42  ;;  %v716_v58 = vld [vmem:[#allocation8 + $0x748] sm:$0xff] }
 0x18c   :  { %3806 = vmatprep.subr.bf16.mxu1 %v7420_v51  ;;  %v7372_v51 = vcombine.high %v604_v33, %v608_v37  ;;  %v580_v2 = vld [vmem:[#allocation8 + $0x308] sm:$0xff] }
 0x18d   :  { %v584_v3 = vld [vmem:[#allocation8 + $0x328] sm:$0xff] }
 0x18e   :  { %3766 = vmatpush1.bf16.msra.mxu0 %v7291_v39  ;;  %v728_v39 = vld [vmem:[#allocation8 + $0x7a8] sm:$0xff] }
 0x18f   :  { %3807 = vmatpush1.bf16.msra.mxu1 %v7419_v54  ;;  %3767 = vmatprep.subr.bf16.mxu0 %v7284_v55  ;;  %v7371_v54 = vcombine.low %v604_v33, %v608_v37  ;;  %v7499_v55 = vcombine.low %v732_v41, %v736_v42  ;;  %v7492_v36 = vcombine.high %v724_v35, %v728_v39  ;;  %v708_v4 = vld [vmem:[#allocation8 + $0x708] sm:$0xff] }
 0x190   :  { %3808 = vmatprep.subr.bf16.mxu1 %v7412_v56  ;;  %v7364_v56 = vcombine.high %v596_v53, %v600_v34  ;;  %v572_v22 = vld [vmem:[#allocation8 + $0x2c8] sm:$0xff] }
 0x191   :  { %v576_v9 = vld [vmem:[#allocation8 + $0x2e8] sm:$0xff] }
 0x192   :  { %3768 = vmatpush1.bf16.msra.mxu0 %v7283_v60  ;;  %v720_v60 = vld [vmem:[#allocation8 + $0x768] sm:$0xff] }
 0x193   :  { %3809 = vmatpush1.bf16.msra.mxu1 %v7411_v62  ;;  %3769 = vmatprep.subr.bf16.mxu0 %v7276_v63  ;;  %v7363_v62 = vcombine.low %v596_v53, %v600_v34  ;;  %v7491_v63 = vcombine.low %v724_v35, %v728_v39  ;;  %v7484_v0 = vcombine.high %v716_v58, %v720_v60  ;;  %v700_v10 = vld [vmem:[#allocation8 + $0x6c8] sm:$0xff] }
 0x194   :  { %3810 = vmatprep.subr.bf16.mxu1 %v7404_v45  ;;  %v7356_v45 = vcombine.high %v588_v40, %v592_v57  ;;  %v564_v18 = vld [vmem:[#allocation8 + $0x288] sm:$0xff] }
 0x195   :  { %v568_v21 = vld [vmem:[#allocation8 + $0x2a8] sm:$0xff] }
 0x196   :  { %3770 = vmatpush1.bf16.msra.mxu0 %v7275_v5  ;;  %v712_v5 = vld [vmem:[#allocation8 + $0x728] sm:$0xff] }
 0x197   :  { %3811 = vmatpush1.bf16.msra.mxu1 %v7403_v6  ;;  %3771 = vmatprep.subr.bf16.mxu0 %v7268_v17  ;;  %v7355_v6 = vcombine.low %v588_v40, %v592_v57  ;;  %v7483_v17 = vcombine.low %v716_v58, %v720_v60  ;;  %v7476_v8 = vcombine.high %v708_v4, %v712_v5  ;;  %v692_v24 = vld [vmem:[#allocation8 + $0x688] sm:$0xff] }
 0x198   :  { %3812 = vmatprep.subr.bf16.mxu1 %v7396_v7  ;;  %v7348_v7 = vcombine.high %v580_v2, %v584_v3  ;;  %v556_v37 = vld [vmem:[#allocation8 + $0x248] sm:$0xff] }
 0x199   :  { %v560_v41 = vld [vmem:[#allocation8 + $0x268] sm:$0xff] }
 0x19a   :  { %3772 = vmatpush1.bf16.msra.mxu0 %v7267_v11  ;;  %v704_v11 = vld [vmem:[#allocation8 + $0x6e8] sm:$0xff] }
 0x19b   :  { %3813 = vmatpush1.bf16.msra.mxu1 %v7395_v12  ;;  %3773 = vmatprep.subr.bf16.mxu0 %v7260_v13  ;;  %v7347_v12 = vcombine.low %v580_v2, %v584_v3  ;;  %v7475_v13 = vcombine.low %v708_v4, %v712_v5  ;;  %v7468_v16 = vcombine.high %v700_v10, %v704_v11  ;;  %v684_v42 = vld [vmem:[#allocation8 + $0x648] sm:$0xff] }
 0x19c   :  { %3814 = vmatprep.subr.bf16.mxu1 %v7388_v14  ;;  %v7340_v14 = vcombine.high %v572_v22, %v576_v9  ;;  %v548_v34 = vld [vmem:[#allocation8 + $0x208] sm:$0xff] }
 0x19d   :  { %v552_v35 = vld [vmem:[#allocation8 + $0x228] sm:$0xff] }
 0x19e   :  { %3774 = vmatpush1.bf16.msra.mxu0 %v7259_v26  ;;  %v696_v26 = vld [vmem:[#allocation8 + $0x6a8] sm:$0xff] }
 0x19f   :  { %3815 = vmatpush1.bf16.msra.mxu1 %v7387_v29  ;;  %3775 = vmatprep.subr.bf16.mxu0 %v7252_v30  ;;  %v7339_v29 = vcombine.low %v572_v22, %v576_v9  ;;  %v7467_v30 = vcombine.low %v700_v10, %v704_v11  ;;  %v7460_v33 = vcombine.high %v692_v24, %v696_v26  ;;  %v676_v39 = vld [vmem:[#allocation8 + $0x608] sm:$0xff] }
 0x1a0   :  { %3816 = vmatprep.subr.bf16.mxu1 %v7380_v31  ;;  %v7332_v31 = vcombine.high %v564_v18, %v568_v21  ;;  %v796_v57 = vld [vmem:[#allocation8 + $0x9c8] sm:$0xff] }
 0x1a1   :  { %v800_v58 = vld [vmem:[#allocation8 + $0x9e8] sm:$0xff] }
 0x1a2   :  { %3776 = vmatpush1.bf16.msra.mxu0 %v7251_v49  ;;  %v688_v49 = vld [vmem:[#allocation8 + $0x668] sm:$0xff]  ;;  %v7563_v5 = vcombine.low %v796_v57, %v800_v58 }
 0x1a3   :  { %3817 = vmatpush1.bf16.msra.mxu1 %v7379_v50  ;;  %3777 = vmatprep.subr.bf16.mxu0 %v7372_v51  ;;  %v7331_v50 = vcombine.low %v564_v18, %v568_v21  ;;  %v7459_v51 = vcombine.low %v692_v24, %v696_v26  ;;  %v7452_v53 = vcombine.high %v684_v42, %v688_v49  ;;  %v924_v60 = vld [vmem:[#allocation8 + $0xdc8] sm:$0xff] }
 0x1a4   :  { %3818 = vmatprep.subr.bf16.mxu1 %v7500_v52  ;;  %v7324_v52 = vcombine.high %v556_v37, %v560_v41  ;;  %v788_v3 = vld [vmem:[#allocation8 + $0x988] sm:$0xff] }
 0x1a5   :  { %v792_v4 = vld [vmem:[#allocation8 + $0x9a8] sm:$0xff] }
 0x1a6   :  { %3778 = vmatpush2.bf16.msra.mxu0 %v7371_v54  ;;  %v680_v54 = vld [vmem:[#allocation8 + $0x628] sm:$0xff] }
 0x1a7   :  { %3819 = vmatpush2.bf16.msra.mxu1 %v7499_v55  ;;  %3779 = vmatprep.subr.bf16.mxu0 %v7364_v56  ;;  %v7323_v55 = vcombine.low %v556_v37, %v560_v41  ;;  %v7451_v56 = vcombine.low %v684_v42, %v688_v49  ;;  %v7444_v40 = vcombine.high %v676_v39, %v680_v54  ;;  %v780_v22 = vld [vmem:[#allocation8 + $0x948] sm:$0xff] }
 0x1a8   :  { %3820 = vmatprep.subr.bf16.mxu1 %v7492_v36  ;;  %v7316_v36 = vcombine.high %v548_v34, %v552_v35  ;;  %v784_v9 = vld [vmem:[#allocation8 + $0x968] sm:$0xff] }
 0x1a9   :  { %v908_v11 = vld [vmem:[#allocation8 + $0xd48] sm:$0xff] }
 0x1aa   :  { %3780 = vmatpush2.bf16.msra.mxu0 %v7363_v62  ;;  %v928_v62 = vld [vmem:[#allocation8 + $0xde8] sm:$0xff] }
 0x1ab   :  { %3821 = vmatpush2.bf16.msra.mxu1 %v7491_v63  ;;  %3781 = vmatprep.subr.bf16.mxu0 %v7356_v45  ;;  %v7315_v63 = vcombine.low %v548_v34, %v552_v35  ;;  %v7443_v45 = vcombine.low %v676_v39, %v680_v54  ;;  %v7692_v2 = vcombine.high %v924_v60, %v928_v62  ;;  %v772_v21 = vld [vmem:[#allocation8 + $0x908] sm:$0xff] }
 0x1ac   :  { %3822 = vmatprep.subr.bf16.mxu1 %v7484_v0  ;;  %v7564_v0 = vcombine.high %v796_v57, %v800_v58  ;;  %v776_v24 = vld [vmem:[#allocation8 + $0x928] sm:$0xff] }
 0x1ad   :  { %v900_v26 = vld [vmem:[#allocation8 + $0xd08] sm:$0xff] }
 0x1ae   :  { %3782 = vmatpush2.bf16.msra.mxu0 %v7355_v6  ;;  %v916_v6 = vld [vmem:[#allocation8 + $0xd88] sm:$0xff] }
 0x1af   :  { %3823 = vmatpush2.bf16.msra.mxu1 %v7483_v17  ;;  %3783 = vmatprep.subr.bf16.mxu0 %v7348_v7  ;;  %v920_v17 = vld [vmem:[#allocation8 + $0xda8] sm:$0xff]  ;;  %v7691_v7 = vcombine.low %v924_v60, %v928_v62 }
 0x1b0   :  { %3824 = vmatprep.subr.bf16.mxu1 %v7476_v8  ;;  %v7556_v8 = vcombine.high %v788_v3, %v792_v4  ;;  %v7684_v10 = vcombine.high %v916_v6, %v920_v17  ;;  %v764_v41 = vld [vmem:[#allocation8 + $0x8c8] sm:$0xff] }
 0x1b1   :  { %v768_v42 = vld [vmem:[#allocation8 + $0x8e8] sm:$0xff] }
 0x1b2   :  { %3784 = vmatpush2.bf16.msra.mxu0 %v7347_v12  ;;  %v912_v12 = vld [vmem:[#allocation8 + $0xd68] sm:$0xff] }
 0x1b3   :  { %3825 = vmatpush2.bf16.msra.mxu1 %v7475_v13  ;;  %3785 = vmatprep.subr.bf16.mxu0 %v7340_v14  ;;  %v7555_v13 = vcombine.low %v788_v3, %v792_v4  ;;  %v7683_v14 = vcombine.low %v916_v6, %v920_v17  ;;  %v7676_v18 = vcombine.high %v908_v11, %v912_v12  ;;  %v892_v49 = vld [vmem:[#allocation8 + $0xcc8] sm:$0xff] }
 0x1b4   :  { %3826 = vmatprep.subr.bf16.mxu1 %v7468_v16  ;;  %v7548_v16 = vcombine.high %v780_v22, %v784_v9  ;;  %v756_v35 = vld [vmem:[#allocation8 + $0x888] sm:$0xff] }
 0x1b5   :  { %v760_v39 = vld [vmem:[#allocation8 + $0x8a8] sm:$0xff] }
 0x1b6   :  { %3786 = vmatpush2.bf16.msra.mxu0 %v7339_v29  ;;  %v904_v29 = vld [vmem:[#allocation8 + $0xd28] sm:$0xff] }
 0x1b7   :  { %3827 = vmatpush2.bf16.msra.mxu1 %v7467_v30  ;;  %3787 = vmatprep.subr.bf16.mxu0 %v7332_v31  ;;  %v7547_v30 = vcombine.low %v780_v22, %v784_v9  ;;  %v7675_v31 = vcombine.low %v908_v11, %v912_v12  ;;  %v7668_v37 = vcombine.high %v900_v26, %v904_v29  ;;  %v884_v54 = vld [vmem:[#allocation8 + $0xc88] sm:$0xff] }
 0x1b8   :  { %3828 = vmatprep.subr.bf16.mxu1 %v7460_v33  ;;  %v7540_v33 = vcombine.high %v772_v21, %v776_v24  ;;  %v748_v58 = vld [vmem:[#allocation8 + $0x848] sm:$0xff] }
 0x1b9   :  { %v752_v60 = vld [vmem:[#allocation8 + $0x868] sm:$0xff] }
 0x1ba   :  { %3788 = vmatpush2.bf16.msra.mxu0 %v7331_v50  ;;  %v896_v50 = vld [vmem:[#allocation8 + $0xce8] sm:$0xff] }
 0x1bb   :  { %3829 = vmatpush2.bf16.msra.mxu1 %v7459_v51  ;;  %3789 = vmatprep.subr.bf16.mxu0 %v7324_v52  ;;  %v7539_v51 = vcombine.low %v772_v21, %v776_v24  ;;  %v7667_v52 = vcombine.low %v900_v26, %v904_v29  ;;  %v7660_v34 = vcombine.high %v892_v49, %v896_v50  ;;  %v876_v62 = vld [vmem:[#allocation8 + $0xc48] sm:$0xff] }
 0x1bc   :  { %3830 = vmatprep.subr.bf16.mxu1 %v7452_v53  ;;  %v7532_v53 = vcombine.high %v764_v41, %v768_v42  ;;  %v740_v4 = vld [vmem:[#allocation8 + $0x808] sm:$0xff] }
 0x1bd   :  { %v868_v6 = vld [vmem:[#allocation8 + $0xc08] sm:$0xff] }
 0x1be   :  { %3790 = vmatpush2.bf16.msra.mxu0 %v7323_v55  ;;  %v888_v55 = vld [vmem:[#allocation8 + $0xca8] sm:$0xff] }
 0x1bf   :  { %3831 = vmatpush2.bf16.msra.mxu1 %v7451_v56  ;;  %3791 = vmatprep.subr.bf16.mxu0 %v7316_v36  ;;  %v7531_v56 = vcombine.low %v764_v41, %v768_v42  ;;  %v7659_v36 = vcombine.low %v892_v49, %v896_v50  ;;  %v7652_v57 = vcombine.high %v884_v54, %v888_v55  ;;  %v872_v17 = vld [vmem:[#allocation8 + $0xc28] sm:$0xff] }
 0x1c0   :  { %3832 = vmatprep.subr.bf16.mxu1 %v7444_v40  ;;  %v7524_v40 = vcombine.high %v756_v35, %v760_v39  ;;  %v7636_v9 = vcombine.high %v868_v6, %v872_v17  ;;  %v864_v11 = vld [vmem:[#allocation8 + $0xbe8] sm:$0xff] }
 0x1c1   :  { %v988_v12 = vld [vmem:[#allocation8 + $0xfc8] sm:$0xff] }
 0x1c2   :  { %3792 = vmatpush2.bf16.msra.mxu0 %v7315_v63  ;;  %v880_v63 = vld [vmem:[#allocation8 + $0xc68] sm:$0xff] }
 0x1c3   :  { %3833 = vmatpush2.bf16.msra.mxu1 %v7443_v45  ;;  %3843 = vmatprep.subr.bf16.mxu0 %v7564_v0  ;;  %v7523_v45 = vcombine.low %v756_v35, %v760_v39  ;;  %v7651_v0 = vcombine.low %v884_v54, %v888_v55  ;;  %v7644_v3 = vcombine.high %v876_v62, %v880_v63  ;;  %v852_v24 = vld [vmem:[#allocation8 + $0xb88] sm:$0xff] }
 0x1c4   :  { %3884 = vmatprep.subr.bf16.mxu1 %v7692_v2  ;;  %v7516_v2 = vcombine.high %v748_v58, %v752_v60  ;;  %v856_v26 = vld [vmem:[#allocation8 + $0xba8] sm:$0xff] }
 0x1c5   :  { %3794 = vmatmul.mubr.bf16.vlgmr.msra.gmra.mxu0 %v9024_v19  ;;  %v980_v29 = vld [vmem:[#allocation8 + $0xf88] sm:$0xff] }
 0x1c6   :  { %3835 = vmatmul.mubr.bf16.vlgmr.msra.gmra.mxu1 %v9030_v23  ;;  %3844 = vmatpush1.bf16.msra.mxu0 %v7563_v5  ;;  %v744_v5 = vld [vmem:[#allocation8 + $0x828] sm:$0xff] }
 0x1c7   :  { %3875 = vmatprep.mubr.bf16.mxu0 %v9042_v38  ;;  %3885 = vmatpush1.bf16.msra.mxu1 %v7691_v7  ;;  %v7515_v7 = vcombine.low %v748_v58, %v752_v60  ;;  %v7508_v22 = vcombine.high %v740_v4, %v744_v5  ;;  %v844_v42 = vld [vmem:[#allocation8 + $0xb48] sm:$0xff] }
 0x1c8   :  { %3916 = vmatprep.mubr.bf16.mxu1 %v9044_v59  ;;  %3845 = vmatprep.subr.bf16.mxu0 %v7556_v8  ;;  %v7643_v8 = vcombine.low %v876_v62, %v880_v63  ;;  %v848_v49 = vld [vmem:[#allocation8 + $0xb68] sm:$0xff] }
 0x1c9   :  { %3886 = vmatprep.subr.bf16.mxu1 %v7684_v10  ;;  %v860_v10 = vld [vmem:[#allocation8 + $0xbc8] sm:$0xff] }
 0x1ca   :  { %3846 = vmatpush1.bf16.msra.mxu0 %v7555_v13  ;;  %v992_v13 = vld [vmem:[#allocation8 + $0xfe8] sm:$0xff] }
 0x1cb   :  { %3887 = vmatpush1.bf16.msra.mxu1 %v7683_v14  ;;  %3847 = vmatprep.subr.bf16.mxu0 %v7548_v16  ;;  %v7507_v14 = vcombine.low %v740_v4, %v744_v5  ;;  %v7635_v16 = vcombine.low %v868_v6, %v872_v17  ;;  %v7756_v21 = vcombine.high %v988_v12, %v992_v13  ;;  %v972_v50 = vld [vmem:[#allocation8 + $0xf48] sm:$0xff] }
 0x1cc   :  { %3888 = vmatprep.subr.bf16.mxu1 %v7676_v18  ;;  %v7628_v18 = vcombine.high %v860_v10, %v864_v11  ;;  %v836_v39 = vld [vmem:[#allocation8 + $0xb08] sm:$0xff] }
 0x1cd   :  { %v840_v54 = vld [vmem:[#allocation8 + $0xb28] sm:$0xff] }
 0x1ce   :  { %3848 = vmatpush1.bf16.msra.mxu0 %v7547_v30  ;;  %v984_v30 = vld [vmem:[#allocation8 + $0xfa8] sm:$0xff] }
 0x1cf   :  { %3889 = vmatpush1.bf16.msra.mxu1 %v7675_v31  ;;  %3849 = vmatprep.subr.bf16.mxu0 %v7540_v33  ;;  %v7627_v31 = vcombine.low %v860_v10, %v864_v11  ;;  %v7755_v33 = vcombine.low %v988_v12, %v992_v13  ;;  %v7748_v41 = vcombine.high %v980_v29, %v984_v30  ;;  %v964_v55 = vld [vmem:[#allocation8 + $0xf08] sm:$0xff] }
 0x1d0   :  { %3890 = vmatprep.subr.bf16.mxu1 %v7668_v37  ;;  %v7620_v37 = vcombine.high %v852_v24, %v856_v26  ;;  %v828_v60 = vld [vmem:[#allocation8 + $0xac8] sm:$0xff] }
 0x1d1   :  { %v832_v62 = vld [vmem:[#allocation8 + $0xae8] sm:$0xff] }
 0x1d2   :  { %3850 = vmatpush1.bf16.msra.mxu0 %v7539_v51  ;;  %v976_v51 = vld [vmem:[#allocation8 + $0xf68] sm:$0xff] }
 0x1d3   :  { %3891 = vmatpush1.bf16.msra.mxu1 %v7667_v52  ;;  %3851 = vmatprep.subr.bf16.mxu0 %v7532_v53  ;;  %v7619_v52 = vcombine.low %v852_v24, %v856_v26  ;;  %v7747_v53 = vcombine.low %v980_v29, %v984_v30  ;;  %v7740_v35 = vcombine.high %v972_v50, %v976_v51  ;;  %v956_v63 = vld [vmem:[#allocation8 + $0xec8] sm:$0xff] }
 0x1d4   :  { %3892 = vmatprep.subr.bf16.mxu1 %v7660_v34  ;;  %v7612_v34 = vcombine.high %v844_v42, %v848_v49  ;;  %v820_v5 = vld [vmem:[#allocation8 + $0xa88] sm:$0xff] }
 0x1d5   :  { %v824_v6 = vld [vmem:[#allocation8 + $0xaa8] sm:$0xff] }
 0x1d6   :  { %3852 = vmatpush1.bf16.msra.mxu0 %v7531_v56  ;;  %v968_v56 = vld [vmem:[#allocation8 + $0xf28] sm:$0xff] }
 0x1d7   :  { %3893 = vmatpush1.bf16.msra.mxu1 %v7659_v36  ;;  %3853 = vmatprep.subr.bf16.mxu0 %v7524_v40  ;;  %v7611_v36 = vcombine.low %v844_v42, %v848_v49  ;;  %v7739_v40 = vcombine.low %v972_v50, %v976_v51  ;;  %v7732_v58 = vcombine.high %v964_v55, %v968_v56  ;;  %v948_v17 = vld [vmem:[#allocation8 + $0xe88] sm:$0xff]  ;;  %v541_v49 = vld [vmem:[#allocation8 + $0x1d0] sm:$0xff] }
 0x1d8   :  { %3894 = vmatprep.subr.bf16.mxu1 %v7652_v57  ;;  %v7604_v57 = vcombine.high %v836_v39, %v840_v54  ;;  %v812_v11 = vld [vmem:[#allocation8 + $0xa48] sm:$0xff]  ;;  %v545_v50 = vld [vmem:[#allocation8 + $0x1f0] sm:$0xff] }
 0x1d9   :  { %v816_v12 = vld [vmem:[#allocation8 + $0xa68] sm:$0xff]  ;;  %v669_v51 = vld [vmem:[#allocation8 + $0x5d0] sm:$0xff] }
 0x1da   :  { %3854 = vmatpush1.bf16.msra.mxu0 %v7523_v45  ;;  %v960_v45 = vld [vmem:[#allocation8 + $0xee8] sm:$0xff] }
 0x1db   :  { %3895 = vmatpush1.bf16.msra.mxu1 %v7651_v0  ;;  %3855 = vmatprep.subr.bf16.mxu0 %v7516_v2  ;;  %v7603_v0 = vcombine.low %v836_v39, %v840_v54  ;;  %v7731_v2 = vcombine.low %v964_v55, %v968_v56  ;;  %v7724_v4 = vcombine.high %v956_v63, %v960_v45  ;;  %v940_v13 = vld [vmem:[#allocation8 + $0xe48] sm:$0xff]  ;;  %v9072_v39 = vld [vmem:[#allocation10] sm:$0xff]  ;;  %v533_v55 = vld [vmem:[#allocation8 + $0x190] sm:$0xff] }
 0x1dc   :  { %3896 = vmatprep.subr.bf16.mxu1 %v7644_v3  ;;  %v7596_v3 = vcombine.high %v828_v60, %v832_v62  ;;  %v804_v26 = vld [vmem:[#allocation8 + $0xa08] sm:$0xff]  ;;  %v537_v56 = vld [vmem:[#allocation8 + $0x1b0] sm:$0xff] }
 0x1dd   :  { %v808_v29 = vld [vmem:[#allocation8 + $0xa28] sm:$0xff] }
 0x1de   :  { %3856 = vmatpush1.bf16.msra.mxu0 %v7515_v7  ;;  %v952_v7 = vld [vmem:[#allocation8 + $0xea8] sm:$0xff] }
 0x1df   :  { %3897 = vmatpush1.bf16.msra.mxu1 %v7643_v8  ;;  %3857 = vmatprep.subr.bf16.mxu0 %v7508_v22  ;;  %v7595_v8 = vcombine.low %v828_v60, %v832_v62  ;;  %v7723_v22 = vcombine.low %v956_v63, %v960_v45  ;;  %v7716_v10 = vcombine.high %v948_v17, %v952_v7  ;;  %v932_v30 = vld [vmem:[#allocation8 + $0xe08] sm:$0xff]  ;;  %v525_v45 = vld [vmem:[#allocation8 + $0x150] sm:$0xff] }
 0x1e0   :  { %3898 = vmatprep.subr.bf16.mxu1 %v7636_v9  ;;  %v7588_v9 = vcombine.high %v820_v5, %v824_v6  ;;  %v1004_v62 = vrot.slane %v9072_v39, %v8997_v47  ;;  %v7302_v63 = vcombine.high %v533_v55, %v537_v56 }
 0x1e2   :  { %3858 = vmatpush1.bf16.msra.mxu0 %v7507_v14  ;;  %v944_v14 = vld [vmem:[#allocation8 + $0xe68] sm:$0xff] }
 0x1e3   :  { %3899 = vmatpush1.bf16.msra.mxu1 %v7635_v16  ;;  %3859 = vmatprep.subr.bf16.mxu0 %v7628_v18  ;;  %v7587_v16 = vcombine.low %v820_v5, %v824_v6  ;;  %v7715_v18 = vcombine.low %v948_v17, %v952_v7  ;;  %v7708_v24 = vcombine.high %v940_v13, %v944_v14  ;;  %v657_v5 = vld [vmem:[#allocation8 + $0x570] sm:$0xff] }
 0x1e4   :  { %3900 = vmatprep.subr.bf16.mxu1 %v7756_v21  ;;  %v7580_v21 = vcombine.high %v812_v11, %v816_v12  ;;  %v7301_v7 = vcombine.low %v533_v55, %v537_v56  ;;  %v501_v55 = vld [vmem:[#allocation8 + $0x90] sm:$0xff] }
 0x1e5   :  { %v505_v56 = vld [vmem:[#allocation8 + $0xb0] sm:$0xff] }
 0x1e6   :  { %3860 = vmatpush2.bf16.msra.mxu0 %v7627_v31  ;;  %v936_v31 = vld [vmem:[#allocation8 + $0xe28] sm:$0xff] }
 0x1e7   :  { %3901 = vmatpush2.bf16.msra.mxu1 %v7755_v33  ;;  %3861 = vmatprep.subr.bf16.mxu0 %v7620_v37  ;;  %v7579_v33 = vcombine.low %v812_v11, %v816_v12  ;;  %v7707_v37 = vcombine.low %v940_v13, %v944_v14  ;;  %v7700_v42 = vcombine.high %v932_v30, %v936_v31  ;;  %v517_v14 = vld [vmem:[#allocation8 + $0x110] sm:$0xff] }
 0x1e8   :  { %3902 = vmatprep.subr.bf16.mxu1 %v7748_v41  ;;  %v7572_v41 = vcombine.high %v804_v26, %v808_v29 }
 0x1ea   :  { %3862 = vmatpush2.bf16.msra.mxu0 %v7619_v52  ;;  %v673_v52 = vld [vmem:[#allocation8 + $0x5f0] sm:$0xff] }
 0x1eb   :  { %3903 = vmatpush2.bf16.msra.mxu1 %v7747_v53  ;;  %3863 = vmatprep.subr.bf16.mxu0 %v7612_v34  ;;  %v7571_v53 = vcombine.low %v804_v26, %v808_v29  ;;  %v7699_v34 = vcombine.low %v932_v30, %v936_v31  ;;  %v7438_v54 = vcombine.high %v669_v51, %v673_v52 }
 0x1ec   :  { %3904 = vmatprep.subr.bf16.mxu1 %v7740_v35  ;;  %v7310_v35 = vcombine.high %v541_v49, %v545_v50  ;;  %v7437_v60 = vcombine.low %v669_v51, %v673_v52  ;;  %v637_v51 = vld [vmem:[#allocation8 + $0x4d0] sm:$0xff] }
 0x1ed   :  { %v641_v52 = vld [vmem:[#allocation8 + $0x4f0] sm:$0xff] }
 0x1ee   :  { %3864 = vmatpush2.bf16.msra.mxu0 %v7611_v36  ;;  %v7309_v36 = vcombine.low %v541_v49, %v545_v50  ;;  %v509_v49 = vld [vmem:[#allocation8 + $0xd0] sm:$0xff] }
 0x1ef   :  { %3905 = vmatpush2.bf16.msra.mxu1 %v7739_v40  ;;  %3865 = vmatprep.subr.bf16.mxu0 %v7604_v57  ;;  %v1000_v40 = vrot.slane %v9072_v39, %v8989_v44  ;;  %v661_v57 = vld [vmem:[#allocation8 + $0x590] sm:$0xff] }
 0x1f0   :  { %3906 = vmatprep.subr.bf16.mxu1 %v7732_v58  ;;  %v665_v58 = vld [vmem:[#allocation8 + $0x5b0] sm:$0xff] }
 0x1f1   :  { %v513_v50 = vld [vmem:[#allocation8 + $0xf0] sm:$0xff] }
 0x1f2   :  { %3866 = vmatpush2.bf16.msra.mxu0 %v7603_v0  ;;  %v529_v0 = vld [vmem:[#allocation8 + $0x170] sm:$0xff] }
 0x1f3   :  { %3907 = vmatpush2.bf16.msra.mxu1 %v7731_v2  ;;  %3867 = vmatprep.subr.bf16.mxu0 %v7596_v3  ;;  %v7430_v3 = vcombine.high %v661_v57, %v665_v58  ;;  %v7293_v30 = vcombine.low %v525_v45, %v529_v0 }
 0x1f4   :  { %3908 = vmatprep.subr.bf16.mxu1 %v7724_v4  ;;  %v653_v4 = vld [vmem:[#allocation8 + $0x550] sm:$0xff] }
 0x1f5   :  { %v7422_v13 = vcombine.high %v653_v4, %v657_v5 }
 0x1f6   :  { %3868 = vmatpush2.bf16.msra.mxu0 %v7595_v8 }
 0x1f7   :  { %3909 = vmatpush2.bf16.msra.mxu1 %v7723_v22  ;;  %3869 = vmatprep.subr.bf16.mxu0 %v7588_v9  ;;  %v7429_v22 = vcombine.low %v661_v57, %v665_v58  ;;  %v7294_v9 = vcombine.high %v525_v45, %v529_v0  ;;  %v7277_v57 = vcombine.low %v509_v49, %v513_v50  ;;  %v497_v45 = vld [vmem:[#allocation8 + $0x70] sm:$0xff] }
 0x1f8   :  { %3910 = vmatprep.subr.bf16.mxu1 %v7716_v10  ;;  %v7405_v58 = vcombine.low %v637_v51, %v641_v52  ;;  %v621_v0 = vld [vmem:[#allocation8 + $0x450] sm:$0xff] }
 0x1fa   :  { %3870 = vmatpush2.bf16.msra.mxu0 %v7587_v16  ;;  %v521_v16 = vld [vmem:[#allocation8 + $0x130] sm:$0xff] }
 0x1fb   :  { %3911 = vmatpush2.bf16.msra.mxu1 %v7715_v18  ;;  %3871 = vmatprep.subr.bf16.mxu0 %v7580_v21  ;;  %v645_v21 = vld [vmem:[#allocation8 + $0x510] sm:$0xff] }
 0x1fc   :  { %3912 = vmatprep.subr.bf16.mxu1 %v7708_v24  ;;  %v649_v24 = vld [vmem:[#allocation8 + $0x530] sm:$0xff] }
 0x1fe   :  { %3872 = vmatpush2.bf16.msra.mxu0 %v7579_v33  ;;  %v7421_v33 = vcombine.low %v653_v4, %v657_v5 }
 0x1ff   :  { %3913 = vmatpush2.bf16.msra.mxu1 %v7707_v37  ;;  %3873 = vmatprep.subr.bf16.mxu0 %v7572_v41  ;;  %v7286_v37 = vcombine.high %v517_v14, %v521_v16 }
 0x200   :  { %3914 = vmatprep.subr.bf16.mxu1 %v7700_v42  ;;  %v7414_v42 = vcombine.high %v645_v21, %v649_v24 }
 0x202   :  { %3874 = vmatpush2.bf16.msra.mxu0 %v7571_v53  ;;  %v7285_v53 = vcombine.low %v517_v14, %v521_v16  ;;  %v605_v14 = vld [vmem:[#allocation8 + $0x3d0] sm:$0xff] }
 0x203   :  { %3915 = vmatpush2.bf16.msra.mxu1 %v7699_v34  ;;  %3925 = vmatprep.subr.bf16.mxu0 %v7310_v35  ;;  %v7413_v34 = vcombine.low %v645_v21, %v649_v24  ;;  %v7278_v35 = vcombine.high %v509_v49, %v513_v50  ;;  %v609_v16 = vld [vmem:[#allocation8 + $0x3f0] sm:$0xff] }
 0x204   :  { %3966 = vmatprep.subr.bf16.mxu1 %v7438_v54  ;;  %v7406_v54 = vcombine.high %v637_v51, %v641_v52  ;;  %v737_v21 = vld [vmem:[#allocation8 + $0x7f0] sm:$0xff]  ;;  %v7373_v49 = vcombine.low %v605_v14, %v609_v16 }
 0x205   :  { %3876 = vmatmul.mubr.bf16.vlgmr.msra.gmra.mxu0 %v9060_v25  ;;  %v3631_v2 = vpop.f32.mrf.mxu0 }
 0x206   :  { %3917 = vmatmul.mubr.bf16.vlgmr.msra.gmra.mxu1 %v9062_v27  ;;  %v3632_v6 = vadd.f32 %v3631_v2, %v1000_v40  ;;  %v3672_v17 = vpop.f32.mrf.mxu1  ;;  %3926 = vmatpush1.bf16.msra.mxu0 %v7309_v36  ;;  %v629_v36 = vld [vmem:[#allocation8 + $0x490] sm:$0xff] }
 0x207   :  { %3957 = vmatprep.mubr.bf16.mxu0 %v9018_v15  ;;  %3967 = vmatpush1.bf16.msra.mxu1 %v7437_v60  ;;  %v3633_v8 = vpop.f32.mrf.mxu0  ;;  %v633_v40 = vld [vmem:[#allocation8 + $0x4b0] sm:$0xff]  ;;  %v7270_v60 = vcombine.high %v501_v55, %v505_v56 }
 0x208   :  { %v9081_v10 = vadd.f32 %v3672_v17, %v3632_v6  ;;  %3998 = vmatprep.mubr.bf16.mxu1 %v9026_v20  ;;  %v3634_v11 = vadd.f32 %v3633_v8, %v1004_v62  ;;  %v3674_v12 = vpop.f32.mrf.mxu1  ;;  %3927 = vmatprep.subr.bf16.mxu0 %v7302_v63  ;;  %v7398_v62 = vcombine.high %v629_v36, %v633_v40  ;;  %v493_v63 = vld [vmem:[#allocation8 + $0x50] sm:$0xff] }
 0x209   :  { %3968 = vmatprep.subr.bf16.mxu1 %v7430_v3  ;;  %v3635_v18 = vpop.f32.mrf.mxu0  ;;  %v625_v2 = vld [vmem:[#allocation8 + $0x470] sm:$0xff]  ;;  %v7269_v3 = vcombine.low %v501_v55, %v505_v56  ;;  %v7397_v4 = vcombine.low %v629_v36, %v633_v40  ;;  %v7262_v5 = vcombine.high %v493_v63, %v497_v45 }
 0x20a   :  { %v9084_v26 = vadd.f32 %v3674_v12, %v3634_v11  ;;  %v3676_v29 = vpop.f32.mrf.mxu1  ;;  %3928 = vmatpush1.bf16.msra.mxu0 %v7301_v7  ;;  %v7390_v6 = vcombine.high %v621_v0, %v625_v2  ;;  %v485_v17 = vld [vmem:[#allocation8 + $0x10] sm:$0xff]  ;;  %v7389_v11 = vcombine.low %v621_v0, %v625_v2 }
 0x20b   :  { %3969 = vmatpush1.bf16.msra.mxu1 %v7429_v22  ;;  %v3636_v31 = vpop.f32.mrf.mxu0  ;;  %3929 = vmatprep.subr.bf16.mxu0 %v7294_v9  ;;  %v489_v7 = vld [vmem:[#allocation8 + $0x30] sm:$0xff]  ;;  %v7261_v9 = vcombine.low %v493_v63, %v497_v45 }
 0x20c   :  { %v3677_v41 = vpop.f32.mrf.mxu1  ;;  %3970 = vmatprep.subr.bf16.mxu1 %v7422_v13  ;;  %v613_v8 = vld [vmem:[#allocation8 + $0x410] sm:$0xff]  ;;  %v7254_v12 = vcombine.high %v485_v17, %v489_v7  ;;  %v7253_v24 = vcombine.low %v485_v17, %v489_v7 }
 0x20d   :  { %v617_v22 = vld [vmem:[#allocation8 + $0x430] sm:$0xff] }
 0x20e   :  { %3930 = vmatpush1.bf16.msra.mxu0 %v7293_v30  ;;  %v7382_v13 = vcombine.high %v613_v8, %v617_v22  ;;  %v733_v18 = vld [vmem:[#allocation8 + $0x7d0] sm:$0xff]  ;;  %v7381_v29 = vcombine.low %v613_v8, %v617_v22  ;;  %v7374_v30 = vcombine.high %v605_v14, %v609_v16 }
 0x20f   :  { %3971 = vmatpush1.bf16.msra.mxu1 %v7421_v33  ;;  %3931 = vmatprep.subr.bf16.mxu0 %v7286_v37  ;;  %v7502_v31 = vcombine.high %v733_v18, %v737_v21  ;;  %v597_v33 = vld [vmem:[#allocation8 + $0x390] sm:$0xff]  ;;  %v7501_v50 = vcombine.low %v733_v18, %v737_v21 }
 0x210   :  { %3972 = vmatprep.subr.bf16.mxu1 %v7414_v42  ;;  %v601_v37 = vld [vmem:[#allocation8 + $0x3b0] sm:$0xff] }
 0x211   :  { %v725_v41 = vld [vmem:[#allocation8 + $0x790] sm:$0xff]  ;;  %v7366_v51 = vcombine.high %v597_v33, %v601_v37  ;;  %v7365_v55 = vcombine.low %v597_v33, %v601_v37 }
 0x212   :  { %3932 = vmatpush1.bf16.msra.mxu0 %v7285_v53  ;;  %v729_v42 = vld [vmem:[#allocation8 + $0x7b0] sm:$0xff] }
 0x213   :  { %3973 = vmatpush1.bf16.msra.mxu1 %v7413_v34  ;;  %3933 = vmatprep.subr.bf16.mxu0 %v7278_v35  ;;  %v7494_v52 = vcombine.high %v725_v41, %v729_v42  ;;  %v589_v53 = vld [vmem:[#allocation8 + $0x350] sm:$0xff]  ;;  %v7493_v56 = vcombine.low %v725_v41, %v729_v42 }
 0x214   :  { %3974 = vmatprep.subr.bf16.mxu1 %v7406_v54  ;;  %v593_v34 = vld [vmem:[#allocation8 + $0x370] sm:$0xff] }
 0x215   :  { %v717_v35 = vld [vmem:[#allocation8 + $0x750] sm:$0xff]  ;;  %v7358_v36 = vcombine.high %v589_v53, %v593_v34  ;;  %v7357_v63 = vcombine.low %v589_v53, %v593_v34 }
 0x216   :  { %3934 = vmatpush1.bf16.msra.mxu0 %v7277_v57  ;;  %v721_v54 = vld [vmem:[#allocation8 + $0x770] sm:$0xff] }
 0x217   :  { %3975 = vmatpush1.bf16.msra.mxu1 %v7405_v58  ;;  %3935 = vmatprep.subr.bf16.mxu0 %v7270_v60  ;;  %v7486_v40 = vcombine.high %v717_v35, %v721_v54  ;;  %v581_v57 = vld [vmem:[#allocation8 + $0x310] sm:$0xff]  ;;  %v7485_v45 = vcombine.low %v717_v35, %v721_v54 }
 0x218   :  { %3976 = vmatprep.subr.bf16.mxu1 %v7398_v62  ;;  %v585_v58 = vld [vmem:[#allocation8 + $0x330] sm:$0xff] }
 0x219   :  { %v709_v60 = vld [vmem:[#allocation8 + $0x710] sm:$0xff]  ;;  %v7350_v0 = vcombine.high %v581_v57, %v585_v58  ;;  %v7349_v17 = vcombine.low %v581_v57, %v585_v58 }
 0x21a   :  { %3936 = vmatpush1.bf16.msra.mxu0 %v7269_v3  ;;  %v713_v62 = vld [vmem:[#allocation8 + $0x730] sm:$0xff] }
 0x21b   :  { %3977 = vmatpush1.bf16.msra.mxu1 %v7397_v4  ;;  %3937 = vmatprep.subr.bf16.mxu0 %v7262_v5  ;;  %v7478_v2 = vcombine.high %v709_v60, %v713_v62  ;;  %v573_v3 = vld [vmem:[#allocation8 + $0x2d0] sm:$0xff]  ;;  %v7477_v7 = vcombine.low %v709_v60, %v713_v62 }
 0x21c   :  { %3978 = vmatprep.subr.bf16.mxu1 %v7390_v6  ;;  %v577_v4 = vld [vmem:[#allocation8 + $0x2f0] sm:$0xff] }
 0x21d   :  { %v701_v5 = vld [vmem:[#allocation8 + $0x6d0] sm:$0xff]  ;;  %v7342_v8 = vcombine.high %v573_v3, %v577_v4  ;;  %v7341_v14 = vcombine.low %v573_v3, %v577_v4 }
 0x21e   :  { %3938 = vmatpush1.bf16.msra.mxu0 %v7261_v9  ;;  %v705_v6 = vld [vmem:[#allocation8 + $0x6f0] sm:$0xff] }
 0x21f   :  { %3979 = vmatpush1.bf16.msra.mxu1 %v7389_v11  ;;  %3939 = vmatprep.subr.bf16.mxu0 %v7254_v12  ;;  %v7470_v22 = vcombine.high %v701_v5, %v705_v6  ;;  %v565_v9 = vld [vmem:[#allocation8 + $0x290] sm:$0xff]  ;;  %v7469_v16 = vcombine.low %v701_v5, %v705_v6 }
 0x220   :  { %3980 = vmatprep.subr.bf16.mxu1 %v7382_v13  ;;  %v569_v11 = vld [vmem:[#allocation8 + $0x2b0] sm:$0xff] }
 0x221   :  { %v693_v12 = vld [vmem:[#allocation8 + $0x690] sm:$0xff]  ;;  %v7334_v18 = vcombine.high %v565_v9, %v569_v11  ;;  %v7333_v33 = vcombine.low %v565_v9, %v569_v11 }
 0x222   :  { %3940 = vmatpush1.bf16.msra.mxu0 %v7253_v24  ;;  %v697_v13 = vld [vmem:[#allocation8 + $0x6b0] sm:$0xff] }
 0x223   :  { %3981 = vmatpush1.bf16.msra.mxu1 %v7381_v29  ;;  %3941 = vmatprep.subr.bf16.mxu0 %v7374_v30  ;;  %v7462_v21 = vcombine.high %v693_v12, %v697_v13  ;;  %v557_v24 = vld [vmem:[#allocation8 + $0x250] sm:$0xff]  ;;  %v7461_v37 = vcombine.low %v693_v12, %v697_v13 }
 0x224   :  { %3982 = vmatprep.subr.bf16.mxu1 %v7502_v31  ;;  %v561_v29 = vld [vmem:[#allocation8 + $0x270] sm:$0xff] }
 0x225   :  { %v685_v30 = vld [vmem:[#allocation8 + $0x650] sm:$0xff]  ;;  %v7326_v41 = vcombine.high %v557_v24, %v561_v29  ;;  %v7325_v53 = vcombine.low %v557_v24, %v561_v29 }
 0x226   :  { %3942 = vmatpush2.bf16.msra.mxu0 %v7373_v49  ;;  %v689_v31 = vld [vmem:[#allocation8 + $0x670] sm:$0xff] }
 0x227   :  { %3983 = vmatpush2.bf16.msra.mxu1 %v7501_v50  ;;  %3943 = vmatprep.subr.bf16.mxu0 %v7366_v51  ;;  %v7454_v42 = vcombine.high %v685_v30, %v689_v31  ;;  %v549_v49 = vld [vmem:[#allocation8 + $0x210] sm:$0xff]  ;;  %v7453_v34 = vcombine.low %v685_v30, %v689_v31 }
 0x228   :  { %3984 = vmatprep.subr.bf16.mxu1 %v7494_v52  ;;  %v553_v50 = vld [vmem:[#allocation8 + $0x230] sm:$0xff] }
 0x229   :  { %v677_v51 = vld [vmem:[#allocation8 + $0x610] sm:$0xff]  ;;  %v7318_v35 = vcombine.high %v549_v49, %v553_v50  ;;  %v7317_v57 = vcombine.low %v549_v49, %v553_v50 }
 0x22a   :  { %3944 = vmatpush2.bf16.msra.mxu0 %v7365_v55  ;;  %v681_v52 = vld [vmem:[#allocation8 + $0x630] sm:$0xff] }
 0x22b   :  { %3985 = vmatpush2.bf16.msra.mxu1 %v7493_v56  ;;  %3945 = vmatprep.subr.bf16.mxu0 %v7358_v36  ;;  %v7446_v54 = vcombine.high %v677_v51, %v681_v52  ;;  %v797_v55 = vld [vmem:[#allocation8 + $0x9d0] sm:$0xff]  ;;  %v7445_v58 = vcombine.low %v677_v51, %v681_v52 }
 0x22c   :  { %3986 = vmatprep.subr.bf16.mxu1 %v7486_v40  ;;  %v801_v56 = vld [vmem:[#allocation8 + $0x9f0] sm:$0xff] }
 0x22d   :  { %v925_v36 = vld [vmem:[#allocation8 + $0xdd0] sm:$0xff]  ;;  %v7566_v60 = vcombine.high %v797_v55, %v801_v56 }
 0x22e   :  { %3946 = vmatpush2.bf16.msra.mxu0 %v7357_v63  ;;  %v929_v40 = vld [vmem:[#allocation8 + $0xdf0] sm:$0xff] }
 0x22f   :  { %3987 = vmatpush2.bf16.msra.mxu1 %v7485_v45  ;;  %3947 = vmatprep.subr.bf16.mxu0 %v7350_v0  ;;  %v7694_v62 = vcombine.high %v925_v36, %v929_v40  ;;  %v789_v63 = vld [vmem:[#allocation8 + $0x990] sm:$0xff]  ;;  %v7565_v0 = vcombine.low %v797_v55, %v801_v56  ;;  %v7693_v4 = vcombine.low %v925_v36, %v929_v40 }
 0x230   :  { %3988 = vmatprep.subr.bf16.mxu1 %v7478_v2  ;;  %v793_v45 = vld [vmem:[#allocation8 + $0x9b0] sm:$0xff] }
 0x231   :  { %v917_v2 = vld [vmem:[#allocation8 + $0xd90] sm:$0xff]  ;;  %v7558_v5 = vcombine.high %v789_v63, %v793_v45  ;;  %v7557_v13 = vcombine.low %v789_v63, %v793_v45 }
 0x232   :  { %3948 = vmatpush2.bf16.msra.mxu0 %v7349_v17  ;;  %v921_v3 = vld [vmem:[#allocation8 + $0xdb0] sm:$0xff] }
 0x233   :  { %3989 = vmatpush2.bf16.msra.mxu1 %v7477_v7  ;;  %3949 = vmatprep.subr.bf16.mxu0 %v7342_v8  ;;  %v781_v6 = vld [vmem:[#allocation8 + $0x950] sm:$0xff]  ;;  %v7686_v8 = vcombine.high %v917_v2, %v921_v3 }
 0x234   :  { %3990 = vmatprep.subr.bf16.mxu1 %v7470_v22  ;;  %v785_v17 = vld [vmem:[#allocation8 + $0x970] sm:$0xff] }
 0x235   :  { %v909_v22 = vld [vmem:[#allocation8 + $0xd50] sm:$0xff]  ;;  %v7549_v51 = vcombine.low %v781_v6, %v785_v17 }
 0x236   :  { %3950 = vmatpush2.bf16.msra.mxu0 %v7341_v14  ;;  %v913_v9 = vld [vmem:[#allocation8 + $0xd70] sm:$0xff] }
 0x237   :  { %3991 = vmatpush2.bf16.msra.mxu1 %v7469_v16  ;;  %3951 = vmatprep.subr.bf16.mxu0 %v7334_v18  ;;  %v7685_v16 = vcombine.low %v917_v2, %v921_v3  ;;  %v7550_v18 = vcombine.high %v781_v6, %v785_v17  ;;  %v773_v30 = vld [vmem:[#allocation8 + $0x910] sm:$0xff] }
 0x238   :  { %3992 = vmatprep.subr.bf16.mxu1 %v7462_v21  ;;  %v777_v31 = vld [vmem:[#allocation8 + $0x930] sm:$0xff] }
 0x239   :  { %v765_v56 = vld [vmem:[#allocation8 + $0x8d0] sm:$0xff] }
 0x23a   :  { %3952 = vmatpush2.bf16.msra.mxu0 %v7333_v33  ;;  %v769_v36 = vld [vmem:[#allocation8 + $0x8f0] sm:$0xff] }
 0x23b   :  { %3993 = vmatpush2.bf16.msra.mxu1 %v7461_v37  ;;  %3953 = vmatprep.subr.bf16.mxu0 %v7326_v41  ;;  %v901_v37 = vld [vmem:[#allocation8 + $0xd10] sm:$0xff]  ;;  %v7534_v45 = vcombine.high %v765_v56, %v769_v36 }
 0x23c   :  { %3994 = vmatprep.subr.bf16.mxu1 %v7454_v42  ;;  %v905_v41 = vld [vmem:[#allocation8 + $0xd30] sm:$0xff] }
 0x23d   :  { %v7670_v55 = vcombine.high %v901_v37, %v905_v41  ;;  %v893_v40 = vld [vmem:[#allocation8 + $0xcd0] sm:$0xff]  ;;  %v7669_v63 = vcombine.low %v901_v37, %v905_v41 }
 0x23e   :  { %3954 = vmatpush2.bf16.msra.mxu0 %v7325_v53  ;;  %v7542_v53 = vcombine.high %v773_v30, %v777_v31  ;;  %v885_v6 = vld [vmem:[#allocation8 + $0xc90] sm:$0xff] }
 0x23f   :  { %3995 = vmatpush2.bf16.msra.mxu1 %v7453_v34  ;;  %3955 = vmatprep.subr.bf16.mxu0 %v7318_v35  ;;  %v889_v17 = vld [vmem:[#allocation8 + $0xcb0] sm:$0xff] }
 0x240   :  { %3996 = vmatprep.subr.bf16.mxu1 %v7446_v54 }
 0x242   :  { %3956 = vmatpush2.bf16.msra.mxu0 %v7317_v57  ;;  %v897_v57 = vld [vmem:[#allocation8 + $0xcf0] sm:$0xff] }
 0x243   :  { %3997 = vmatpush2.bf16.msra.mxu1 %v7445_v58  ;;  %4007 = vmatprep.subr.bf16.mxu0 %v7566_v60  ;;  %v7662_v3 = vcombine.high %v893_v40, %v897_v57 }
 0x244   :  { %4048 = vmatprep.subr.bf16.mxu1 %v7694_v62  ;;  %v7541_v62 = vcombine.low %v773_v30, %v777_v31 }
 0x245   :  { %v3713_v7 = vpop.f32.mrf.mxu0  ;;  %3958 = vmatmul.mubr.bf16.vlgmr.msra.gmra.mxu0 %v9024_v19 }
 0x246   :  { %v3714_v11 = vadd.f32 %v3713_v7, %v9081_v10  ;;  %v3754_v12 = vpop.f32.mrf.mxu1  ;;  %3999 = vmatmul.mubr.bf16.vlgmr.msra.gmra.mxu1 %v9030_v23  ;;  %4008 = vmatpush1.bf16.msra.mxu0 %v7565_v0  ;;  %v7678_v10 = vcombine.high %v909_v22, %v913_v9 }
 0x247   :  { %4039 = vmatprep.mubr.bf16.mxu0 %v9042_v38  ;;  %4049 = vmatpush1.bf16.msra.mxu1 %v7693_v4  ;;  %v3715_v14 = vpop.f32.mrf.mxu0  ;;  %v757_v4 = vld [vmem:[#allocation8 + $0x890] sm:$0xff] }
 0x248   :  { %v9090_v21 = vadd.f32 %v3754_v12, %v3714_v11  ;;  %4080 = vmatprep.mubr.bf16.mxu1 %v9044_v59  ;;  %v3716_v24 = vadd.f32 %v3715_v14, %v9084_v26  ;;  %v3756_v29 = vpop.f32.mrf.mxu1  ;;  %4009 = vmatprep.subr.bf16.mxu0 %v7558_v5  ;;  %v7677_v26 = vcombine.low %v909_v22, %v913_v9  ;;  %v761_v5 = vld [vmem:[#allocation8 + $0x8b0] sm:$0xff] }
 0x249   :  { %v3717_v33 = vpop.f32.mrf.mxu0  ;;  %4050 = vmatprep.subr.bf16.mxu1 %v7686_v8  ;;  %v7533_v22 = vcombine.low %v765_v56, %v769_v36  ;;  %v7661_v9 = vcombine.low %v893_v40, %v897_v57  ;;  %v7526_v11 = vcombine.high %v757_v4, %v761_v5  ;;  %v7654_v14 = vcombine.high %v885_v6, %v889_v17 }
 0x24a   :  { %v4253_v42 = vrot.slane %v9090_v21, 4  ;;  %v9095_v49 = vadd.f32 %v3756_v29, %v3716_v24  ;;  %v3758_v50 = vpop.f32.mrf.mxu1  ;;  %4010 = vmatpush1.bf16.msra.mxu0 %v7557_v13  ;;  %v877_v24 = vld [vmem:[#allocation8 + $0xc50] sm:$0xff]  ;;  %v7525_v31 = vcombine.low %v757_v4, %v761_v5  ;;  %v7653_v33 = vcombine.low %v885_v6, %v889_v17 }
 0x24b   :  { %4051 = vmatpush1.bf16.msra.mxu1 %v7685_v16  ;;  %v3718_v52 = vpop.f32.mrf.mxu0  ;;  %4011 = vmatprep.subr.bf16.mxu0 %v7550_v18  ;;  %v749_v16 = vld [vmem:[#allocation8 + $0x850] sm:$0xff] }
 0x24c   :  { %v4254_v34 = vadd.f32 %v4253_v42, %v9090_v21  ;;  %v4259_v35 = vrot.slane %v9095_v49, 4  ;;  %v3759_v54 = vpop.f32.mrf.mxu1  ;;  %4052 = vmatprep.subr.bf16.mxu1 %v7678_v10  ;;  %v753_v18 = vld [vmem:[#allocation8 + $0x870] sm:$0xff] }
 0x24d   :  { %v881_v29 = vld [vmem:[#allocation8 + $0xc70] sm:$0xff]  ;;  %v7518_v37 = vcombine.high %v749_v16, %v753_v18  ;;  %v7517_v54 = vcombine.low %v749_v16, %v753_v18 }
 0x24e   :  { %v4255_v58 = vrot.slane %v4254_v34, 2  ;;  %v4260_v60 = vadd.f32 %v4259_v35, %v9095_v49  ;;  %4012 = vmatpush1.bf16.msra.mxu0 %v7549_v51  ;;  %v7646_v50 = vcombine.high %v877_v24, %v881_v29  ;;  %v741_v51 = vld [vmem:[#allocation8 + $0x810] sm:$0xff] }
 0x24f   :  { %4053 = vmatpush1.bf16.msra.mxu1 %v7677_v26  ;;  %4013 = vmatprep.subr.bf16.mxu0 %v7542_v53  ;;  %v745_v52 = vld [vmem:[#allocation8 + $0x830] sm:$0xff] }
 0x250   :  { %v4256_v0 = vadd.f32 %v4255_v58, %v4254_v34  ;;  %v4261_v2 = vrot.slane %v4260_v60, 2  ;;  %4054 = vmatprep.subr.bf16.mxu1 %v7670_v55  ;;  %v869_v26 = vld [vmem:[#allocation8 + $0xc10] sm:$0xff]  ;;  %v7645_v55 = vcombine.low %v877_v24, %v881_v29  ;;  %v7510_v56 = vcombine.high %v741_v51, %v745_v52 }
 0x251   :  { %v873_v53 = vld [vmem:[#allocation8 + $0xc30] sm:$0xff] }
 0x252   :  { %v4257_v7 = vrot.slane %v4256_v0, 1  ;;  %v4262_v8 = vadd.f32 %v4261_v2, %v4260_v60  ;;  %4014 = vmatpush1.bf16.msra.mxu0 %v7541_v62  ;;  %v7638_v57 = vcombine.high %v869_v26, %v873_v53  ;;  %v861_v58 = vld [vmem:[#allocation8 + $0xbd0] sm:$0xff]  ;;  %v7509_v2 = vcombine.low %v741_v51, %v745_v52 }
 0x253   :  { %4055 = vmatpush1.bf16.msra.mxu1 %v7669_v63  ;;  %4015 = vmatprep.subr.bf16.mxu0 %v7534_v45  ;;  %v865_v60 = vld [vmem:[#allocation8 + $0xbf0] sm:$0xff] }
 0x254   :  { %v4258_v12 = vadd.f32 %v4257_v7, %v4256_v0  ;;  %v4263_v13 = vrot.slane %v4262_v8, 1  ;;  %4056 = vmatprep.subr.bf16.mxu1 %v7662_v3  ;;  %v989_v62 = vld [vmem:[#allocation8 + $0xfd0] sm:$0xff]  ;;  %v7637_v3 = vcombine.low %v869_v26, %v873_v53  ;;  %v7630_v4 = vcombine.high %v861_v58, %v865_v60 }
 0x255   :  { %v993_v63 = vld [vmem:[#allocation8 + $0xff0] sm:$0xff] }
 0x256   :  { %v9100_v10 = vmul.f32 0.125, %v4258_v12  ;;  %v4264_v30 = vadd.f32 %v4263_v13, %v4262_v8  ;;  %4016 = vmatpush1.bf16.msra.mxu0 %v7533_v22  ;;  %v7758_v17 = vcombine.high %v989_v62, %v993_v63  ;;  %v853_v7 = vld [vmem:[#allocation8 + $0xb90] sm:$0xff]  ;;  %v7629_v13 = vcombine.low %v861_v58, %v865_v60 }
 0x257   :  { %4057 = vmatpush1.bf16.msra.mxu1 %v7661_v9  ;;  %4017 = vmatprep.subr.bf16.mxu0 %v7526_v11  ;;  %v857_v8 = vld [vmem:[#allocation8 + $0xbb0] sm:$0xff] }
 0x258   :  { %v4310_v41 = vsub.f32 %v9090_v21, %v9100_v10  ;;  %v9104_v42 = vmul.f32 0.125, %v4264_v30  ;;  %4058 = vmatprep.subr.bf16.mxu1 %v7654_v14  ;;  %v981_v22 = vld [vmem:[#allocation8 + $0xf90] sm:$0xff]  ;;  %v7757_v14 = vcombine.low %v989_v62, %v993_v63  ;;  %v7622_v16 = vcombine.high %v853_v7, %v857_v8 }
 0x259   :  { %v985_v9 = vld [vmem:[#allocation8 + $0xfb0] sm:$0xff]  ;;  %v7621_v51 = vcombine.low %v853_v7, %v857_v8 }
 0x25a   :  { %v4318_v34 = vmul.f32 %v4310_v41, %v4310_v41  ;;  %v4311_v35 = vsub.f32 %v9095_v49, %v9104_v42  ;;  %4018 = vmatpush1.bf16.msra.mxu0 %v7525_v31  ;;  %v7750_v29 = vcombine.high %v981_v22, %v985_v9  ;;  %v845_v30 = vld [vmem:[#allocation8 + $0xb50] sm:$0xff]  ;;  %v7749_v52 = vcombine.low %v981_v22, %v985_v9 }
 0x25b   :  { %4059 = vmatpush1.bf16.msra.mxu1 %v7653_v33  ;;  %4019 = vmatprep.subr.bf16.mxu0 %v7518_v37  ;;  %v849_v31 = vld [vmem:[#allocation8 + $0xb70] sm:$0xff] }
 0x25c   :  { %v4326_v36 = vrot.slane %v4318_v34, 4  ;;  %v4319_v40 = vmul.f32 %v4311_v35, %v4311_v35  ;;  %4060 = vmatprep.subr.bf16.mxu1 %v7646_v50  ;;  %v973_v33 = vld [vmem:[#allocation8 + $0xf50] sm:$0xff]  ;;  %v7614_v26 = vcombine.high %v845_v30, %v849_v31  ;;  %v7613_v58 = vcombine.low %v845_v30, %v849_v31 }
 0x25d   :  { %v977_v37 = vld [vmem:[#allocation8 + $0xf70] sm:$0xff] }
 0x25e   :  { %v4327_v45 = vadd.f32 %v4326_v36, %v4318_v34  ;;  %v4332_v0 = vrot.slane %v4319_v40, 4  ;;  %4020 = vmatpush1.bf16.msra.mxu0 %v7517_v54  ;;  %v7742_v35 = vcombine.high %v973_v33, %v977_v37  ;;  %v837_v54 = vld [vmem:[#allocation8 + $0xb10] sm:$0xff]  ;;  %v7741_v60 = vcombine.low %v973_v33, %v977_v37 }
 0x25f   :  { %4061 = vmatpush1.bf16.msra.mxu1 %v7645_v55  ;;  %4021 = vmatprep.subr.bf16.mxu0 %v7510_v56  ;;  %v841_v55 = vld [vmem:[#allocation8 + $0xb30] sm:$0xff] }
 0x260   :  { %v4328_v5 = vrot.slane %v4327_v45, 2  ;;  %v4333_v6 = vadd.f32 %v4332_v0, %v4319_v40  ;;  %4062 = vmatprep.subr.bf16.mxu1 %v7638_v57  ;;  %v965_v56 = vld [vmem:[#allocation8 + $0xf10] sm:$0xff]  ;;  %v7606_v62 = vcombine.high %v837_v54, %v841_v55 }
 0x261   :  { %v969_v36 = vld [vmem:[#allocation8 + $0xf30] sm:$0xff] }
 0x262   :  { %v4329_v11 = vadd.f32 %v4328_v5, %v4327_v45  ;;  %v4334_v12 = vrot.slane %v4333_v6, 2  ;;  %4022 = vmatpush1.bf16.msra.mxu0 %v7509_v2  ;;  %v7734_v45 = vcombine.high %v965_v56, %v969_v36  ;;  %v829_v0 = vld [vmem:[#allocation8 + $0xad0] sm:$0xff]  ;;  %v7605_v5 = vcombine.low %v837_v54, %v841_v55 }
 0x263   :  { %4063 = vmatpush1.bf16.msra.mxu1 %v7637_v3  ;;  %4023 = vmatprep.subr.bf16.mxu0 %v7630_v4  ;;  %v833_v2 = vld [vmem:[#allocation8 + $0xaf0] sm:$0xff] }
 0x264   :  { %v4330_v18 = vrot.slane %v4329_v11, 1  ;;  %v4335_v24 = vadd.f32 %v4334_v12, %v4333_v6  ;;  %4064 = vmatprep.subr.bf16.mxu1 %v7758_v17  ;;  %v957_v3 = vld [vmem:[#allocation8 + $0xed0] sm:$0xff]  ;;  %v7733_v6 = vcombine.low %v965_v56, %v969_v36  ;;  %v7598_v17 = vcombine.high %v829_v0, %v833_v2 }
 0x265   :  { %v961_v4 = vld [vmem:[#allocation8 + $0xef0] sm:$0xff]  ;;  %v7597_v12 = vcombine.low %v829_v0, %v833_v2  ;;  %v674_v0 = vld [vmem:[#allocation8 + $0x5f8] sm:$0xff] }
 0x266   :  { %v4331_v41 = vadd.f32 %v4330_v18, %v4329_v11  ;;  %v4336_v50 = vrot.slane %v4335_v24, 1  ;;  %4024 = vmatpush2.bf16.msra.mxu0 %v7629_v13  ;;  %v7726_v7 = vcombine.high %v957_v3, %v961_v4  ;;  %v821_v8 = vld [vmem:[#allocation8 + $0xa90] sm:$0xff]  ;;  %v9108_v13 = vld [vmem:[#allocation11] sm:$0xff] }
 0x267   :  { %4065 = vmatpush2.bf16.msra.mxu1 %v7757_v14  ;;  %4025 = vmatprep.subr.bf16.mxu0 %v7622_v16  ;;  %v825_v22 = vld [vmem:[#allocation8 + $0xab0] sm:$0xff]  ;;  %v7725_v14 = vcombine.low %v957_v3, %v961_v4  ;;  %v4403_v33 = vrot.slane %v9108_v13, %v8989_v44 }
 0x268   :  { %v4374_v53 = vmul.f32 0.125, %v4331_v41  ;;  %v4337_v34 = vadd.f32 %v4336_v50, %v4335_v24  ;;  %4066 = vmatprep.subr.bf16.mxu1 %v7750_v29  ;;  %v949_v9 = vld [vmem:[#allocation8 + $0xe90] sm:$0xff]  ;;  %v7590_v16 = vcombine.high %v821_v8, %v825_v22  ;;  %v7589_v37 = vcombine.low %v821_v8, %v825_v22  ;;  %v534_v8 = vld [vmem:[#allocation8 + $0x198] sm:$0xff] }
 0x269   :  { %v953_v11 = vld [vmem:[#allocation8 + $0xeb0] sm:$0xff]  ;;  %v538_v22 = vld [vmem:[#allocation8 + $0x1b8] sm:$0xff] }
 0x26a   :  { %v4382_v40 = vadd.f32 1e-05, %v4374_v53  ;;  %v4375_v57 = vmul.f32 0.125, %v4337_v34  ;;  %4026 = vmatpush2.bf16.msra.mxu0 %v7621_v51  ;;  %v7718_v18 = vcombine.high %v949_v9, %v953_v11  ;;  %v813_v24 = vld [vmem:[#allocation8 + $0xa50] sm:$0xff]  ;;  %v7717_v41 = vcombine.low %v949_v9, %v953_v11  ;;  %v666_v11 = vld [vmem:[#allocation8 + $0x5b8] sm:$0xff] }
 0x26b   :  { %4067 = vmatpush2.bf16.msra.mxu1 %v7749_v52  ;;  %4027 = vmatprep.subr.bf16.mxu0 %v7614_v26  ;;  %v817_v29 = vld [vmem:[#allocation8 + $0xa70] sm:$0xff]  ;;  %v4407_v51 = vrot.slane %v9108_v13, %v8997_v47 }
 0x26c   :  { %8633 = vrsqrt.f32 %v4382_v40  ;;  %v4383_v63 = vadd.f32 1e-05, %v4375_v57  ;;  %4068 = vmatprep.subr.bf16.mxu1 %v7742_v35  ;;  %v941_v30 = vld [vmem:[#allocation8 + $0xe50] sm:$0xff]  ;;  %v7582_v50 = vcombine.high %v813_v24, %v817_v29  ;;  %v7581_v56 = vcombine.low %v813_v24, %v817_v29  ;;  %v530_v24 = vld [vmem:[#allocation8 + $0x178] sm:$0xff] }
 0x26d   :  { %v945_v31 = vld [vmem:[#allocation8 + $0xe70] sm:$0xff] }
 0x26e   :  { %8635 = vrsqrt.f32 %v4383_v63  ;;  %4028 = vmatpush2.bf16.msra.mxu0 %v7613_v58  ;;  %v7710_v52 = vcombine.high %v941_v30, %v945_v31  ;;  %v805_v26 = vld [vmem:[#allocation8 + $0xa10] sm:$0xff]  ;;  %v7709_v40 = vcombine.low %v941_v30, %v945_v31  ;;  %v546_v63 = vld [vmem:[#allocation8 + $0x1f8] sm:$0xff] }
 0x26f   :  { %4069 = vmatpush2.bf16.msra.mxu1 %v7741_v60  ;;  %4029 = vmatprep.subr.bf16.mxu0 %v7606_v62  ;;  %v809_v53 = vld [vmem:[#allocation8 + $0xa30] sm:$0xff]  ;;  %v542_v62 = vld [vmem:[#allocation8 + $0x1d8] sm:$0xff] }
 0x270   :  { %4070 = vmatprep.subr.bf16.mxu1 %v7734_v45  ;;  %v933_v35 = vld [vmem:[#allocation8 + $0xe10] sm:$0xff]  ;;  %v7574_v57 = vcombine.high %v805_v26, %v809_v53  ;;  %v670_v45 = vld [vmem:[#allocation8 + $0x5d8] sm:$0xff]  ;;  %v7573_v4 = vcombine.low %v805_v26, %v809_v53  ;;  %v7311_v9 = vcombine.low %v542_v62, %v546_v63 }
 0x271   :  { %v937_v54 = vld [vmem:[#allocation8 + $0xe30] sm:$0xff]  ;;  %v654_v31 = vld [vmem:[#allocation8 + $0x558] sm:$0xff] }
 0x272   :  { %4030 = vmatpush2.bf16.msra.mxu0 %v7605_v5  ;;  %v7702_v60 = vcombine.high %v933_v35, %v937_v54  ;;  %v7701_v5 = vcombine.low %v933_v35, %v937_v54  ;;  %v518_v54 = vld [vmem:[#allocation8 + $0x118] sm:$0xff] }
 0x273   :  { %4071 = vmatpush2.bf16.msra.mxu1 %v7733_v6  ;;  %4031 = vmatprep.subr.bf16.mxu0 %v7598_v17  ;;  %v7312_v6 = vcombine.high %v542_v62, %v546_v63 }
 0x274   :  { %4072 = vmatprep.subr.bf16.mxu1 %v7726_v7  ;;  %v7440_v7 = vcombine.high %v670_v45, %v674_v0 }
 0x276   :  { %4032 = vmatpush2.bf16.msra.mxu0 %v7597_v12  ;;  %v7439_v12 = vcombine.low %v670_v45, %v674_v0 }
 0x277   :  { %4073 = vmatpush2.bf16.msra.mxu1 %v7725_v14  ;;  %4033 = vmatprep.subr.bf16.mxu0 %v7590_v16  ;;  %v1012_v14 = vrot.slane %v9072_v39, %v9000_v48  ;;  %v7304_v16 = vcombine.high %v534_v8, %v538_v22 }
 0x278   :  { %4074 = vmatprep.subr.bf16.mxu1 %v7718_v18  ;;  %v526_v18 = vld [vmem:[#allocation8 + $0x158] sm:$0xff] }
 0x279   :  { %v8634_v34 = vpop.eup %8633  ;;  %v7295_v62 = vcombine.low %v526_v18, %v530_v24 }
 0x27a   :  { %v9114_v55 = vmul.f32 %v8634_v34, %v4403_v33  ;;  %4034 = vmatpush2.bf16.msra.mxu0 %v7589_v37  ;;  %v658_v33 = vld [vmem:[#allocation8 + $0x578] sm:$0xff] }
 0x27b   :  { %v8636_v36 = vpop.eup %8635  ;;  %4075 = vmatpush2.bf16.msra.mxu1 %v7717_v41  ;;  %4035 = vmatprep.subr.bf16.mxu0 %v7582_v50  ;;  %v7303_v50 = vcombine.low %v534_v8, %v538_v22  ;;  %v7424_v35 = vcombine.high %v654_v31, %v658_v33  ;;  %v7423_v45 = vcombine.low %v654_v31, %v658_v33  ;;  %v642_v8 = vld [vmem:[#allocation8 + $0x4f8] sm:$0xff] }
 0x27c   :  { %v9116_v58 = vmul.f32 %v8636_v36, %v4407_v51  ;;  %4076 = vmatprep.subr.bf16.mxu1 %v7710_v52  ;;  %v9120_v2 = vmul.f32 %v9114_v55, %v9100_v10  ;;  %v1008_v10 = vrot.slane %v9072_v39, %v8994_v46  ;;  %v7296_v52 = vcombine.high %v526_v18, %v530_v24  ;;  %v494_v31 = vld [vmem:[#allocation8 + $0x58] sm:$0xff] }
 0x27d   :  { %v498_v33 = vld [vmem:[#allocation8 + $0x78] sm:$0xff] }
 0x27e   :  { %v9124_v3 = vmul.f32 %v9116_v58, %v9104_v42  ;;  %4036 = vmatpush2.bf16.msra.mxu0 %v7581_v56  ;;  %v662_v42 = vld [vmem:[#allocation8 + $0x598] sm:$0xff] }
 0x27f   :  { %4077 = vmatpush2.bf16.msra.mxu1 %v7709_v40  ;;  %4037 = vmatprep.subr.bf16.mxu0 %v7574_v57  ;;  %v7432_v30 = vcombine.high %v662_v42, %v666_v11  ;;  %v7431_v39 = vcombine.low %v662_v42, %v666_v11  ;;  %v522_v56 = vld [vmem:[#allocation8 + $0x138] sm:$0xff] }
 0x280   :  { %v4465_v17 = vcombine.low %v9120_v2, %v9124_v3  ;;  %4078 = vmatprep.subr.bf16.mxu1 %v7702_v60  ;;  %v646_v40 = vld [vmem:[#allocation8 + $0x518] sm:$0xff]  ;;  %v7287_v22 = vcombine.low %v518_v54, %v522_v56 }
 0x281   :  { %v650_v57 = vld [vmem:[#allocation8 + $0x538] sm:$0xff] }
 0x282   :  { %4038 = vmatpush2.bf16.msra.mxu0 %v7573_v4  ;;  %v7416_v4 = vcombine.high %v646_v40, %v650_v57  ;;  %v502_v11 = vld [vmem:[#allocation8 + $0x98] sm:$0xff] }
 0x283   :  { %4079 = vmatpush2.bf16.msra.mxu1 %v7701_v5  ;;  %4089 = vmatprep.subr.bf16.mxu0 %v7312_v6  ;;  %v510_v5 = vld [vmem:[#allocation8 + $0xd8] sm:$0xff] }
 0x284   :  { %4130 = vmatprep.subr.bf16.mxu1 %v7440_v7  ;;  %v514_v6 = vld [vmem:[#allocation8 + $0xf8] sm:$0xff] }
 0x285   :  { %v3795_v29 = vpop.f32.mrf.mxu0  ;;  %4040 = vmatmul.mubr.bf16.vlgmr.msra.gmra.mxu0 %v9060_v25  ;;  %v638_v7 = vld [vmem:[#allocation8 + $0x4d8] sm:$0xff]  ;;  %v7279_v18 = vcombine.low %v510_v5, %v514_v6 }
 0x286   :  { %v3796_v37 = vadd.f32 %v3795_v29, %v1008_v10  ;;  %v3836_v41 = vpop.f32.mrf.mxu1  ;;  %4081 = vmatmul.mubr.bf16.vlgmr.msra.gmra.mxu1 %v9062_v27  ;;  %4090 = vmatpush1.bf16.msra.mxu0 %v7311_v9  ;;  %v7415_v10 = vcombine.low %v646_v40, %v650_v57  ;;  %v7280_v9 = vcombine.high %v510_v5, %v514_v6  ;;  %v598_v6 = vld [vmem:[#allocation8 + $0x398] sm:$0xff] }
 0x287   :  { %4121 = vmatprep.mubr.bf16.mxu0 %v9018_v15  ;;  %4131 = vmatpush1.bf16.msra.mxu1 %v7439_v12  ;;  %v3797_v51 = vpop.f32.mrf.mxu0  ;;  %v7408_v42 = vcombine.high %v638_v7, %v642_v8  ;;  %v506_v12 = vld [vmem:[#allocation8 + $0xb8] sm:$0xff]  ;;  %v7407_v24 = vcombine.low %v638_v7, %v642_v8 }
 0x288   :  { %v9135_v26 = vadd.f32 %v3836_v41, %v3796_v37  ;;  %4162 = vmatprep.mubr.bf16.mxu1 %v9026_v20  ;;  %v3798_v53 = vadd.f32 %v3797_v51, %v1012_v14  ;;  %v3838_v34 = vpop.f32.mrf.mxu1  ;;  %4091 = vmatprep.subr.bf16.mxu0 %v7304_v16  ;;  %v7288_v20 = vcombine.high %v518_v54, %v522_v56  ;;  %v630_v14 = vld [vmem:[#allocation8 + $0x498] sm:$0xff] }
 0x289   :  { %v3799_v36 = vpop.f32.mrf.mxu0  ;;  %4132 = vmatprep.subr.bf16.mxu1 %v7432_v30  ;;  %v634_v16 = vld [vmem:[#allocation8 + $0x4b8] sm:$0xff]  ;;  %v7272_v29 = vcombine.high %v502_v11, %v506_v12  ;;  %v7263_v56 = vcombine.low %v494_v31, %v498_v33 }
 0x28a   :  { %v9138_v60 = vadd.f32 %v3838_v34, %v3798_v53  ;;  %v3840_v15 = vpop.f32.mrf.mxu1  ;;  %4092 = vmatpush1.bf16.msra.mxu0 %v7303_v50  ;;  %v7400_v30 = vcombine.high %v630_v14, %v634_v16  ;;  %v622_v37 = vld [vmem:[#allocation8 + $0x458] sm:$0xff]  ;;  %v7271_v50 = vcombine.low %v502_v11, %v506_v12  ;;  %v7399_v51 = vcombine.low %v630_v14, %v634_v16 }
 0x28b   :  { %4133 = vmatpush1.bf16.msra.mxu1 %v7431_v39  ;;  %v3800_v63 = vpop.f32.mrf.mxu0  ;;  %4093 = vmatprep.subr.bf16.mxu0 %v7296_v52  ;;  %v626_v41 = vld [vmem:[#allocation8 + $0x478] sm:$0xff]  ;;  %v7264_v39 = vcombine.high %v494_v31, %v498_v33 }
 0x28c   :  { %v3841_v0 = vpop.f32.mrf.mxu1  ;;  %4134 = vmatprep.subr.bf16.mxu1 %v7424_v35  ;;  %v7392_v52 = vcombine.high %v622_v37, %v626_v41  ;;  %v486_v53 = vld [vmem:[#allocation8 + $0x18] sm:$0xff]  ;;  %v7391_v36 = vcombine.low %v622_v37, %v626_v41 }
 0x28d   :  { %v490_v34 = vld [vmem:[#allocation8 + $0x38] sm:$0xff] }
 0x28e   :  { %4094 = vmatpush1.bf16.msra.mxu0 %v7295_v62  ;;  %v614_v35 = vld [vmem:[#allocation8 + $0x418] sm:$0xff]  ;;  %v7256_v40 = vcombine.high %v486_v53, %v490_v34 }
 0x28f   :  { %4135 = vmatpush1.bf16.msra.mxu1 %v7423_v45  ;;  %4095 = vmatprep.subr.bf16.mxu0 %v7288_v20  ;;  %v618_v54 = vld [vmem:[#allocation8 + $0x438] sm:$0xff]  ;;  %v7255_v20 = vcombine.low %v486_v53, %v490_v34 }
 0x290   :  { %4136 = vmatprep.subr.bf16.mxu1 %v7416_v4  ;;  %v7384_v57 = vcombine.high %v614_v35, %v618_v54  ;;  %v606_v15 = vld [vmem:[#allocation8 + $0x3d8] sm:$0xff]  ;;  %v7383_v0 = vcombine.low %v614_v35, %v618_v54 }
 0x291   :  { %v610_v62 = vld [vmem:[#allocation8 + $0x3f8] sm:$0xff] }
 0x292   :  { %4096 = vmatpush1.bf16.msra.mxu0 %v7287_v22  ;;  %v734_v63 = vld [vmem:[#allocation8 + $0x7d8] sm:$0xff]  ;;  %v7376_v4 = vcombine.high %v606_v15, %v610_v62 }
 0x293   :  { %4137 = vmatpush1.bf16.msra.mxu1 %v7415_v10  ;;  %4097 = vmatprep.subr.bf16.mxu0 %v7280_v9  ;;  %v738_v45 = vld [vmem:[#allocation8 + $0x7f8] sm:$0xff]  ;;  %v7375_v10 = vcombine.low %v606_v15, %v610_v62 }
 0x294   :  { %4138 = vmatprep.subr.bf16.mxu1 %v7408_v42  ;;  %v7504_v5 = vcombine.high %v734_v63, %v738_v45  ;;  %v602_v7 = vld [vmem:[#allocation8 + $0x3b8] sm:$0xff]  ;;  %v7503_v9 = vcombine.low %v734_v63, %v738_v45 }
 0x295   :  { %v726_v8 = vld [vmem:[#allocation8 + $0x798] sm:$0xff]  ;;  %v7368_v42 = vcombine.high %v598_v6, %v602_v7 }
 0x296   :  { %4098 = vmatpush1.bf16.msra.mxu0 %v7279_v18  ;;  %v730_v22 = vld [vmem:[#allocation8 + $0x7b8] sm:$0xff] }
 0x297   :  { %4139 = vmatpush1.bf16.msra.mxu1 %v7407_v24  ;;  %4099 = vmatprep.subr.bf16.mxu0 %v7272_v29  ;;  %v7496_v11 = vcombine.high %v726_v8, %v730_v22  ;;  %v590_v12 = vld [vmem:[#allocation8 + $0x358] sm:$0xff]  ;;  %v7367_v24 = vcombine.low %v598_v6, %v602_v7  ;;  %v7495_v29 = vcombine.low %v726_v8, %v730_v22 }
 0x298   :  { %4140 = vmatprep.subr.bf16.mxu1 %v7400_v30  ;;  %v594_v14 = vld [vmem:[#allocation8 + $0x378] sm:$0xff] }
 0x299   :  { %v718_v16 = vld [vmem:[#allocation8 + $0x758] sm:$0xff]  ;;  %v7360_v30 = vcombine.high %v590_v12, %v594_v14 }
 0x29a   :  { %4100 = vmatpush1.bf16.msra.mxu0 %v7271_v50  ;;  %v722_v18 = vld [vmem:[#allocation8 + $0x778] sm:$0xff] }
 0x29b   :  { %4141 = vmatpush1.bf16.msra.mxu1 %v7399_v51  ;;  %4101 = vmatprep.subr.bf16.mxu0 %v7264_v39  ;;  %v7488_v31 = vcombine.high %v718_v16, %v722_v18  ;;  %v582_v33 = vld [vmem:[#allocation8 + $0x318] sm:$0xff]  ;;  %v7359_v51 = vcombine.low %v590_v12, %v594_v14  ;;  %v7487_v39 = vcombine.low %v718_v16, %v722_v18 }
 0x29c   :  { %4142 = vmatprep.subr.bf16.mxu1 %v7392_v52  ;;  %v586_v37 = vld [vmem:[#allocation8 + $0x338] sm:$0xff] }
 0x29d   :  { %v710_v41 = vld [vmem:[#allocation8 + $0x718] sm:$0xff]  ;;  %v7352_v52 = vcombine.high %v582_v33, %v586_v37 }
 0x29e   :  { %4102 = vmatpush1.bf16.msra.mxu0 %v7263_v56  ;;  %v714_v50 = vld [vmem:[#allocation8 + $0x738] sm:$0xff] }
 0x29f   :  { %4143 = vmatpush1.bf16.msra.mxu1 %v7391_v36  ;;  %4103 = vmatprep.subr.bf16.mxu0 %v7256_v40  ;;  %v7480_v53 = vcombine.high %v710_v41, %v714_v50  ;;  %v574_v34 = vld [vmem:[#allocation8 + $0x2d8] sm:$0xff]  ;;  %v7351_v36 = vcombine.low %v582_v33, %v586_v37  ;;  %v7479_v40 = vcombine.low %v710_v41, %v714_v50 }
 0x2a0   :  { %4144 = vmatprep.subr.bf16.mxu1 %v7384_v57  ;;  %v578_v35 = vld [vmem:[#allocation8 + $0x2f8] sm:$0xff] }
 0x2a1   :  { %v702_v54 = vld [vmem:[#allocation8 + $0x6d8] sm:$0xff]  ;;  %v7344_v57 = vcombine.high %v574_v34, %v578_v35 }
 0x2a2   :  { %4104 = vmatpush1.bf16.msra.mxu0 %v7255_v20  ;;  %v706_v56 = vld [vmem:[#allocation8 + $0x6f8] sm:$0xff] }
 0x2a3   :  { %4145 = vmatpush1.bf16.msra.mxu1 %v7383_v0  ;;  %4105 = vmatprep.subr.bf16.mxu0 %v7376_v4  ;;  %v7472_v15 = vcombine.high %v702_v54, %v706_v56  ;;  %v566_v62 = vld [vmem:[#allocation8 + $0x298] sm:$0xff]  ;;  %v7343_v0 = vcombine.low %v574_v34, %v578_v35  ;;  %v7471_v4 = vcombine.low %v702_v54, %v706_v56 }
 0x2a4   :  { %4146 = vmatprep.subr.bf16.mxu1 %v7504_v5  ;;  %v570_v63 = vld [vmem:[#allocation8 + $0x2b8] sm:$0xff] }
 0x2a5   :  { %v694_v45 = vld [vmem:[#allocation8 + $0x698] sm:$0xff]  ;;  %v7336_v5 = vcombine.high %v566_v62, %v570_v63 }
 0x2a6   :  { %4106 = vmatpush2.bf16.msra.mxu0 %v7375_v10  ;;  %v698_v20 = vld [vmem:[#allocation8 + $0x6b8] sm:$0xff] }
 0x2a7   :  { %4147 = vmatpush2.bf16.msra.mxu1 %v7503_v9  ;;  %4107 = vmatprep.subr.bf16.mxu0 %v7368_v42  ;;  %v7464_v6 = vcombine.high %v694_v45, %v698_v20  ;;  %v558_v7 = vld [vmem:[#allocation8 + $0x258] sm:$0xff]  ;;  %v7335_v9 = vcombine.low %v566_v62, %v570_v63  ;;  %v7463_v42 = vcombine.low %v694_v45, %v698_v20 }
 0x2a8   :  { %4148 = vmatprep.subr.bf16.mxu1 %v7496_v11  ;;  %v562_v8 = vld [vmem:[#allocation8 + $0x278] sm:$0xff] }
 0x2a9   :  { %v686_v22 = vld [vmem:[#allocation8 + $0x658] sm:$0xff]  ;;  %v7328_v11 = vcombine.high %v558_v7, %v562_v8 }
 0x2aa   :  { %4108 = vmatpush2.bf16.msra.mxu0 %v7367_v24  ;;  %v690_v10 = vld [vmem:[#allocation8 + $0x678] sm:$0xff] }
 0x2ab   :  { %4149 = vmatpush2.bf16.msra.mxu1 %v7495_v29  ;;  %4109 = vmatprep.subr.bf16.mxu0 %v7360_v30  ;;  %v7456_v12 = vcombine.high %v686_v22, %v690_v10  ;;  %v550_v14 = vld [vmem:[#allocation8 + $0x218] sm:$0xff]  ;;  %v7327_v29 = vcombine.low %v558_v7, %v562_v8  ;;  %v7455_v30 = vcombine.low %v686_v22, %v690_v10 }
 0x2ac   :  { %4150 = vmatprep.subr.bf16.mxu1 %v7488_v31  ;;  %v554_v16 = vld [vmem:[#allocation8 + $0x238] sm:$0xff] }
 0x2ad   :  { %v678_v18 = vld [vmem:[#allocation8 + $0x618] sm:$0xff]  ;;  %v7320_v31 = vcombine.high %v550_v14, %v554_v16 }
 0x2ae   :  { %4110 = vmatpush2.bf16.msra.mxu0 %v7359_v51  ;;  %v682_v24 = vld [vmem:[#allocation8 + $0x638] sm:$0xff] }
 0x2af   :  { %4151 = vmatpush2.bf16.msra.mxu1 %v7487_v39  ;;  %4111 = vmatprep.subr.bf16.mxu0 %v7352_v52  ;;  %v7448_v33 = vcombine.high %v678_v18, %v682_v24  ;;  %v798_v37 = vld [vmem:[#allocation8 + $0x9d8] sm:$0xff]  ;;  %v7319_v39 = vcombine.low %v550_v14, %v554_v16  ;;  %v7447_v52 = vcombine.low %v678_v18, %v682_v24 }
 0x2b0   :  { %4152 = vmatprep.subr.bf16.mxu1 %v7480_v53  ;;  %v802_v41 = vld [vmem:[#allocation8 + $0x9f8] sm:$0xff] }
 0x2b1   :  { %v926_v50 = vld [vmem:[#allocation8 + $0xdd8] sm:$0xff]  ;;  %v7568_v53 = vcombine.high %v798_v37, %v802_v41  ;;  %v7567_v56 = vcombine.low %v798_v37, %v802_v41 }
 0x2b2   :  { %4112 = vmatpush2.bf16.msra.mxu0 %v7351_v36  ;;  %v930_v51 = vld [vmem:[#allocation8 + $0xdf8] sm:$0xff] }
 0x2b3   :  { %4153 = vmatpush2.bf16.msra.mxu1 %v7479_v40  ;;  %4113 = vmatprep.subr.bf16.mxu0 %v7344_v57  ;;  %v7696_v34 = vcombine.high %v926_v50, %v930_v51  ;;  %v790_v35 = vld [vmem:[#allocation8 + $0x998] sm:$0xff]  ;;  %v7695_v57 = vcombine.low %v926_v50, %v930_v51 }
 0x2b4   :  { %4154 = vmatprep.subr.bf16.mxu1 %v7472_v15  ;;  %v794_v54 = vld [vmem:[#allocation8 + $0x9b8] sm:$0xff] }
 0x2b5   :  { %v918_v36 = vld [vmem:[#allocation8 + $0xd98] sm:$0xff]  ;;  %v7560_v15 = vcombine.high %v790_v35, %v794_v54  ;;  %v7559_v7 = vcombine.low %v790_v35, %v794_v54 }
 0x2b6   :  { %4114 = vmatpush2.bf16.msra.mxu0 %v7343_v0  ;;  %v922_v40 = vld [vmem:[#allocation8 + $0xdb8] sm:$0xff] }
 0x2b7   :  { %4155 = vmatpush2.bf16.msra.mxu1 %v7471_v4  ;;  %4115 = vmatprep.subr.bf16.mxu0 %v7336_v5  ;;  %v782_v62 = vld [vmem:[#allocation8 + $0x958] sm:$0xff]  ;;  %v7688_v20 = vcombine.high %v918_v36, %v922_v40  ;;  %v7687_v22 = vcombine.low %v918_v36, %v922_v40 }
 0x2b8   :  { %4156 = vmatprep.subr.bf16.mxu1 %v7464_v6  ;;  %v786_v63 = vld [vmem:[#allocation8 + $0x978] sm:$0xff] }
 0x2b9   :  { %v910_v0 = vld [vmem:[#allocation8 + $0xd58] sm:$0xff]  ;;  %v7552_v10 = vcombine.high %v782_v62, %v786_v63 }
 0x2ba   :  { %4116 = vmatpush2.bf16.msra.mxu0 %v7335_v9  ;;  %v914_v4 = vld [vmem:[#allocation8 + $0xd78] sm:$0xff] }
 0x2bb   :  { %4157 = vmatpush2.bf16.msra.mxu1 %v7463_v42  ;;  %4117 = vmatprep.subr.bf16.mxu0 %v7328_v11  ;;  %v774_v11 = vld [vmem:[#allocation8 + $0x918] sm:$0xff] }
 0x2bc   :  { %4158 = vmatprep.subr.bf16.mxu1 %v7456_v12  ;;  %v778_v12 = vld [vmem:[#allocation8 + $0x938] sm:$0xff] }
 0x2bd   :  { %v902_v14 = vld [vmem:[#allocation8 + $0xd18] sm:$0xff]  ;;  %v7543_v35 = vcombine.low %v774_v11, %v778_v12 }
 0x2be   :  { %4118 = vmatpush2.bf16.msra.mxu0 %v7327_v29  ;;  %v906_v16 = vld [vmem:[#allocation8 + $0xd38] sm:$0xff]  ;;  %v7551_v29 = vcombine.low %v782_v62, %v786_v63 }
 0x2bf   :  { %4159 = vmatpush2.bf16.msra.mxu1 %v7455_v30  ;;  %4119 = vmatprep.subr.bf16.mxu0 %v7320_v31  ;;  %v7544_v30 = vcombine.high %v774_v11, %v778_v12  ;;  %v7672_v41 = vcombine.high %v902_v14, %v906_v16  ;;  %v766_v50 = vld [vmem:[#allocation8 + $0x8d8] sm:$0xff]  ;;  %v7671_v54 = vcombine.low %v902_v14, %v906_v16 }
 0x2c0   :  { %4160 = vmatprep.subr.bf16.mxu1 %v7448_v33  ;;  %v770_v51 = vld [vmem:[#allocation8 + $0x8f8] sm:$0xff] }
 0x2c1   :  { %v762_v62 = vld [vmem:[#allocation8 + $0x8b8] sm:$0xff] }
 0x2c2   :  { %4120 = vmatpush2.bf16.msra.mxu0 %v7319_v39  ;;  %v894_v39 = vld [vmem:[#allocation8 + $0xcd8] sm:$0xff] }
 0x2c3   :  { %4161 = vmatpush2.bf16.msra.mxu1 %v7447_v52  ;;  %4171 = vmatprep.subr.bf16.mxu0 %v7568_v53  ;;  %v898_v52 = vld [vmem:[#allocation8 + $0xcf8] sm:$0xff] }
 0x2c4   :  { %4212 = vmatprep.subr.bf16.mxu1 %v7696_v34  ;;  %v886_v63 = vld [vmem:[#allocation8 + $0xc98] sm:$0xff] }
 0x2c5   :  { %v3877_v45 = vpop.f32.mrf.mxu0  ;;  %4122 = vmatmul.mubr.bf16.vlgmr.msra.gmra.mxu0 %v9024_v19 }
 0x2c6   :  { %v3878_v5 = vadd.f32 %v3877_v45, %v9135_v26  ;;  %v3918_v6 = vpop.f32.mrf.mxu1  ;;  %4163 = vmatmul.mubr.bf16.vlgmr.msra.gmra.mxu1 %v9030_v23  ;;  %4172 = vmatpush1.bf16.msra.mxu0 %v7567_v56  ;;  %v7680_v26 = vcombine.high %v910_v0, %v914_v4  ;;  %v7536_v56 = vcombine.high %v766_v50, %v770_v51  ;;  %v890_v45 = vld [vmem:[#allocation8 + $0xcb8] sm:$0xff] }
 0x2c7   :  { %4203 = vmatprep.mubr.bf16.mxu0 %v9042_v38  ;;  %4213 = vmatpush1.bf16.msra.mxu1 %v7695_v57  ;;  %v3879_v8 = vpop.f32.mrf.mxu0  ;;  %v7664_v57 = vcombine.high %v894_v39, %v898_v52  ;;  %v7655_v14 = vcombine.low %v886_v63, %v890_v45 }
 0x2c8   :  { %v9144_v9 = vadd.f32 %v3918_v6, %v3878_v5  ;;  %4244 = vmatprep.mubr.bf16.mxu1 %v9044_v59  ;;  %v3880_v19 = vadd.f32 %v3879_v8, %v9138_v60  ;;  %v3920_v42 = vpop.f32.mrf.mxu1  ;;  %4173 = vmatprep.subr.bf16.mxu0 %v7560_v15  ;;  %v7679_v60 = vcombine.low %v910_v0, %v914_v4  ;;  %v758_v15 = vld [vmem:[#allocation8 + $0x898] sm:$0xff] }
 0x2c9   :  { %v3881_v23 = vpop.f32.mrf.mxu0  ;;  %4214 = vmatprep.subr.bf16.mxu1 %v7688_v20  ;;  %v7535_v4 = vcombine.low %v766_v50, %v770_v51  ;;  %v7663_v5 = vcombine.low %v894_v39, %v898_v52  ;;  %v7528_v6 = vcombine.high %v758_v15, %v762_v62 }
 0x2ca   :  { %v4265_v38 = vrot.slane %v9144_v9, 4  ;;  %v9149_v18 = vadd.f32 %v3920_v42, %v3880_v19  ;;  %v3922_v24 = vpop.f32.mrf.mxu1  ;;  %4174 = vmatpush1.bf16.msra.mxu0 %v7559_v7  ;;  %v754_v19 = vld [vmem:[#allocation8 + $0x878] sm:$0xff]  ;;  %v7527_v23 = vcombine.low %v758_v15, %v762_v62 }
 0x2cb   :  { %4215 = vmatpush1.bf16.msra.mxu1 %v7687_v22  ;;  %v3882_v59 = vpop.f32.mrf.mxu0  ;;  %4175 = vmatprep.subr.bf16.mxu0 %v7552_v10  ;;  %v7656_v22 = vcombine.high %v886_v63, %v890_v45  ;;  %v750_v10 = vld [vmem:[#allocation8 + $0x858] sm:$0xff] }
 0x2cc   :  { %v4266_v31 = vadd.f32 %v4265_v38, %v9144_v9  ;;  %v4271_v33 = vrot.slane %v9149_v18, 4  ;;  %v3923_v37 = vpop.f32.mrf.mxu1  ;;  %4216 = vmatprep.subr.bf16.mxu1 %v7680_v26  ;;  %v878_v42 = vld [vmem:[#allocation8 + $0xc58] sm:$0xff]  ;;  %v7520_v16 = vcombine.high %v750_v10, %v754_v19 }
 0x2cd   :  { %v882_v26 = vld [vmem:[#allocation8 + $0xc78] sm:$0xff] }
 0x2ce   :  { %v4267_v53 = vrot.slane %v4266_v31, 2  ;;  %v4272_v34 = vadd.f32 %v4271_v33, %v9149_v18  ;;  %4176 = vmatpush1.bf16.msra.mxu0 %v7551_v29  ;;  %v7648_v29 = vcombine.high %v878_v42, %v882_v26  ;;  %v742_v59 = vld [vmem:[#allocation8 + $0x818] sm:$0xff]  ;;  %v7647_v50 = vcombine.low %v878_v42, %v882_v26 }
 0x2cf   :  { %4217 = vmatpush1.bf16.msra.mxu1 %v7679_v60  ;;  %4177 = vmatprep.subr.bf16.mxu0 %v7544_v30  ;;  %v746_v60 = vld [vmem:[#allocation8 + $0x838] sm:$0xff] }
 0x2d0   :  { %v4268_v36 = vadd.f32 %v4267_v53, %v4266_v31  ;;  %v4273_v40 = vrot.slane %v4272_v34, 2  ;;  %4218 = vmatprep.subr.bf16.mxu1 %v7672_v41  ;;  %v870_v30 = vld [vmem:[#allocation8 + $0xc18] sm:$0xff]  ;;  %v7519_v41 = vcombine.low %v750_v10, %v754_v19  ;;  %v7512_v51 = vcombine.high %v742_v59, %v746_v60 }
 0x2d1   :  { %v874_v31 = vld [vmem:[#allocation8 + $0xc38] sm:$0xff] }
 0x2d2   :  { %v4269_v20 = vrot.slane %v4268_v36, 1  ;;  %v4274_v0 = vadd.f32 %v4273_v40, %v4272_v34  ;;  %4178 = vmatpush1.bf16.msra.mxu0 %v7543_v35  ;;  %v7640_v53 = vcombine.high %v870_v30, %v874_v31  ;;  %v862_v34 = vld [vmem:[#allocation8 + $0xbd8] sm:$0xff]  ;;  %v7639_v15 = vcombine.low %v870_v30, %v874_v31 }
 0x2d3   :  { %4219 = vmatpush1.bf16.msra.mxu1 %v7671_v54  ;;  %4179 = vmatprep.subr.bf16.mxu0 %v7536_v56  ;;  %v866_v35 = vld [vmem:[#allocation8 + $0xbf8] sm:$0xff] }
 0x2d4   :  { %v4270_v7 = vadd.f32 %v4269_v20, %v4268_v36  ;;  %v4275_v8 = vrot.slane %v4274_v0, 1  ;;  %4220 = vmatprep.subr.bf16.mxu1 %v7664_v57  ;;  %v990_v54 = vld [vmem:[#allocation8 + $0xfd8] sm:$0xff]  ;;  %v7511_v57 = vcombine.low %v742_v59, %v746_v60  ;;  %v7632_v62 = vcombine.high %v862_v34, %v866_v35 }
 0x2d5   :  { %v994_v56 = vld [vmem:[#allocation8 + $0xff8] sm:$0xff] }
 0x2d6   :  { %v9154_v11 = vmul.f32 0.125, %v4270_v7  ;;  %v4276_v12 = vadd.f32 %v4275_v8, %v4274_v0  ;;  %4180 = vmatpush1.bf16.msra.mxu0 %v7535_v4  ;;  %v7760_v20 = vcombine.high %v990_v54, %v994_v56  ;;  %v854_v0 = vld [vmem:[#allocation8 + $0xb98] sm:$0xff]  ;;  %v7759_v10 = vcombine.low %v990_v54, %v994_v56 }
 0x2d7   :  { %4221 = vmatpush1.bf16.msra.mxu1 %v7663_v5  ;;  %4181 = vmatprep.subr.bf16.mxu0 %v7528_v6  ;;  %v858_v4 = vld [vmem:[#allocation8 + $0xbb8] sm:$0xff] }
 0x2d8   :  { %v4312_v38 = vsub.f32 %v9144_v9, %v9154_v11  ;;  %v9158_v24 = vmul.f32 0.125, %v4276_v12  ;;  %4222 = vmatprep.subr.bf16.mxu1 %v7656_v22  ;;  %v982_v5 = vld [vmem:[#allocation8 + $0xf98] sm:$0xff]  ;;  %v7631_v22 = vcombine.low %v862_v34, %v866_v35  ;;  %v7624_v19 = vcombine.high %v854_v0, %v858_v4 }
 0x2d9   :  { %v986_v6 = vld [vmem:[#allocation8 + $0xfb8] sm:$0xff]  ;;  %v7623_v60 = vcombine.low %v854_v0, %v858_v4 }
 0x2da   :  { %v4320_v33 = vmul.f32 %v4312_v38, %v4312_v38  ;;  %v4313_v37 = vsub.f32 %v9149_v18, %v9158_v24  ;;  %4182 = vmatpush1.bf16.msra.mxu0 %v7527_v23  ;;  %v7752_v12 = vcombine.high %v982_v5, %v986_v6  ;;  %v846_v23 = vld [vmem:[#allocation8 + $0xb58] sm:$0xff]  ;;  %v7751_v30 = vcombine.low %v982_v5, %v986_v6 }
 0x2db   :  { %4223 = vmatpush1.bf16.msra.mxu1 %v7655_v14  ;;  %4183 = vmatprep.subr.bf16.mxu0 %v7520_v16  ;;  %v850_v14 = vld [vmem:[#allocation8 + $0xb78] sm:$0xff] }
 0x2dc   :  { %v4338_v39 = vrot.slane %v4320_v33, 4  ;;  %v4321_v52 = vmul.f32 %v4313_v37, %v4313_v37  ;;  %4224 = vmatprep.subr.bf16.mxu1 %v7648_v29  ;;  %v974_v16 = vld [vmem:[#allocation8 + $0xf58] sm:$0xff]  ;;  %v7616_v31 = vcombine.high %v846_v23, %v850_v14  ;;  %v7615_v35 = vcombine.low %v846_v23, %v850_v14 }
 0x2dd   :  { %v978_v38 = vld [vmem:[#allocation8 + $0xf78] sm:$0xff] }
 0x2de   :  { %v4339_v36 = vadd.f32 %v4338_v39, %v4320_v33  ;;  %v4344_v40 = vrot.slane %v4321_v52, 4  ;;  %4184 = vmatpush1.bf16.msra.mxu0 %v7519_v41  ;;  %v7744_v41 = vcombine.high %v974_v16, %v978_v38  ;;  %v966_v39 = vld [vmem:[#allocation8 + $0xf18] sm:$0xff]  ;;  %v7743_v54 = vcombine.low %v974_v16, %v978_v38 }
 0x2df   :  { %4225 = vmatpush1.bf16.msra.mxu1 %v7647_v50  ;;  %4185 = vmatprep.subr.bf16.mxu0 %v7512_v51  ;;  %v838_v50 = vld [vmem:[#allocation8 + $0xb18] sm:$0xff]  ;;  %v8887_v16 = vmov 1966171168  }
 0x2e0   :  { %v4340_v63 = vrot.slane %v4339_v36, 2  ;;  %v4345_v45 = vadd.f32 %v4344_v40, %v4321_v52  ;;  %4226 = vmatprep.subr.bf16.mxu1 %v7640_v53  ;;  %v842_v51 = vld [vmem:[#allocation8 + $0xb38] sm:$0xff]  ;;  %v4470_v38 = vunpack.c.l.s4 %v8887_v16 }
 0x2e1   :  { %v970_v52 = vld [vmem:[#allocation8 + $0xf38] sm:$0xff]  ;;  %v7608_v56 = vcombine.high %v838_v50, %v842_v51 }
 0x2e2   :  { %v4341_v7 = vadd.f32 %v4340_v63, %v4339_v36  ;;  %v4346_v8 = vrot.slane %v4345_v45, 2  ;;  %4186 = vmatpush1.bf16.msra.mxu0 %v7511_v57  ;;  %v7736_v40 = vcombine.high %v966_v39, %v970_v52  ;;  %v830_v57 = vld [vmem:[#allocation8 + $0xad8] sm:$0xff] }
 0x2e3   :  { %4227 = vmatpush1.bf16.msra.mxu1 %v7639_v15  ;;  %4187 = vmatprep.subr.bf16.mxu0 %v7632_v62  ;;  %v834_v15 = vld [vmem:[#allocation8 + $0xaf8] sm:$0xff] }
 0x2e4   :  { %v4342_v42 = vrot.slane %v4341_v7, 1  ;;  %v4347_v26 = vadd.f32 %v4346_v8, %v4345_v45  ;;  %4228 = vmatprep.subr.bf16.mxu1 %v7760_v20  ;;  %v958_v62 = vld [vmem:[#allocation8 + $0xed8] sm:$0xff]  ;;  %v7607_v45 = vcombine.low %v838_v50, %v842_v51  ;;  %v7735_v20 = vcombine.low %v966_v39, %v970_v52 }
 0x2e5   :  { %v962_v63 = vld [vmem:[#allocation8 + $0xef8] sm:$0xff]  ;;  %v7600_v0 = vcombine.high %v830_v57, %v834_v15  ;;  %v4471_v52 = vunpack.c.0.s8 %v4470_v38 }
 0x2e6   :  { %v4343_v29 = vadd.f32 %v4342_v42, %v4341_v7  ;;  %v4348_v59 = vrot.slane %v4347_v26, 1  ;;  %4188 = vmatpush2.bf16.msra.mxu0 %v7631_v22  ;;  %v7728_v4 = vcombine.high %v958_v62, %v962_v63  ;;  %v822_v5 = vld [vmem:[#allocation8 + $0xa98] sm:$0xff]  ;;  %v7599_v22 = vcombine.low %v830_v57, %v834_v15 }
 0x2e7   :  { %4229 = vmatpush2.bf16.msra.mxu1 %v7759_v10  ;;  %4189 = vmatprep.subr.bf16.mxu0 %v7624_v19  ;;  %v826_v6 = vld [vmem:[#allocation8 + $0xab8] sm:$0xff]  ;;  %v7727_v10 = vcombine.low %v958_v62, %v962_v63 }
 0x2e8   :  { %v4376_v33 = vmul.f32 0.125, %v4343_v29  ;;  %v4349_v37 = vadd.f32 %v4348_v59, %v4347_v26  ;;  %4230 = vmatprep.subr.bf16.mxu1 %v7752_v12  ;;  %v950_v7 = vld [vmem:[#allocation8 + $0xe98] sm:$0xff]  ;;  %v7592_v19 = vcombine.high %v822_v5, %v826_v6  ;;  %v4411_v29 = vrot.slane %v9108_v13, %v8994_v46 }
 0x2e9   :  { %v954_v8 = vld [vmem:[#allocation8 + $0xeb8] sm:$0xff]  ;;  %v7591_v59 = vcombine.low %v822_v5, %v826_v6 }
 0x2ea   :  { %v4384_v53 = vadd.f32 1e-05, %v4376_v33  ;;  %v4377_v34 = vmul.f32 0.125, %v4349_v37  ;;  %4190 = vmatpush2.bf16.msra.mxu0 %v7623_v60  ;;  %v7720_v42 = vcombine.high %v950_v7, %v954_v8  ;;  %v814_v26 = vld [vmem:[#allocation8 + $0xa58] sm:$0xff]  ;;  %v7719_v60 = vcombine.low %v950_v7, %v954_v8 }
 0x2eb   :  { %4231 = vmatpush2.bf16.msra.mxu1 %v7751_v30  ;;  %4191 = vmatprep.subr.bf16.mxu0 %v7616_v31  ;;  %v818_v12 = vld [vmem:[#allocation8 + $0xa78] sm:$0xff]  ;;  %v4415_v31 = vrot.slane %v9108_v13, %v9000_v48 }
 0x2ec   :  { %8637 = vrsqrt.f32 %v4384_v53  ;;  %v4385_v36 = vadd.f32 1e-05, %v4377_v34  ;;  %4232 = vmatprep.subr.bf16.mxu1 %v7744_v41  ;;  %v942_v23 = vld [vmem:[#allocation8 + $0xe58] sm:$0xff]  ;;  %v7584_v30 = vcombine.high %v814_v26, %v818_v12  ;;  %v7583_v34 = vcombine.low %v814_v26, %v818_v12 }
 0x2ed   :  { %v946_v14 = vld [vmem:[#allocation8 + $0xe78] sm:$0xff] }
 0x2ee   :  { %8639 = vrsqrt.f32 %v4385_v36  ;;  %4192 = vmatpush2.bf16.msra.mxu0 %v7615_v35  ;;  %v7712_v33 = vcombine.high %v942_v23, %v946_v14  ;;  %v806_v37 = vld [vmem:[#allocation8 + $0xa18] sm:$0xff] }
 0x2ef   :  { %4233 = vmatpush2.bf16.msra.mxu1 %v7743_v54  ;;  %4193 = vmatprep.subr.bf16.mxu0 %v7608_v56  ;;  %v810_v41 = vld [vmem:[#allocation8 + $0xa38] sm:$0xff]  ;;  %v7711_v54 = vcombine.low %v942_v23, %v946_v14 }
 0x2f0   :  { %4234 = vmatprep.subr.bf16.mxu1 %v7736_v40  ;;  %v934_v51 = vld [vmem:[#allocation8 + $0xe18] sm:$0xff]  ;;  %v7576_v56 = vcombine.high %v806_v37, %v810_v41  ;;  %v9171_v40 = vsub.s32 %v4471_v52, %v8986_v43  ;;  %v7575_v62 = vcombine.low %v806_v37, %v810_v41 }
 0x2f1   :  { %v938_v39 = vld [vmem:[#allocation8 + $0xe38] sm:$0xff] }
 0x2f2   :  { %4194 = vmatpush2.bf16.msra.mxu0 %v7607_v45  ;;  %v7704_v13 = vcombine.high %v934_v51, %v938_v39  ;;  %v7703_v63 = vcombine.low %v934_v51, %v938_v39 }
 0x2f3   :  { %4235 = vmatpush2.bf16.msra.mxu1 %v7735_v20  ;;  %4195 = vmatprep.subr.bf16.mxu0 %v7600_v0  ;;  %v9181_v20 = vrot.slane %v4465_v17, %v9171_v40 }
 0x2f4   :  { %4236 = vmatprep.subr.bf16.mxu1 %v7728_v4 }
 0x2f6   :  { %4196 = vmatpush2.bf16.msra.mxu0 %v7599_v22 }
 0x2f7   :  { %4237 = vmatpush2.bf16.msra.mxu1 %v7727_v10  ;;  %4197 = vmatprep.subr.bf16.mxu0 %v7592_v19 }
 0x2f8   :  { %4238 = vmatprep.subr.bf16.mxu1 %v7720_v42 }
 0x2f9   :  { %v8638_v50 = vpop.eup %8637 }
 0x2fa   :  { %v9166_v53 = vmul.f32 %v8638_v50, %v4411_v29  ;;  %4198 = vmatpush2.bf16.msra.mxu0 %v7591_v59 }
 0x2fb   :  { %v8640_v35 = vpop.eup %8639  ;;  %4239 = vmatpush2.bf16.msra.mxu1 %v7719_v60  ;;  %4199 = vmatprep.subr.bf16.mxu0 %v7584_v30 }
 0x2fc   :  { %v9168_v36 = vmul.f32 %v8640_v35, %v4415_v31  ;;  %4240 = vmatprep.subr.bf16.mxu1 %v7712_v33  ;;  %v4451_v57 = vmul.f32 %v9166_v53, %v9154_v11  ;;  %v9186_v11 = vld [vmem:[#allocation10] sm:$0xff] }
 0x2fd   :  { %v1020_v4 = vrot.slane %v9186_v11, %v9011_v61 }
 0x2fe   :  { %v4452_v15 = vmul.f32 %v9168_v36, %v9158_v24  ;;  %4200 = vmatpush2.bf16.msra.mxu0 %v7583_v34  ;;  %v1016_v24 = vrot.slane %v9186_v11, %v9049_v28 }
 0x2ff   :  { %4241 = vmatpush2.bf16.msra.mxu1 %v7711_v54  ;;  %4201 = vmatprep.subr.bf16.mxu0 %v7576_v56 }
 0x300   :  { %v4466_v45 = vcombine.low %v4451_v57, %v4452_v15  ;;  %4242 = vmatprep.subr.bf16.mxu1 %v7704_v13  ;;  %v8187_v13 = vld [vmem:[#allocation14 + $0x11c] ss:$20 sps:$4 sm:$0xff]  }
 0x301   :  { %v8190_v57 = vld [vmem:[#allocation14 + $0x39c] ss:$20 sps:$4 sm:$0xff]  }
 0x302   :  { %v9184_v43 = vrot.slane %v4466_v45, %v9171_v40  ;;  %4202 = vmatpush2.bf16.msra.mxu0 %v7575_v62  ;;  %v8188_v45 = vld [vmem:[#allocation14 + $0x398] ss:$20 sps:$4 sm:$0xff]  }
 0x303   :  { %4243 = vmatpush2.bf16.msra.mxu1 %v7703_v63  ;;  %v8185_v63 = vld [vmem:[#allocation14 + $0x118] ss:$20 sps:$4 sm:$0xff]   ;;  %6712 = vmatprep.subr.bf16.mxu0 %v8187_v13  ;;  %v8220_v13 = vld [vmem:[#allocation14 + $0x2d4] ss:$20 sps:$4 sm:$0xff]  }
 0x304   :  { %v4497_v0 = vcombine.low %v9181_v20, %v9184_v43  ;;  %6753 = vmatprep.subr.bf16.mxu1 %v8190_v57 }
 0x305   :  { %v3959_v5 = vpop.f32.mrf.mxu0  ;;  %4204 = vmatmul.mubr.bf16.vlgmr.msra.gmra.mxu0 %v9060_v25 }
 0x306   :  { %v3960_v2 = vadd.f32 %v3959_v5, %v1016_v24  ;;  %v4000_v3 = vpop.f32.mrf.mxu1  ;;  %4245 = vmatmul.mubr.bf16.vlgmr.msra.gmra.mxu1 %v9062_v27  ;;  %6713 = vmatpush1.bf16.msra.mxu0 %v8185_v63  ;;  %v8193_v5 = vld [vmem:[#allocation14 + $0xf4] ss:$20 sps:$4 sm:$0xff]   ;;  %v8215_v63 = vld [vmem:[#allocation14 + $0x50] ss:$20 sps:$4 sm:$0xff]  }
 0x307   :  { %v3961_v17 = vpop.f32.mrf.mxu0  ;;  %6754 = vmatpush1.bf16.msra.mxu1 %v8188_v45  ;;  %6714 = vmatprep.subr.bf16.mxu0 %v8193_v5  ;;  %v8218_v45 = vld [vmem:[#allocation14 + $0x2d0] ss:$20 sps:$4 sm:$0xff]   ;;  %v8223_v5 = vld [vmem:[#allocation14 + $0x2c] ss:$20 sps:$4 sm:$0xff]  }
 0x308   :  { %v4001_v6 = vadd.f32 %v4000_v3, %v3960_v2  ;;  %v3962_v7 = vadd.f32 %v3961_v17, %v1020_v4  ;;  %v4002_v8 = vpop.f32.mrf.mxu1  ;;  %v8196_v2 = vld [vmem:[#allocation14 + $0x374] ss:$20 sps:$4 sm:$0xff]  }
 0x309   :  { %v3963_v22 = vpop.f32.mrf.mxu0  ;;  %6755 = vmatprep.subr.bf16.mxu1 %v8196_v2  ;;  %v8226_v2 = vld [vmem:[#allocation14 + $0x2ac] ss:$20 sps:$4 sm:$0xff]  }
 0x30a   :  { %v4003_v10 = vadd.f32 %v4002_v8, %v3962_v7  ;;  %v4004_v19 = vpop.f32.mrf.mxu1  ;;  %v8194_v7 = vld [vmem:[#allocation14 + $0x370] ss:$20 sps:$4 sm:$0xff]  }
 0x30b   :  { %v3964_v42 = vpop.f32.mrf.mxu0  ;;  %6756 = vmatpush1.bf16.msra.mxu1 %v8194_v7  ;;  %v8202_v19 = vld [vmem:[#allocation14 + $0x34c] ss:$20 sps:$4 sm:$0xff]   ;;  %v8232_v7 = vld [vmem:[#allocation14 + $0x284] ss:$20 sps:$4 sm:$0xff]  }
 0x30c   :  { %v4005_v26 = vpop.f32.mrf.mxu1  ;;  %6757 = vmatprep.subr.bf16.mxu1 %v8202_v19  ;;  %v8238_v19 = vld [vmem:[#allocation14 + $0x4dc] ss:$20 sps:$4 sm:$0xff]  }
 0x345   :  { %v4041_v12 = vpop.f32.mrf.mxu0 }
 0x346   :  { %v4042_v23 = vadd.f32 %v4041_v12, %v4001_v6  ;;  %v4082_v14 = vpop.f32.mrf.mxu1  ;;  %v8191_v6 = vld [vmem:[#allocation14 + $0xf0] ss:$20 sps:$4 sm:$0xff]   ;;  %v8197_v12 = vld [vmem:[#allocation14 + $0xc8] ss:$20 sps:$4 sm:$0xff]  }
 0x347   :  { %v4043_v16 = vpop.f32.mrf.mxu0  ;;  %6715 = vmatpush1.bf16.msra.mxu0 %v8191_v6  ;;  %v8229_v6 = vld [vmem:[#allocation14 + $0x4] ss:$20 sps:$4 sm:$0xff]  }
 0x348   :  { %v9196_v38 = vadd.f32 %v4082_v14, %v4042_v23  ;;  %v4044_v25 = vadd.f32 %v4043_v16, %v4003_v10  ;;  %v4084_v29 = vpop.f32.mrf.mxu1  ;;  %v8199_v10 = vld [vmem:[#allocation14 + $0xcc] ss:$20 sps:$4 sm:$0xff]   ;;  %v8200_v23 = vld [vmem:[#allocation14 + $0x348] ss:$20 sps:$4 sm:$0xff]  }
 0x349   :  { %v4045_v59 = vpop.f32.mrf.mxu0  ;;  %6716 = vmatprep.subr.bf16.mxu0 %v8199_v10  ;;  %6758 = vmatpush1.bf16.msra.mxu1 %v8200_v23  ;;  %v8235_v10 = vld [vmem:[#allocation14 + $0x25c] ss:$20 sps:$4 sm:$0xff]   ;;  %v8236_v23 = vld [vmem:[#allocation14 + $0x4d8] ss:$20 sps:$4 sm:$0xff]  }
 0x34a   :  { %v4277_v27 = vrot.slane %v9196_v38, 4  ;;  %v9199_v60 = vadd.f32 %v4084_v29, %v4044_v25  ;;  %v4086_v30 = vpop.f32.mrf.mxu1  ;;  %v8205_v25 = vld [vmem:[#allocation14 + $0xa4] ss:$20 sps:$4 sm:$0xff]  }
 0x34b   :  { %v4046_v31 = vpop.f32.mrf.mxu0  ;;  %6717 = vmatpush1.bf16.msra.mxu0 %v8197_v12  ;;  %v8208_v29 = vld [vmem:[#allocation14 + $0x324] ss:$20 sps:$4 sm:$0xff]   ;;  %v8203_v30 = vld [vmem:[#allocation14 + $0xa0] ss:$20 sps:$4 sm:$0xff]  }
 0x34c   :  { %v4278_v33 = vadd.f32 %v4277_v27, %v9196_v38  ;;  %v4283_v37 = vrot.slane %v9199_v60, 4  ;;  %v4087_v41 = vpop.f32.mrf.mxu1  ;;  %v8206_v31 = vld [vmem:[#allocation14 + $0x320] ss:$20 sps:$4 sm:$0xff]   ;;  %6718 = vmatprep.subr.bf16.mxu0 %v8205_v25  ;;  %6759 = vmatprep.subr.bf16.mxu1 %v8208_v29  ;;  %v8233_v12 = vld [vmem:[#allocation14 + $0x258] ss:$20 sps:$4 sm:$0xff]  }
 0x34d   :  { %6760 = vmatpush1.bf16.msra.mxu1 %v8206_v31  ;;  %v8211_v41 = vld [vmem:[#allocation14 + $0x7c] ss:$20 sps:$4 sm:$0xff]   ;;  %v8241_v25 = vld [vmem:[#allocation14 + $0x234] ss:$20 sps:$4 sm:$0xff]  }
 0x34e   :  { %v4279_v50 = vrot.slane %v4278_v33, 2  ;;  %v4284_v51 = vadd.f32 %v4283_v37, %v9199_v60  ;;  %v8244_v29 = vld [vmem:[#allocation14 + $0x4b4] ss:$20 sps:$4 sm:$0xff]  }
 0x34f   :  { %6719 = vmatpush1.bf16.msra.mxu0 %v8203_v30  ;;  %v8242_v30 = vld [vmem:[#allocation14 + $0x4b0] ss:$20 sps:$4 sm:$0xff]  }
 0x350   :  { %v4280_v39 = vadd.f32 %v4279_v50, %v4278_v33  ;;  %v4285_v52 = vrot.slane %v4284_v51, 2  ;;  %v8214_v50 = vld [vmem:[#allocation14 + $0x2fc] ss:$20 sps:$4 sm:$0xff]   ;;  %6720 = vmatprep.subr.bf16.mxu0 %v8211_v41  ;;  %v8247_v41 = vld [vmem:[#allocation14 + $0x20c] ss:$20 sps:$4 sm:$0xff]  }
 0x351   :  { %6761 = vmatprep.subr.bf16.mxu1 %v8214_v50  ;;  %v8250_v50 = vld [vmem:[#allocation14 + $0x48c] ss:$20 sps:$4 sm:$0xff]  }
 0x352   :  { %v4281_v34 = vrot.slane %v4280_v39, 1  ;;  %v4286_v35 = vadd.f32 %v4285_v52, %v4284_v51  ;;  %v8209_v52 = vld [vmem:[#allocation14 + $0x78] ss:$20 sps:$4 sm:$0xff]  }
 0x353   :  { %6721 = vmatpush1.bf16.msra.mxu0 %v8209_v52 }
 0x354   :  { %v4282_v54 = vadd.f32 %v4281_v34, %v4280_v39  ;;  %v4287_v56 = vrot.slane %v4286_v35, 1  ;;  %v8212_v34 = vld [vmem:[#allocation14 + $0x2f8] ss:$20 sps:$4 sm:$0xff]  }
 0x355   :  { %6762 = vmatpush1.bf16.msra.mxu1 %v8212_v34  ;;  %v8245_v34 = vld [vmem:[#allocation14 + $0x208] ss:$20 sps:$4 sm:$0xff]  }
 0x356   :  { %v9204_v15 = vmul.f32 0.125, %v4282_v54  ;;  %v4288_v62 = vadd.f32 %v4287_v56, %v4286_v35  ;;  %v8217_v56 = vld [vmem:[#allocation14 + $0x54] ss:$20 sps:$4 sm:$0xff]   ;;  %6763 = vmatprep.subr.bf16.mxu1 %v8220_v13  ;;  %v8256_v13 = vld [vmem:[#allocation14 + $0x464] ss:$20 sps:$4 sm:$0xff]  }
 0x357   :  { %6722 = vmatprep.subr.bf16.mxu0 %v8217_v56  ;;  %v8253_v56 = vld [vmem:[#allocation14 + $0x1e4] ss:$20 sps:$4 sm:$0xff]  }
 0x358   :  { %v4314_v24 = vsub.f32 %v9196_v38, %v9204_v15  ;;  %v9208_v4 = vmul.f32 0.125, %v4288_v62  ;;  %6723 = vmatpush1.bf16.msra.mxu0 %v8215_v63 }
 0x359   :  { %6764 = vmatpush1.bf16.msra.mxu1 %v8218_v45  ;;  %6724 = vmatprep.subr.bf16.mxu0 %v8223_v5  ;;  %v8257_v45 = vld [vmem:[#allocation14 + $0x1b8] ss:$20 sps:$4 sm:$0xff]  }
 0x35a   :  { %v4322_v3 = vmul.f32 %v4314_v24, %v4314_v24  ;;  %v4315_v17 = vsub.f32 %v9199_v60, %v9208_v4  ;;  %6765 = vmatprep.subr.bf16.mxu1 %v8226_v2 }
 0x35c   :  { %v4350_v8 = vrot.slane %v4322_v3, 4  ;;  %v4323_v22 = vmul.f32 %v4315_v17, %v4315_v17  ;;  %v8224_v17 = vld [vmem:[#allocation14 + $0x2a8] ss:$20 sps:$4 sm:$0xff]  }
 0x35d   :  { %6766 = vmatpush1.bf16.msra.mxu1 %v8224_v17  ;;  %v8265_v17 = vld [vmem:[#allocation14 + $0x194] ss:$20 sps:$4 sm:$0xff]  }
 0x35e   :  { %v4351_v42 = vadd.f32 %v4350_v8, %v4322_v3  ;;  %v4356_v26 = vrot.slane %v4323_v22, 4  ;;  %v8221_v3 = vld [vmem:[#allocation14 + $0x28] ss:$20 sps:$4 sm:$0xff]   ;;  %v8227_v8 = vld [vmem:[#allocation14] ss:$20 sps:$4 sm:$0xff]   ;;  %6767 = vmatprep.subr.bf16.mxu1 %v8232_v7 }
 0x35f   :  { %6725 = vmatpush1.bf16.msra.mxu0 %v8221_v3 }
 0x360   :  { %v4352_v14 = vrot.slane %v4351_v42, 2  ;;  %v4357_v16 = vadd.f32 %v4356_v26, %v4323_v22  ;;  %v8230_v22 = vld [vmem:[#allocation14 + $0x280] ss:$20 sps:$4 sm:$0xff]   ;;  %6726 = vmatprep.subr.bf16.mxu0 %v8229_v6 }
 0x361   :  { %6768 = vmatpush1.bf16.msra.mxu1 %v8230_v22  ;;  %v8268_v6 = vld [vmem:[#allocation14 + $0x414] ss:$20 sps:$4 sm:$0xff]   ;;  %v8266_v22 = vld [vmem:[#allocation14 + $0x410] ss:$20 sps:$4 sm:$0xff]  }
 0x362   :  { %v4353_v59 = vadd.f32 %v4352_v14, %v4351_v42  ;;  %v4358_v27 = vrot.slane %v4357_v16, 2  ;;  %v9212_v42 = vld [vmem:[#allocation11] sm:$0xff]  ;;  %6769 = vmatprep.subr.bf16.mxu1 %v8238_v19  ;;  %v8271_v19 = vld [vmem:[#allocation14 + $0x16c] ss:$20 sps:$4 sm:$0xff]  }
 0x363   :  { %6727 = vmatpush1.bf16.msra.mxu0 %v8227_v8  ;;  %v4419_v26 = vrot.slane %v9212_v42, %v9049_v28  ;;  %v4423_v14 = vrot.slane %v9212_v42, %v9011_v61  ;;  %v8263_v8 = vld [vmem:[#allocation14 + $0x190] ss:$20 sps:$4 sm:$0xff]  }
 0x364   :  { %v4354_v33 = vrot.slane %v4353_v59, 1  ;;  %v4359_v37 = vadd.f32 %v4358_v27, %v4357_v16  ;;  %6728 = vmatprep.subr.bf16.mxu0 %v8235_v10  ;;  %v8239_v27 = vld [vmem:[#allocation14 + $0x230] ss:$20 sps:$4 sm:$0xff]  }
 0x365   :  { %6770 = vmatpush2.bf16.msra.mxu1 %v8236_v23  ;;  %v8269_v23 = vld [vmem:[#allocation14 + $0x168] ss:$20 sps:$4 sm:$0xff]  }
 0x366   :  { %v4355_v51 = vadd.f32 %v4354_v33, %v4353_v59  ;;  %v4360_v39 = vrot.slane %v4359_v37, 1  ;;  %6771 = vmatprep.subr.bf16.mxu1 %v8244_v29  ;;  %v8275_v29 = vld [vmem:[#allocation14 + $0x140] ss:$20 sps:$4 sm:$0xff]  }
 0x367   :  { %6729 = vmatpush2.bf16.msra.mxu0 %v8233_v12 }
 0x368   :  { %v4378_v35 = vmul.f32 0.125, %v4355_v51  ;;  %v4361_v54 = vadd.f32 %v4360_v39, %v4359_v37  ;;  %6730 = vmatprep.subr.bf16.mxu0 %v8241_v25  ;;  %v8280_v25 = vld [vmem:[#allocation14 + $0x3c4] ss:$20 sps:$4 sm:$0xff]  }
 0x369   :  { %6772 = vmatpush2.bf16.msra.mxu1 %v8242_v30  ;;  %v8286_v30 = vld [vmem:[#allocation14 + $0x89c] ss:$20 sps:$4 sm:$0xff]  }
 0x36a   :  { %v4386_v57 = vadd.f32 1e-05, %v4378_v35  ;;  %v4379_v62 = vmul.f32 0.125, %v4361_v54  ;;  %v8248_v35 = vld [vmem:[#allocation14 + $0x488] ss:$20 sps:$4 sm:$0xff]   ;;  %6773 = vmatprep.subr.bf16.mxu1 %v8250_v50 }
 0x36b   :  { %6731 = vmatpush2.bf16.msra.mxu0 %v8239_v27  ;;  %v8283_v27 = vld [vmem:[#allocation14 + $0x61c] ss:$20 sps:$4 sm:$0xff]  }
 0x36c   :  { %8641 = vrsqrt.f32 %v4386_v57  ;;  %v4387_v24 = vadd.f32 1e-05, %v4379_v62  ;;  %6732 = vmatprep.subr.bf16.mxu0 %v8247_v41  ;;  %v8254_v57 = vld [vmem:[#allocation14 + $0x460] ss:$20 sps:$4 sm:$0xff]   ;;  %v8262_v62 = vld [vmem:[#allocation14 + $0x43c] ss:$20 sps:$4 sm:$0xff]  }
 0x36d   :  { %6774 = vmatpush2.bf16.msra.mxu1 %v8248_v35 }
 0x36e   :  { %8643 = vrsqrt.f32 %v4387_v24  ;;  %6775 = vmatprep.subr.bf16.mxu1 %v8256_v13  ;;  %v8260_v24 = vld [vmem:[#allocation14 + $0x438] ss:$20 sps:$4 sm:$0xff]  }
 0x36f   :  { %6733 = vmatpush2.bf16.msra.mxu0 %v8245_v34 }
 0x370   :  { %6734 = vmatprep.subr.bf16.mxu0 %v8253_v56 }
 0x371   :  { %6776 = vmatpush2.bf16.msra.mxu1 %v8254_v57 }
 0x372   :  { %6777 = vmatprep.subr.bf16.mxu1 %v8262_v62 }
 0x375   :  { %6778 = vmatpush2.bf16.msra.mxu1 %v8260_v24 }
 0x376   :  { %6779 = vmatprep.subr.bf16.mxu1 %v8268_v6 }
 0x379   :  { %v8642_v16 = vpop.eup %8641  ;;  %6780 = vmatpush2.bf16.msra.mxu1 %v8266_v22 }
 0x37a   :  { %v4444_v59 = vmul.f32 %v8642_v16, %v4419_v26  ;;  %v8274_v26 = vld [vmem:[#allocation14 + $0x3ec] ss:$20 sps:$4 sm:$0xff]   ;;  %v8277_v16 = vld [vmem:[#allocation14 + $0x144] ss:$20 sps:$4 sm:$0xff]  }
 0x37b   :  { %v8644_v31 = vpop.eup %8643  ;;  %6781 = vmatprep.subr.bf16.mxu1 %v8274_v26 }
 0x37c   :  { %v4535_v33 = vrot.slane %v4444_v59, %v8989_v44  ;;  %v9219_v37 = vmul.f32 %v8644_v31, %v4423_v14  ;;  %v9222_v51 = vmul.f32 %v4444_v59, %v9204_v15  ;;  %v8251_v15 = vld [vmem:[#allocation14 + $0x1e0] ss:$20 sps:$4 sm:$0xff]   ;;  %v8272_v14 = vld [vmem:[#allocation14 + $0x3e8] ss:$20 sps:$4 sm:$0xff]   ;;  %v1024_v31 = vrot.slane %v9186_v11, %v9052_v32 }
 0x37d   :  { %6735 = vmatpush2.bf16.msra.mxu0 %v8251_v15  ;;  %6782 = vmatpush2.bf16.msra.mxu1 %v8272_v14  ;;  %v8278_v59 = vld [vmem:[#allocation14 + $0x3c0] ss:$20 sps:$4 sm:$0xff]  }
 0x37e   :  { %v9225_v39 = vmul.f32 %v4535_v33, %v9196_v38  ;;  %v9229_v52 = vmul.f32 %v9219_v37, %v9208_v4  ;;  %v8259_v4 = vld [vmem:[#allocation14 + $0x1bc] ss:$20 sps:$4 sm:$0xff]   ;;  %6783 = vmatprep.subr.bf16.mxu1 %v8280_v25  ;;  %v1028_v33 = vrot.slane %v9186_v11, %v9014_v1 }
 0x37f   :  { %6736 = vmatprep.subr.bf16.mxu0 %v8259_v4 }
 0x380   :  { %v4467_v54 = vcombine.low %v9222_v51, %v9229_v52  ;;  %v4527_v51 = vrot.slane %v9166_v53, %v8989_v44  ;;  %v4531_v52 = vrot.slane %v9168_v36, %v8989_v44 }
 0x381   :  { %6737 = vmatpush2.bf16.msra.mxu0 %v8257_v45  ;;  %6784 = vmatpush2.bf16.msra.mxu1 %v8278_v59 }
 0x382   :  { %6738 = vmatprep.subr.bf16.mxu0 %v8265_v17  ;;  %6835 = vmatprep.subr.bf16.mxu1 %v8286_v30 }
 0x385   :  { %v4123_v38 = vpop.f32.mrf.mxu0  ;;  %6739 = vmatpush2.bf16.msra.mxu0 %v8263_v8 }
 0x386   :  { %v4164_v63 = vpop.f32.mrf.mxu1  ;;  %6740 = vmatprep.subr.bf16.mxu0 %v8271_v19  ;;  %v4124_v41 = vadd.f32 %v4123_v38, %v1024_v31 }
 0x387   :  { %v4125_v5 = vpop.f32.mrf.mxu0 }
 0x388   :  { %v4166_v2 = vpop.f32.mrf.mxu1  ;;  %v4126_v50 = vadd.f32 %v4125_v5, %v1028_v33  ;;  %v4165_v34 = vadd.f32 %v4164_v63, %v4124_v41 }
 0x389   :  { %v4127_v3 = vpop.f32.mrf.mxu0  ;;  %6741 = vmatpush2.bf16.msra.mxu0 %v8269_v23 }
 0x38a   :  { %v4168_v7 = vpop.f32.mrf.mxu1  ;;  %6742 = vmatprep.subr.bf16.mxu0 %v8277_v16  ;;  %v4167_v56 = vadd.f32 %v4166_v2, %v4126_v50 }
 0x38b   :  { %v4128_v10 = vpop.f32.mrf.mxu0 }
 0x38c   :  { %v4169_v12 = vpop.f32.mrf.mxu1 }
 0x38d   :  { %6743 = vmatpush2.bf16.msra.mxu0 %v8275_v29 }
 0x38e   :  { %6794 = vmatprep.subr.bf16.mxu0 %v8283_v27 }
 0x3c5   :  { %v4205_v35 = vpop.f32.mrf.mxu0 }
 0x3c6   :  { %v4206_v13 = vadd.f32 %v4205_v35, %v4165_v34  ;;  %v4246_v15 = vpop.f32.mrf.mxu1 }
 0x3c7   :  { %v4207_v57 = vpop.f32.mrf.mxu0 }
 0x3c8   :  { %v4247_v4 = vadd.f32 %v4246_v15, %v4206_v13  ;;  %v4208_v62 = vadd.f32 %v4207_v57, %v4167_v56  ;;  %v4248_v45 = vpop.f32.mrf.mxu1 }
 0x3c9   :  { %v4209_v24 = vpop.f32.mrf.mxu0 }
 0x3ca   :  { %v4289_v3 = vrot.slane %v4247_v4, 4  ;;  %v9237_v17 = vadd.f32 %v4248_v45, %v4208_v62  ;;  %v4250_v6 = vpop.f32.mrf.mxu1 }
 0x3cb   :  { %v4210_v7 = vpop.f32.mrf.mxu0 }
 0x3cc   :  { %v4290_v8 = vadd.f32 %v4289_v3, %v4247_v4  ;;  %v4295_v11 = vrot.slane %v9237_v17, 4  ;;  %v4251_v38 = vpop.f32.mrf.mxu1  ;;  %v4427_v7 = vrot.slane %v9212_v42, %v9052_v32 }
 0x3ce   :  { %v4291_v5 = vrot.slane %v4290_v8, 2  ;;  %v4296_v63 = vadd.f32 %v4295_v11, %v9237_v17 }
 0x3d0   :  { %v4292_v2 = vadd.f32 %v4291_v5, %v4290_v8  ;;  %v4297_v22 = vrot.slane %v4296_v63, 2  ;;  %v4431_v8 = vrot.slane %v9212_v42, %v9014_v1  ;;  %v4519_v42 = vrot.slane %v9114_v55, %v8989_v44  ;;  %v4448_v55 = vld [vmem:[#allocation13] sm:$0xff] }
 0x3d2   :  { %v4293_v10 = vrot.slane %v4292_v2, 1  ;;  %v4298_v19 = vadd.f32 %v4297_v22, %v4296_v63 }
 0x3d4   :  { %v4294_v26 = vadd.f32 %v4293_v10, %v4292_v2  ;;  %v4299_v12 = vrot.slane %v4298_v19, 1 }
 0x3d6   :  { %v4308_v23 = vmul.f32 0.125, %v4294_v26  ;;  %v4300_v14 = vadd.f32 %v4299_v12, %v4298_v19  ;;  %v4489_v12 = vrot.slane %v4467_v54, %v9171_v40  ;;  %v4539_v54 = vrot.slane %v9219_v37, %v8989_v44 }
 0x3d8   :  { %v4316_v16 = vsub.f32 %v4247_v4, %v4308_v23  ;;  %v4309_v25 = vmul.f32 0.125, %v4300_v14  ;;  %v4553_v53 = vmul.f32 %v4539_v54, %v9199_v60  ;;  %v8307_v54 = vld [vmem:[#allocation14 + $0x57c] ss:$20 sps:$4 sm:$0xff]  }
 0x3da   :  { %v4324_v29 = vmul.f32 %v4316_v16, %v4316_v16  ;;  %v4317_v59 = vsub.f32 %v9237_v17, %v4309_v25 }
 0x3dc   :  { %v4362_v27 = vrot.slane %v4324_v29, 4  ;;  %v4325_v30 = vmul.f32 %v4317_v59, %v4317_v59  ;;  %v4548_v59 = vmul.f32 %v4519_v42, %v9090_v21  ;;  %v8293_v42 = vld [vmem:[#allocation14 + $0x5c8] ss:$20 sps:$4 sm:$0xff]  }
 0x3de   :  { %v4363_v31 = vadd.f32 %v4362_v27, %v4324_v29  ;;  %v4368_v33 = vrot.slane %v4325_v30, 4  ;;  %v4523_v29 = vrot.slane %v9116_v58, %v8989_v44 }
 0x3e0   :  { %v4364_v41 = vrot.slane %v4363_v31, 2  ;;  %v4369_v50 = vadd.f32 %v4368_v33, %v4325_v30  ;;  %v4549_v20 = vmul.f32 %v4523_v29, %v9095_v49  ;;  %v8296_v29 = vld [vmem:[#allocation14 + $0x848] ss:$20 sps:$4 sm:$0xff]  }
 0x3e2   :  { %v4365_v34 = vadd.f32 %v4364_v41, %v4363_v31  ;;  %v4370_v35 = vrot.slane %v4369_v50, 2 }
 0x3e4   :  { %v4366_v56 = vrot.slane %v4365_v34, 1  ;;  %v4371_v13 = vadd.f32 %v4370_v35, %v4369_v50 }
 0x3e6   :  { %v4367_v15 = vadd.f32 %v4366_v56, %v4365_v34  ;;  %v4372_v57 = vrot.slane %v4371_v13, 1 }
 0x3e8   :  { %v4380_v62 = vmul.f32 0.125, %v4367_v15  ;;  %v4373_v45 = vadd.f32 %v4372_v57, %v4371_v13 }
 0x3ea   :  { %v4388_v24 = vadd.f32 1e-05, %v4380_v62  ;;  %v4381_v3 = vmul.f32 0.125, %v4373_v45 }
 0x3ec   :  { %8645 = vrsqrt.f32 %v4388_v24  ;;  %v4389_v6 = vadd.f32 1e-05, %v4381_v3  ;;  %v8284_v3 = vld [vmem:[#allocation14 + $0x898] ss:$20 sps:$4 sm:$0xff]  }
 0x3ee   :  { %8647 = vrsqrt.f32 %v4389_v6 }
 0x3f9   :  { %v8646_v11 = vpop.eup %8645 }
 0x3fa   :  { %v4446_v38 = vmul.f32 %v8646_v11, %v4427_v7 }
 0x3fb   :  { %v8648_v5 = vpop.eup %8647 }
 0x3fc   :  { %v4543_v63 = vrot.slane %v4446_v38, %v8989_v44  ;;  %v4447_v2 = vmul.f32 %v8648_v5, %v4431_v8  ;;  %v4455_v22 = vmul.f32 %v4446_v38, %v4308_v23  ;;  %v8289_v5 = vld [vmem:[#allocation14 + $0x5f4] ss:$20 sps:$4 sm:$0xff]  }
 0x3fe   :  { %v4554_v10 = vmul.f32 %v4543_v63, %v4247_v4  ;;  %v4456_v19 = vmul.f32 %v4447_v2, %v4309_v25  ;;  %v4505_v4 = vrot.slane %v4497_v0, %v9171_v40  ;;  %v4547_v25 = vrot.slane %v4447_v2, %v8989_v44  ;;  %v8292_v2 = vld [vmem:[#allocation14 + $0x874] ss:$20 sps:$4 sm:$0xff]  }
 0x3ff   :  { %v4551_v0 = vmul.f32 %v4531_v52, %v9149_v18  ;;  %v8302_v52 = vld [vmem:[#allocation14 + $0x820] ss:$20 sps:$4 sm:$0xff]  }
 0x400   :  { %v4468_v26 = vcombine.low %v4455_v22, %v4456_v19  ;;  %v4555_v36 = vmul.f32 %v4547_v25, %v9237_v17  ;;  %v8287_v19 = vld [vmem:[#allocation14 + $0x5f0] ss:$20 sps:$4 sm:$0xff]   ;;  %v8305_v25 = vld [vmem:[#allocation14 + $0x578] ss:$20 sps:$4 sm:$0xff]  }
 0x402   :  { %v4496_v14 = vrot.slane %v4468_v26, %v9171_v40  ;;  %v8290_v26 = vld [vmem:[#allocation14 + $0x870] ss:$20 sps:$4 sm:$0xff]  }
 0x404   :  { %v4498_v16 = vcombine.low %v4489_v12, %v4496_v14  ;;  %v8295_v14 = vld [vmem:[#allocation14 + $0x5cc] ss:$20 sps:$4 sm:$0xff]  }
 0x406   :  { %v4512_v23 = vrot.slane %v4498_v16, %v9171_v40  ;;  %v4550_v40 = vmul.f32 %v4527_v51, %v9144_v9  ;;  %v8298_v16 = vld [vmem:[#allocation14 + $0x84c] ss:$20 sps:$4 sm:$0xff]  }
 0x407   :  { %v8299_v51 = vld [vmem:[#allocation14 + $0x5a0] ss:$20 sps:$4 sm:$0xff]  }
 0x408   :  { %v4513_v58 = vcombine.low %v4505_v4, %v4512_v23  ;;  %v8301_v4 = vld [vmem:[#allocation14 + $0x5a4] ss:$20 sps:$4 sm:$0xff]  }
 0x409   :  { %v8304_v23 = vld [vmem:[#allocation14 + $0x824] ss:$20 sps:$4 sm:$0xff]  }
 0x40a   :  { %v4515_v43 = vsub.f32 %v4448_v55, %v4513_v58  ;;  %v8310_v55 = vld [vmem:[#allocation14 + $0x7fc] ss:$20 sps:$4 sm:$0xff]   ;;  %v8308_v58 = vld [vmem:[#allocation14 + $0x7f8] ss:$20 sps:$4 sm:$0xff]  }
 0x40c   :  { %v4564_v27 = vrot.slane %v4515_v43, %v8997_v47  ;;  %v4572_v37 = vrot.slane %v4515_v43, %v9000_v48  ;;  %v4560_v30 = vrot.slane %v4515_v43, %v8989_v44  ;;  %v4568_v31 = vrot.slane %v4515_v43, %v8994_v46 }
 0x40d   :  { %v4580_v21 = vrot.slane %v4515_v43, %v9011_v61  ;;  %v4588_v49 = vrot.slane %v4515_v43, %v9014_v1  ;;  %v4576_v9 = vrot.slane %v4515_v43, %v9049_v28  ;;  %v4584_v18 = vrot.slane %v4515_v43, %v9052_v32  ;;  %v8311_v43 = vld [vmem:[#allocation14 + $0x550] ss:$20 sps:$4 sm:$0xff]  }
 0x40e   :  { %v4598_v33 = vadd.f32 %v4564_v27, %v4549_v20  ;;  %v4600_v60 = vadd.f32 %v4572_v37, %v4551_v0  ;;  %v4597_v41 = vadd.f32 %v4560_v30, %v4548_v59  ;;  %v4599_v17 = vadd.f32 %v4568_v31, %v4550_v40  ;;  %v8313_v59 = vld [vmem:[#allocation14 + $0x554] ss:$20 sps:$4 sm:$0xff]   ;;  %v8314_v40 = vld [vmem:[#allocation14 + $0x7d0] ss:$20 sps:$4 sm:$0xff]   ;;  %v8319_v0 = vld [vmem:[#allocation14 + $0x52c] ss:$20 sps:$4 sm:$0xff]  }
 0x40f   :  { %v4602_v50 = vadd.f32 %v4580_v21, %v4553_v53  ;;  %v4604_v34 = vadd.f32 %v4588_v49, %v4555_v36  ;;  %v9283_v35 = vadd.f32 %v4576_v9, %v9225_v39  ;;  %v9285_v56 = vadd.f32 %v4584_v18, %v4554_v10  ;;  %v8281_v39 = vld [vmem:[#allocation14 + $0x618] ss:$20 sps:$4 sm:$0xff]   ;;  %v8316_v20 = vld [vmem:[#allocation14 + $0x7d4] ss:$20 sps:$4 sm:$0xff]   ;;  %v8331_v49 = vld [vmem:[#allocation14 + $0x75c] ss:$20 sps:$4 sm:$0xff]  }
 0x410   :  { %vm4606_vm9 = vcmp.gt.f32.partialorder %v4598_v33, 0.0  ;;  %v4614_v13 = vmul.f32 0.2, %v4598_v33  ;;  %vm4608_vm10 = vcmp.gt.f32.partialorder %v4600_v60, 0.0  ;;  %v4616_v61 = vmul.f32 0.2, %v4600_v60 }
 0x411   :  { %vm4605_vm11 = vcmp.gt.f32.partialorder %v4597_v41, 0.0  ;;  %v4613_v1 = vmul.f32 0.2, %v4597_v41  ;;  %vm4607_vm12 = vcmp.gt.f32.partialorder %v4599_v17, 0.0  ;;  %v4615_v15 = vmul.f32 0.2, %v4599_v17 }
 0x412   :  { %v4622_v32 = vsel %vm4606_vm9, %v4598_v33, %v4614_v13  ;;  %v4624_v57 = vsel %vm4608_vm10, %v4600_v60, %v4616_v61  ;;  %vm4610_vm13 = vcmp.gt.f32.partialorder %v4602_v50, 0.0  ;;  %v4618_v62 = vmul.f32 0.2, %v4602_v50  ;;  %v8322_v53 = vld [vmem:[#allocation14 + $0x7ac] ss:$20 sps:$4 sm:$0xff]  }
 0x413   :  { %v9287_v45 = vpack.c.bf16 %v4622_v32, %v4622_v32  ;;  %v9289_v24 = vpack.c.bf16 %v4624_v57, %v4624_v57  ;;  %v4621_v6 = vsel %vm4605_vm11, %v4597_v41, %v4613_v1  ;;  %v4623_v7 = vsel %vm4607_vm12, %v4599_v17, %v4615_v15  ;;  %v8317_v36 = vld [vmem:[#allocation14 + $0x528] ss:$20 sps:$4 sm:$0xff]   ;;  %v8325_v37 = vld [vmem:[#allocation14 + $0x504] ss:$20 sps:$4 sm:$0xff]   ;;  %v8323_v31 = vld [vmem:[#allocation14 + $0x500] ss:$20 sps:$4 sm:$0xff]  }
 0x414   :  { %v9291_v8 = vpack.c.bf16 %v4621_v6, %v4621_v6  ;;  %v9293_v11 = vpack.c.bf16 %v4623_v7, %v4623_v7  ;;  %v4626_v38 = vsel %vm4610_vm13, %v4602_v50, %v4618_v62  ;;  %vm4612_vm14 = vcmp.gt.f32.partialorder %v4604_v34, 0.0  ;;  %v8320_v27 = vld [vmem:[#allocation14 + $0x7a8] ss:$20 sps:$4 sm:$0xff]   ;;  %v8328_v30 = vld [vmem:[#allocation14 + $0x784] ss:$20 sps:$4 sm:$0xff]  }
 0x415   :  { %6744 = vmatprep.mubr.bf16.mxu0 %v9287_v45  ;;  %6785 = vmatprep.mubr.bf16.mxu1 %v9289_v24  ;;  %v4620_v63 = vmul.f32 0.2, %v4604_v34  ;;  %v9299_v22 = vpack.c.bf16 %v4626_v38, %v4626_v38  ;;  %v8326_v21 = vld [vmem:[#allocation14 + $0x780] ss:$20 sps:$4 sm:$0xff]   ;;  %v8334_v9 = vld [vmem:[#allocation14 + $0x9dc] ss:$20 sps:$4 sm:$0xff]  }
 0x416   :  { %6745 = vmatmul.mubr.bf16.vlgmr.msra.gmra.mxu0 %v9291_v8  ;;  %6786 = vmatmul.mubr.bf16.vlgmr.msra.gmra.mxu1 %v9293_v11  ;;  %v8329_v18 = vld [vmem:[#allocation14 + $0x758] ss:$20 sps:$4 sm:$0xff]   ;;  %v8337_v60 = vld [vmem:[#allocation14 + $0x734] ss:$20 sps:$4 sm:$0xff]   ;;  %v8335_v17 = vld [vmem:[#allocation14 + $0x730] ss:$20 sps:$4 sm:$0xff]  }
 0x417   :  { %6795 = vmatpush1.bf16.msra.mxu0 %v8281_v39  ;;  %6836 = vmatpush1.bf16.msra.mxu1 %v8284_v3  ;;  %v4628_v10 = vsel %vm4612_vm14, %v4604_v34, %v4620_v63  ;;  %v8332_v33 = vld [vmem:[#allocation14 + $0x9d8] ss:$20 sps:$4 sm:$0xff]   ;;  %v8340_v41 = vld [vmem:[#allocation14 + $0x9b4] ss:$20 sps:$4 sm:$0xff]   ;;  %v8338_v50 = vld [vmem:[#allocation14 + $0x9b0] ss:$20 sps:$4 sm:$0xff]  }
 0x418   :  { %6826 = vmatprep.mubr.bf16.mxu0 %v9299_v22  ;;  %v9302_v12 = vpack.c.bf16 %v4628_v10, %v4628_v10  ;;  %6796 = vmatprep.subr.bf16.mxu0 %v8289_v5  ;;  %v8343_v34 = vld [vmem:[#allocation14 + $0x70c] ss:$20 sps:$4 sm:$0xff]   ;;  %v8341_v61 = vld [vmem:[#allocation14 + $0x708] ss:$20 sps:$4 sm:$0xff]   ;;  %v8349_v15 = vld [vmem:[#allocation14 + $0x6e4] ss:$20 sps:$4 sm:$0xff]  }
 0x419   :  { %6837 = vmatprep.subr.bf16.mxu1 %v8292_v2  ;;  %v8346_v13 = vld [vmem:[#allocation14 + $0x98c] ss:$20 sps:$4 sm:$0xff]   ;;  %v8344_v1 = vld [vmem:[#allocation14 + $0x988] ss:$20 sps:$4 sm:$0xff]   ;;  %v8352_v32 = vld [vmem:[#allocation14 + $0x964] ss:$20 sps:$4 sm:$0xff]  }
 0x41a   :  { %6867 = vmatprep.mubr.bf16.mxu1 %v9302_v12  ;;  %v8347_v57 = vld [vmem:[#allocation14 + $0x6e0] ss:$20 sps:$4 sm:$0xff]   ;;  %v8355_v39 = vld [vmem:[#allocation14 + $0x6bc] ss:$20 sps:$4 sm:$0xff]   ;;  %v8353_v6 = vld [vmem:[#allocation14 + $0x6b8] ss:$20 sps:$4 sm:$0xff]  }
 0x41b   :  { %6797 = vmatpush1.bf16.msra.mxu0 %v8287_v19  ;;  %6838 = vmatpush1.bf16.msra.mxu1 %v8290_v26  ;;  %v8350_v62 = vld [vmem:[#allocation14 + $0x960] ss:$20 sps:$4 sm:$0xff]   ;;  %v8358_v3 = vld [vmem:[#allocation14 + $0x93c] ss:$20 sps:$4 sm:$0xff]   ;;  %v8356_v7 = vld [vmem:[#allocation14 + $0x938] ss:$20 sps:$4 sm:$0xff]  }
 0x41c   :  { %6798 = vmatprep.subr.bf16.mxu0 %v8295_v14  ;;  %6839 = vmatprep.subr.bf16.mxu1 %v8298_v16  ;;  %v8361_v38 = vld [vmem:[#allocation14 + $0x694] ss:$20 sps:$4 sm:$0xff]   ;;  %v8359_v63 = vld [vmem:[#allocation14 + $0x690] ss:$20 sps:$4 sm:$0xff]   ;;  %v8367_v10 = vld [vmem:[#allocation14 + $0x66c] ss:$20 sps:$4 sm:$0xff]  }
 0x41d   :  { %v8364_v5 = vld [vmem:[#allocation14 + $0x914] ss:$20 sps:$4 sm:$0xff]   ;;  %v8362_v2 = vld [vmem:[#allocation14 + $0x910] ss:$20 sps:$4 sm:$0xff]   ;;  %v8370_v19 = vld [vmem:[#allocation14 + $0x8ec] ss:$20 sps:$4 sm:$0xff]  }
 0x41e   :  { %v8365_v26 = vld [vmem:[#allocation14 + $0x668] ss:$20 sps:$4 sm:$0xff]   ;;  %v8373_v16 = vld [vmem:[#allocation14 + $0x644] ss:$20 sps:$4 sm:$0xff]   ;;  %vm4609_vm15 = vcmp.gt.f32.partialorder %v9283_v35, 0.0  ;;  %vm4611_vm0 = vcmp.gt.f32.partialorder %v9285_v56, 0.0 }
 0x41f   :  { %6799 = vmatpush1.bf16.msra.mxu0 %v8293_v42  ;;  %6840 = vmatpush1.bf16.msra.mxu1 %v8296_v29  ;;  %v8368_v14 = vld [vmem:[#allocation14 + $0x8e8] ss:$20 sps:$4 sm:$0xff]   ;;  %v8376_v42 = vld [vmem:[#allocation14 + $0x8c4] ss:$20 sps:$4 sm:$0xff]   ;;  %v4617_v29 = vmul.f32 0.2, %v9283_v35 }
 0x420   :  { %6800 = vmatprep.subr.bf16.mxu0 %v8301_v4  ;;  %6841 = vmatprep.subr.bf16.mxu1 %v8304_v23  ;;  %v4619_v4 = vmul.f32 0.2, %v9285_v56  ;;  %v8371_v23 = vld [vmem:[#allocation14 + $0x640] ss:$20 sps:$4 sm:$0xff]  }
 0x423   :  { %6801 = vmatpush1.bf16.msra.mxu0 %v8299_v51  ;;  %6842 = vmatpush1.bf16.msra.mxu1 %v8302_v52  ;;  %v8374_v51 = vld [vmem:[#allocation14 + $0x8c0] ss:$20 sps:$4 sm:$0xff]   ;;  %v8379_v52 = vld [vmem:[#allocation14 + $0x124] ss:$20 sps:$4 sm:$0xff]  }
 0x424   :  { %6802 = vmatprep.subr.bf16.mxu0 %v8307_v54  ;;  %6843 = vmatprep.subr.bf16.mxu1 %v8310_v55  ;;  %v8382_v54 = vld [vmem:[#allocation14 + $0x3a4] ss:$20 sps:$4 sm:$0xff]   ;;  %v4625_v55 = vsel %vm4609_vm15, %v9283_v35, %v4617_v29  ;;  %v8448_v29 = vld [vmem:[#allocation14 + $0x46c] ss:$20 sps:$4 sm:$0xff]  }
 0x425   :  { %v8383_v35 = vld [vmem:[#allocation14 + $0xf8] ss:$20 sps:$4 sm:$0xff]  }
 0x427   :  { %6803 = vmatpush1.bf16.msra.mxu0 %v8305_v25  ;;  %6844 = vmatpush1.bf16.msra.mxu1 %v8308_v58  ;;  %v4627_v25 = vsel %vm4611_vm0, %v9285_v56, %v4619_v4  ;;  %v8377_v58 = vld [vmem:[#allocation14 + $0x120] ss:$20 sps:$4 sm:$0xff]   ;;  %v8386_v56 = vld [vmem:[#allocation14 + $0x378] ss:$20 sps:$4 sm:$0xff]   ;;  %v8443_v4 = vld [vmem:[#allocation14 + $0x1e8] ss:$20 sps:$4 sm:$0xff]  }
 0x428   :  { %6804 = vmatprep.subr.bf16.mxu0 %v8313_v59  ;;  %6845 = vmatprep.subr.bf16.mxu1 %v8316_v20  ;;  %v9311_v59 = vpack.c.bf16 %v4625_v55, %v4625_v55  ;;  %v9313_v20 = vpack.c.bf16 %v4627_v25, %v4627_v25  ;;  %v8452_v55 = vld [vmem:[#allocation14 + $0x440] ss:$20 sps:$4 sm:$0xff]   ;;  %v8457_v25 = vld [vmem:[#allocation14 + $0x19c] ss:$20 sps:$4 sm:$0xff]  }
 0x42b   :  { %6805 = vmatpush1.bf16.msra.mxu0 %v8311_v43  ;;  %6846 = vmatpush1.bf16.msra.mxu1 %v8314_v40  ;;  %v8380_v43 = vld [vmem:[#allocation14 + $0x3a0] ss:$20 sps:$4 sm:$0xff]   ;;  %v8385_v40 = vld [vmem:[#allocation14 + $0xfc] ss:$20 sps:$4 sm:$0xff]  }
 0x42c   :  { %6806 = vmatprep.subr.bf16.mxu0 %v8319_v0  ;;  %6847 = vmatprep.subr.bf16.mxu1 %v8322_v53  ;;  %v8388_v0 = vld [vmem:[#allocation14 + $0x37c] ss:$20 sps:$4 sm:$0xff]   ;;  %v8391_v53 = vld [vmem:[#allocation14 + $0xd4] ss:$20 sps:$4 sm:$0xff]  }
 0x42f   :  { %6807 = vmatpush1.bf16.msra.mxu0 %v8317_v36  ;;  %6848 = vmatpush1.bf16.msra.mxu1 %v8320_v27  ;;  %v8394_v36 = vld [vmem:[#allocation14 + $0x354] ss:$20 sps:$4 sm:$0xff]   ;;  %v8389_v27 = vld [vmem:[#allocation14 + $0xd0] ss:$20 sps:$4 sm:$0xff]  }
 0x430   :  { %6808 = vmatprep.subr.bf16.mxu0 %v8325_v37  ;;  %6849 = vmatprep.subr.bf16.mxu1 %v8328_v30  ;;  %v8392_v37 = vld [vmem:[#allocation14 + $0x350] ss:$20 sps:$4 sm:$0xff]   ;;  %v8397_v30 = vld [vmem:[#allocation14 + $0xac] ss:$20 sps:$4 sm:$0xff]  }
 0x433   :  { %6809 = vmatpush1.bf16.msra.mxu0 %v8323_v31  ;;  %6850 = vmatpush1.bf16.msra.mxu1 %v8326_v21  ;;  %v8400_v31 = vld [vmem:[#allocation14 + $0x32c] ss:$20 sps:$4 sm:$0xff]   ;;  %v8395_v21 = vld [vmem:[#allocation14 + $0xa8] ss:$20 sps:$4 sm:$0xff]  }
 0x434   :  { %6810 = vmatprep.subr.bf16.mxu0 %v8331_v49  ;;  %6851 = vmatprep.subr.bf16.mxu1 %v8334_v9  ;;  %v8398_v49 = vld [vmem:[#allocation14 + $0x328] ss:$20 sps:$4 sm:$0xff]   ;;  %v8403_v9 = vld [vmem:[#allocation14 + $0x84] ss:$20 sps:$4 sm:$0xff]  }
 0x437   :  { %6811 = vmatpush2.bf16.msra.mxu0 %v8329_v18  ;;  %6852 = vmatpush2.bf16.msra.mxu1 %v8332_v33  ;;  %v8406_v18 = vld [vmem:[#allocation14 + $0x304] ss:$20 sps:$4 sm:$0xff]   ;;  %v8401_v33 = vld [vmem:[#allocation14 + $0x80] ss:$20 sps:$4 sm:$0xff]  }
 0x438   :  { %6812 = vmatprep.subr.bf16.mxu0 %v8337_v60  ;;  %6853 = vmatprep.subr.bf16.mxu1 %v8340_v41  ;;  %v8404_v60 = vld [vmem:[#allocation14 + $0x300] ss:$20 sps:$4 sm:$0xff]   ;;  %v8409_v41 = vld [vmem:[#allocation14 + $0x5c] ss:$20 sps:$4 sm:$0xff]  }
 0x43b   :  { %6813 = vmatpush2.bf16.msra.mxu0 %v8335_v17  ;;  %6854 = vmatpush2.bf16.msra.mxu1 %v8338_v50  ;;  %v8412_v17 = vld [vmem:[#allocation14 + $0x2dc] ss:$20 sps:$4 sm:$0xff]   ;;  %v8407_v50 = vld [vmem:[#allocation14 + $0x58] ss:$20 sps:$4 sm:$0xff]  }
 0x43c   :  { %6814 = vmatprep.subr.bf16.mxu0 %v8343_v34  ;;  %6855 = vmatprep.subr.bf16.mxu1 %v8346_v13  ;;  %v8410_v34 = vld [vmem:[#allocation14 + $0x2d8] ss:$20 sps:$4 sm:$0xff]   ;;  %v8415_v13 = vld [vmem:[#allocation14 + $0x34] ss:$20 sps:$4 sm:$0xff]  }
 0x43f   :  { %6815 = vmatpush2.bf16.msra.mxu0 %v8341_v61  ;;  %6856 = vmatpush2.bf16.msra.mxu1 %v8344_v1  ;;  %v8418_v61 = vld [vmem:[#allocation14 + $0x2b4] ss:$20 sps:$4 sm:$0xff]   ;;  %v8413_v1 = vld [vmem:[#allocation14 + $0x30] ss:$20 sps:$4 sm:$0xff]  }
 0x440   :  { %6816 = vmatprep.subr.bf16.mxu0 %v8349_v15  ;;  %6857 = vmatprep.subr.bf16.mxu1 %v8352_v32  ;;  %v8416_v15 = vld [vmem:[#allocation14 + $0x2b0] ss:$20 sps:$4 sm:$0xff]   ;;  %v8421_v32 = vld [vmem:[#allocation14 + $0xc] ss:$20 sps:$4 sm:$0xff]  }
 0x443   :  { %6817 = vmatpush2.bf16.msra.mxu0 %v8347_v57  ;;  %6858 = vmatpush2.bf16.msra.mxu1 %v8350_v62  ;;  %v8424_v57 = vld [vmem:[#allocation14 + $0x28c] ss:$20 sps:$4 sm:$0xff]   ;;  %v8419_v62 = vld [vmem:[#allocation14 + $0x8] ss:$20 sps:$4 sm:$0xff]  }
 0x444   :  { %6818 = vmatprep.subr.bf16.mxu0 %v8355_v39  ;;  %6859 = vmatprep.subr.bf16.mxu1 %v8358_v3  ;;  %v8422_v39 = vld [vmem:[#allocation14 + $0x288] ss:$20 sps:$4 sm:$0xff]   ;;  %v8427_v3 = vld [vmem:[#allocation14 + $0x264] ss:$20 sps:$4 sm:$0xff]  }
 0x447   :  { %6819 = vmatpush2.bf16.msra.mxu0 %v8353_v6  ;;  %6860 = vmatpush2.bf16.msra.mxu1 %v8356_v7  ;;  %v8430_v6 = vld [vmem:[#allocation14 + $0x4e4] ss:$20 sps:$4 sm:$0xff]   ;;  %v8425_v7 = vld [vmem:[#allocation14 + $0x260] ss:$20 sps:$4 sm:$0xff]  }
 0x448   :  { %6820 = vmatprep.subr.bf16.mxu0 %v8361_v38  ;;  %6861 = vmatprep.subr.bf16.mxu1 %v8364_v5  ;;  %v8428_v38 = vld [vmem:[#allocation14 + $0x4e0] ss:$20 sps:$4 sm:$0xff]   ;;  %v8433_v5 = vld [vmem:[#allocation14 + $0x23c] ss:$20 sps:$4 sm:$0xff]  }
 0x44b   :  { %6821 = vmatpush2.bf16.msra.mxu0 %v8359_v63  ;;  %6862 = vmatpush2.bf16.msra.mxu1 %v8362_v2  ;;  %v8436_v63 = vld [vmem:[#allocation14 + $0x4bc] ss:$20 sps:$4 sm:$0xff]   ;;  %v8431_v2 = vld [vmem:[#allocation14 + $0x238] ss:$20 sps:$4 sm:$0xff]  }
 0x44c   :  { %6822 = vmatprep.subr.bf16.mxu0 %v8367_v10  ;;  %6863 = vmatprep.subr.bf16.mxu1 %v8370_v19  ;;  %v8434_v10 = vld [vmem:[#allocation14 + $0x4b8] ss:$20 sps:$4 sm:$0xff]   ;;  %v8439_v19 = vld [vmem:[#allocation14 + $0x214] ss:$20 sps:$4 sm:$0xff]  }
 0x44f   :  { %6823 = vmatpush2.bf16.msra.mxu0 %v8365_v26  ;;  %6864 = vmatpush2.bf16.msra.mxu1 %v8368_v14  ;;  %v8442_v26 = vld [vmem:[#allocation14 + $0x494] ss:$20 sps:$4 sm:$0xff]   ;;  %v8437_v14 = vld [vmem:[#allocation14 + $0x210] ss:$20 sps:$4 sm:$0xff]  }
 0x450   :  { %6824 = vmatprep.subr.bf16.mxu0 %v8373_v16  ;;  %6865 = vmatprep.subr.bf16.mxu1 %v8376_v42  ;;  %v8440_v16 = vld [vmem:[#allocation14 + $0x490] ss:$20 sps:$4 sm:$0xff]   ;;  %v8445_v42 = vld [vmem:[#allocation14 + $0x1ec] ss:$20 sps:$4 sm:$0xff]  }
 0x453   :  { %6825 = vmatpush2.bf16.msra.mxu0 %v8371_v23  ;;  %6866 = vmatpush2.bf16.msra.mxu1 %v8374_v51  ;;  %v8446_v23 = vld [vmem:[#allocation14 + $0x468] ss:$20 sps:$4 sm:$0xff]   ;;  %v8451_v51 = vld [vmem:[#allocation14 + $0x1c4] ss:$20 sps:$4 sm:$0xff]  }
 0x454   :  { %6876 = vmatprep.subr.bf16.mxu0 %v8379_v52  ;;  %6917 = vmatprep.subr.bf16.mxu1 %v8382_v54  ;;  %v8454_v52 = vld [vmem:[#allocation14 + $0x444] ss:$20 sps:$4 sm:$0xff]   ;;  %v8449_v54 = vld [vmem:[#allocation14 + $0x1c0] ss:$20 sps:$4 sm:$0xff]  }
 0x456   :  { %6827 = vmatmul.mubr.bf16.vlgmr.msra.gmra.mxu0 %v9311_v59  ;;  %6868 = vmatmul.mubr.bf16.vlgmr.msra.gmra.mxu1 %v9313_v20 }
 0x457   :  { %6877 = vmatpush1.bf16.msra.mxu0 %v8377_v58  ;;  %6908 = vmatprep.mubr.bf16.mxu0 %v9287_v45  ;;  %v8460_v58 = vld [vmem:[#allocation14 + $0x41c] ss:$20 sps:$4 sm:$0xff]  }
 0x458   :  { %6918 = vmatpush1.bf16.msra.mxu1 %v8380_v43  ;;  %6949 = vmatprep.mubr.bf16.mxu1 %v9289_v24  ;;  %v8455_v43 = vld [vmem:[#allocation14 + $0x198] ss:$20 sps:$4 sm:$0xff]  }
 0x459   :  { %6878 = vmatprep.subr.bf16.mxu0 %v8385_v40  ;;  %6919 = vmatprep.subr.bf16.mxu1 %v8388_v0  ;;  %v8458_v40 = vld [vmem:[#allocation14 + $0x418] ss:$20 sps:$4 sm:$0xff]   ;;  %v8463_v0 = vld [vmem:[#allocation14 + $0x174] ss:$20 sps:$4 sm:$0xff]  }
 0x45b   :  { %6879 = vmatpush1.bf16.msra.mxu0 %v8383_v35  ;;  %v8466_v35 = vld [vmem:[#allocation14 + $0x3f4] ss:$20 sps:$4 sm:$0xff]  }
 0x45c   :  { %6920 = vmatpush1.bf16.msra.mxu1 %v8386_v56  ;;  %6880 = vmatprep.subr.bf16.mxu0 %v8391_v53  ;;  %v8461_v56 = vld [vmem:[#allocation14 + $0x170] ss:$20 sps:$4 sm:$0xff]  }
 0x45d   :  { %6921 = vmatprep.subr.bf16.mxu1 %v8394_v36  ;;  %v8464_v53 = vld [vmem:[#allocation14 + $0x3f0] ss:$20 sps:$4 sm:$0xff]   ;;  %v8469_v36 = vld [vmem:[#allocation14 + $0x14c] ss:$20 sps:$4 sm:$0xff]  }
 0x45f   :  { %6881 = vmatpush1.bf16.msra.mxu0 %v8389_v27  ;;  %v8472_v27 = vld [vmem:[#allocation14 + $0x3cc] ss:$20 sps:$4 sm:$0xff]  }
 0x460   :  { %6922 = vmatpush1.bf16.msra.mxu1 %v8392_v37  ;;  %6882 = vmatprep.subr.bf16.mxu0 %v8397_v30  ;;  %v8467_v37 = vld [vmem:[#allocation14 + $0x148] ss:$20 sps:$4 sm:$0xff]  }
 0x461   :  { %6923 = vmatprep.subr.bf16.mxu1 %v8400_v31  ;;  %v8470_v30 = vld [vmem:[#allocation14 + $0x3c8] ss:$20 sps:$4 sm:$0xff]   ;;  %v8475_v31 = vld [vmem:[#allocation14 + $0x624] ss:$20 sps:$4 sm:$0xff]  }
 0x463   :  { %6883 = vmatpush1.bf16.msra.mxu0 %v8395_v21  ;;  %v8478_v21 = vld [vmem:[#allocation14 + $0x8a4] ss:$20 sps:$4 sm:$0xff]  }
 0x464   :  { %6924 = vmatpush1.bf16.msra.mxu1 %v8398_v49  ;;  %6884 = vmatprep.subr.bf16.mxu0 %v8403_v9  ;;  %v8473_v49 = vld [vmem:[#allocation14 + $0x620] ss:$20 sps:$4 sm:$0xff]  }
 0x465   :  { %6925 = vmatprep.subr.bf16.mxu1 %v8406_v18  ;;  %v8476_v9 = vld [vmem:[#allocation14 + $0x8a0] ss:$20 sps:$4 sm:$0xff]   ;;  %v8481_v18 = vld [vmem:[#allocation14 + $0x5fc] ss:$20 sps:$4 sm:$0xff]  }
 0x467   :  { %6885 = vmatpush1.bf16.msra.mxu0 %v8401_v33  ;;  %v8484_v33 = vld [vmem:[#allocation14 + $0x87c] ss:$20 sps:$4 sm:$0xff]  }
 0x468   :  { %6926 = vmatpush1.bf16.msra.mxu1 %v8404_v60  ;;  %6886 = vmatprep.subr.bf16.mxu0 %v8409_v41  ;;  %v8479_v60 = vld [vmem:[#allocation14 + $0x5f8] ss:$20 sps:$4 sm:$0xff]  }
 0x469   :  { %6927 = vmatprep.subr.bf16.mxu1 %v8412_v17  ;;  %v8482_v41 = vld [vmem:[#allocation14 + $0x878] ss:$20 sps:$4 sm:$0xff]   ;;  %v8487_v17 = vld [vmem:[#allocation14 + $0x5d4] ss:$20 sps:$4 sm:$0xff]  }
 0x46b   :  { %6887 = vmatpush1.bf16.msra.mxu0 %v8407_v50  ;;  %v8490_v50 = vld [vmem:[#allocation14 + $0x854] ss:$20 sps:$4 sm:$0xff]  }
 0x46c   :  { %6928 = vmatpush1.bf16.msra.mxu1 %v8410_v34  ;;  %6888 = vmatprep.subr.bf16.mxu0 %v8415_v13  ;;  %v8485_v34 = vld [vmem:[#allocation14 + $0x5d0] ss:$20 sps:$4 sm:$0xff]  }
 0x46d   :  { %6929 = vmatprep.subr.bf16.mxu1 %v8418_v61  ;;  %v8488_v13 = vld [vmem:[#allocation14 + $0x850] ss:$20 sps:$4 sm:$0xff]   ;;  %v8493_v61 = vld [vmem:[#allocation14 + $0x5ac] ss:$20 sps:$4 sm:$0xff]  }
 0x46f   :  { %6889 = vmatpush1.bf16.msra.mxu0 %v8413_v1  ;;  %v8496_v1 = vld [vmem:[#allocation14 + $0x82c] ss:$20 sps:$4 sm:$0xff]  }
 0x470   :  { %6930 = vmatpush1.bf16.msra.mxu1 %v8416_v15  ;;  %6890 = vmatprep.subr.bf16.mxu0 %v8421_v32  ;;  %v8491_v15 = vld [vmem:[#allocation14 + $0x5a8] ss:$20 sps:$4 sm:$0xff]  }
 0x471   :  { %6931 = vmatprep.subr.bf16.mxu1 %v8424_v57  ;;  %v8494_v32 = vld [vmem:[#allocation14 + $0x828] ss:$20 sps:$4 sm:$0xff]   ;;  %v8499_v57 = vld [vmem:[#allocation14 + $0x584] ss:$20 sps:$4 sm:$0xff]  }
 0x473   :  { %6891 = vmatpush1.bf16.msra.mxu0 %v8419_v62  ;;  %v8502_v62 = vld [vmem:[#allocation14 + $0x804] ss:$20 sps:$4 sm:$0xff]  }
 0x474   :  { %6932 = vmatpush1.bf16.msra.mxu1 %v8422_v39  ;;  %6892 = vmatprep.subr.bf16.mxu0 %v8427_v3  ;;  %v8497_v39 = vld [vmem:[#allocation14 + $0x580] ss:$20 sps:$4 sm:$0xff]  }
 0x475   :  { %6933 = vmatprep.subr.bf16.mxu1 %v8430_v6  ;;  %v8500_v3 = vld [vmem:[#allocation14 + $0x800] ss:$20 sps:$4 sm:$0xff]   ;;  %v8505_v6 = vld [vmem:[#allocation14 + $0x55c] ss:$20 sps:$4 sm:$0xff]  }
 0x477   :  { %6893 = vmatpush2.bf16.msra.mxu0 %v8425_v7  ;;  %v8508_v7 = vld [vmem:[#allocation14 + $0x7dc] ss:$20 sps:$4 sm:$0xff]  }
 0x478   :  { %6934 = vmatpush2.bf16.msra.mxu1 %v8428_v38  ;;  %6894 = vmatprep.subr.bf16.mxu0 %v8433_v5  ;;  %v8503_v38 = vld [vmem:[#allocation14 + $0x558] ss:$20 sps:$4 sm:$0xff]  }
 0x479   :  { %6935 = vmatprep.subr.bf16.mxu1 %v8436_v63  ;;  %v8506_v5 = vld [vmem:[#allocation14 + $0x7d8] ss:$20 sps:$4 sm:$0xff]   ;;  %v8511_v63 = vld [vmem:[#allocation14 + $0x534] ss:$20 sps:$4 sm:$0xff]  }
 0x47b   :  { %6895 = vmatpush2.bf16.msra.mxu0 %v8431_v2  ;;  %v8514_v2 = vld [vmem:[#allocation14 + $0x7b4] ss:$20 sps:$4 sm:$0xff]  }
 0x47c   :  { %6936 = vmatpush2.bf16.msra.mxu1 %v8434_v10  ;;  %6896 = vmatprep.subr.bf16.mxu0 %v8439_v19  ;;  %v8509_v10 = vld [vmem:[#allocation14 + $0x530] ss:$20 sps:$4 sm:$0xff]  }
 0x47d   :  { %6937 = vmatprep.subr.bf16.mxu1 %v8442_v26  ;;  %v8512_v19 = vld [vmem:[#allocation14 + $0x7b0] ss:$20 sps:$4 sm:$0xff]   ;;  %v8517_v26 = vld [vmem:[#allocation14 + $0x50c] ss:$20 sps:$4 sm:$0xff]  }
 0x47f   :  { %6897 = vmatpush2.bf16.msra.mxu0 %v8437_v14  ;;  %v8520_v14 = vld [vmem:[#allocation14 + $0x78c] ss:$20 sps:$4 sm:$0xff]  }
 0x480   :  { %6938 = vmatpush2.bf16.msra.mxu1 %v8440_v16  ;;  %6898 = vmatprep.subr.bf16.mxu0 %v8445_v42  ;;  %v8515_v16 = vld [vmem:[#allocation14 + $0x508] ss:$20 sps:$4 sm:$0xff]  }
 0x481   :  { %6939 = vmatprep.subr.bf16.mxu1 %v8448_v29  ;;  %v8518_v42 = vld [vmem:[#allocation14 + $0x788] ss:$20 sps:$4 sm:$0xff]   ;;  %v8523_v29 = vld [vmem:[#allocation14 + $0x764] ss:$20 sps:$4 sm:$0xff]  }
 0x483   :  { %6899 = vmatpush2.bf16.msra.mxu0 %v8443_v4  ;;  %v8526_v4 = vld [vmem:[#allocation14 + $0x9e4] ss:$20 sps:$4 sm:$0xff]  }
 0x484   :  { %6940 = vmatpush2.bf16.msra.mxu1 %v8446_v23  ;;  %6900 = vmatprep.subr.bf16.mxu0 %v8451_v51  ;;  %v8521_v23 = vld [vmem:[#allocation14 + $0x760] ss:$20 sps:$4 sm:$0xff]  }
 0x485   :  { %6941 = vmatprep.subr.bf16.mxu1 %v8454_v52  ;;  %v8524_v51 = vld [vmem:[#allocation14 + $0x9e0] ss:$20 sps:$4 sm:$0xff]   ;;  %v8529_v52 = vld [vmem:[#allocation14 + $0x73c] ss:$20 sps:$4 sm:$0xff]  }
 0x487   :  { %6901 = vmatpush2.bf16.msra.mxu0 %v8449_v54  ;;  %v8532_v54 = vld [vmem:[#allocation14 + $0x9bc] ss:$20 sps:$4 sm:$0xff]  }
 0x488   :  { %6942 = vmatpush2.bf16.msra.mxu1 %v8452_v55  ;;  %6902 = vmatprep.subr.bf16.mxu0 %v8457_v25  ;;  %v8527_v55 = vld [vmem:[#allocation14 + $0x738] ss:$20 sps:$4 sm:$0xff]  }
 0x489   :  { %6943 = vmatprep.subr.bf16.mxu1 %v8460_v58  ;;  %v8530_v25 = vld [vmem:[#allocation14 + $0x9b8] ss:$20 sps:$4 sm:$0xff]   ;;  %v8535_v58 = vld [vmem:[#allocation14 + $0x714] ss:$20 sps:$4 sm:$0xff]  }
 0x48b   :  { %6903 = vmatpush2.bf16.msra.mxu0 %v8455_v43  ;;  %v8538_v43 = vld [vmem:[#allocation14 + $0x994] ss:$20 sps:$4 sm:$0xff]  }
 0x48c   :  { %6944 = vmatpush2.bf16.msra.mxu1 %v8458_v40  ;;  %6904 = vmatprep.subr.bf16.mxu0 %v8463_v0  ;;  %v8533_v40 = vld [vmem:[#allocation14 + $0x710] ss:$20 sps:$4 sm:$0xff]  }
 0x48d   :  { %6945 = vmatprep.subr.bf16.mxu1 %v8466_v35  ;;  %v8536_v0 = vld [vmem:[#allocation14 + $0x990] ss:$20 sps:$4 sm:$0xff]   ;;  %v8541_v35 = vld [vmem:[#allocation14 + $0x6ec] ss:$20 sps:$4 sm:$0xff]  }
 0x48f   :  { %6905 = vmatpush2.bf16.msra.mxu0 %v8461_v56  ;;  %v8544_v56 = vld [vmem:[#allocation14 + $0x96c] ss:$20 sps:$4 sm:$0xff]  }
 0x490   :  { %6946 = vmatpush2.bf16.msra.mxu1 %v8464_v53  ;;  %6906 = vmatprep.subr.bf16.mxu0 %v8469_v36  ;;  %v8539_v53 = vld [vmem:[#allocation14 + $0x6e8] ss:$20 sps:$4 sm:$0xff]  }
 0x491   :  { %6947 = vmatprep.subr.bf16.mxu1 %v8472_v27  ;;  %v8542_v36 = vld [vmem:[#allocation14 + $0x968] ss:$20 sps:$4 sm:$0xff]   ;;  %v8547_v27 = vld [vmem:[#allocation14 + $0x6c4] ss:$20 sps:$4 sm:$0xff]  }
 0x493   :  { %6907 = vmatpush2.bf16.msra.mxu0 %v8467_v37  ;;  %v8550_v37 = vld [vmem:[#allocation14 + $0x944] ss:$20 sps:$4 sm:$0xff]  }
 0x494   :  { %6948 = vmatpush2.bf16.msra.mxu1 %v8470_v30  ;;  %6958 = vmatprep.subr.bf16.mxu0 %v8475_v31  ;;  %v8545_v30 = vld [vmem:[#allocation14 + $0x6c0] ss:$20 sps:$4 sm:$0xff]  }
 0x495   :  { %6999 = vmatprep.subr.bf16.mxu1 %v8478_v21  ;;  %v8548_v31 = vld [vmem:[#allocation14 + $0x940] ss:$20 sps:$4 sm:$0xff]   ;;  %v8553_v21 = vld [vmem:[#allocation14 + $0x69c] ss:$20 sps:$4 sm:$0xff]  }
 0x496   :  { %6909 = vmatmul.mubr.bf16.vlgmr.msra.gmra.mxu0 %v9291_v8 }
 0x497   :  { %6950 = vmatmul.mubr.bf16.vlgmr.msra.gmra.mxu1 %v9293_v11  ;;  %6959 = vmatpush1.bf16.msra.mxu0 %v8473_v49  ;;  %v8556_v49 = vld [vmem:[#allocation14 + $0x91c] ss:$20 sps:$4 sm:$0xff]  }
 0x498   :  { %6990 = vmatprep.mubr.bf16.mxu0 %v9299_v22  ;;  %7000 = vmatpush1.bf16.msra.mxu1 %v8476_v9  ;;  %v8551_v9 = vld [vmem:[#allocation14 + $0x698] ss:$20 sps:$4 sm:$0xff]  }
 0x499   :  { %7031 = vmatprep.mubr.bf16.mxu1 %v9302_v12  ;;  %6960 = vmatprep.subr.bf16.mxu0 %v8481_v18  ;;  %v8554_v18 = vld [vmem:[#allocation14 + $0x918] ss:$20 sps:$4 sm:$0xff]  }
 0x49a   :  { %7001 = vmatprep.subr.bf16.mxu1 %v8484_v33  ;;  %v8559_v33 = vld [vmem:[#allocation14 + $0x674] ss:$20 sps:$4 sm:$0xff]  }
 0x49b   :  { %6961 = vmatpush1.bf16.msra.mxu0 %v8479_v60  ;;  %v8562_v60 = vld [vmem:[#allocation14 + $0x8f4] ss:$20 sps:$4 sm:$0xff]  }
 0x49c   :  { %7002 = vmatpush1.bf16.msra.mxu1 %v8482_v41  ;;  %6962 = vmatprep.subr.bf16.mxu0 %v8487_v17  ;;  %v8557_v41 = vld [vmem:[#allocation14 + $0x670] ss:$20 sps:$4 sm:$0xff]  }
 0x49d   :  { %7003 = vmatprep.subr.bf16.mxu1 %v8490_v50  ;;  %v8560_v17 = vld [vmem:[#allocation14 + $0x8f0] ss:$20 sps:$4 sm:$0xff]   ;;  %v8565_v50 = vld [vmem:[#allocation14 + $0x64c] ss:$20 sps:$4 sm:$0xff]  }
 0x49f   :  { %6963 = vmatpush1.bf16.msra.mxu0 %v8485_v34  ;;  %v8568_v34 = vld [vmem:[#allocation14 + $0x8cc] ss:$20 sps:$4 sm:$0xff]  }
 0x4a0   :  { %7004 = vmatpush1.bf16.msra.mxu1 %v8488_v13  ;;  %6964 = vmatprep.subr.bf16.mxu0 %v8493_v61  ;;  %v8563_v13 = vld [vmem:[#allocation14 + $0x648] ss:$20 sps:$4 sm:$0xff]  }
 0x4a1   :  { %7005 = vmatprep.subr.bf16.mxu1 %v8496_v1  ;;  %v8566_v61 = vld [vmem:[#allocation14 + $0x8c8] ss:$20 sps:$4 sm:$0xff]  }
 0x4a2   :  { %v8569_v1 = vld [vmem:[#allocation14 + $0x268] ss:$20 sps:$4 sm:$0xff]  }
 0x4a3   :  { %6965 = vmatpush1.bf16.msra.mxu0 %v8491_v15  ;;  %v8570_v15 = vld [vmem:[#allocation14 + $0x4e8] ss:$20 sps:$4 sm:$0xff]  }
 0x4a4   :  { %7006 = vmatpush1.bf16.msra.mxu1 %v8494_v32  ;;  %6966 = vmatprep.subr.bf16.mxu0 %v8499_v57  ;;  %v8571_v32 = vld [vmem:[#allocation14 + $0x128] ss:$20 sps:$4 sm:$0xff]  }
 0x4a5   :  { %7007 = vmatprep.subr.bf16.mxu1 %v8502_v62  ;;  %v8572_v57 = vld [vmem:[#allocation14 + $0x3a8] ss:$20 sps:$4 sm:$0xff]   ;;  %v8573_v62 = vld [vmem:[#allocation14 + $0x240] ss:$20 sps:$4 sm:$0xff]  }
 0x4a7   :  { %6967 = vmatpush1.bf16.msra.mxu0 %v8497_v39 }
 0x4a8   :  { %7008 = vmatpush1.bf16.msra.mxu1 %v8500_v3  ;;  %6968 = vmatprep.subr.bf16.mxu0 %v8505_v6  ;;  %v8574_v6 = vld [vmem:[#allocation14 + $0x4c0] ss:$20 sps:$4 sm:$0xff]  }
 0x4a9   :  { %7009 = vmatprep.subr.bf16.mxu1 %v8508_v7  ;;  %v8575_v7 = vld [vmem:[#allocation14 + $0x100] ss:$20 sps:$4 sm:$0xff]  }
 0x4ab   :  { %6969 = vmatpush1.bf16.msra.mxu0 %v8503_v38 }
 0x4ac   :  { %7010 = vmatpush1.bf16.msra.mxu1 %v8506_v5  ;;  %6970 = vmatprep.subr.bf16.mxu0 %v8511_v63  ;;  %v8576_v63 = vld [vmem:[#allocation14 + $0x380] ss:$20 sps:$4 sm:$0xff]  }
 0x4ad   :  { %7011 = vmatprep.subr.bf16.mxu1 %v8514_v2  ;;  %v8577_v2 = vld [vmem:[#allocation14 + $0x218] ss:$20 sps:$4 sm:$0xff]  }
 0x4af   :  { %6971 = vmatpush1.bf16.msra.mxu0 %v8509_v10  ;;  %v8578_v10 = vld [vmem:[#allocation14 + $0x498] ss:$20 sps:$4 sm:$0xff]  }
 0x4b0   :  { %7012 = vmatpush1.bf16.msra.mxu1 %v8512_v19  ;;  %6972 = vmatprep.subr.bf16.mxu0 %v8517_v26 }
 0x4b1   :  { %7013 = vmatprep.subr.bf16.mxu1 %v8520_v14  ;;  %v8579_v14 = vld [vmem:[#allocation14 + $0xd8] ss:$20 sps:$4 sm:$0xff]  }
 0x4b3   :  { %6973 = vmatpush1.bf16.msra.mxu0 %v8515_v16 }
 0x4b4   :  { %7014 = vmatpush1.bf16.msra.mxu1 %v8518_v42  ;;  %6974 = vmatprep.subr.bf16.mxu0 %v8523_v29  ;;  %v8581_v29 = vld [vmem:[#allocation14 + $0x1f0] ss:$20 sps:$4 sm:$0xff]  }
 0x4b5   :  { %7015 = vmatprep.subr.bf16.mxu1 %v8526_v4  ;;  %v8582_v4 = vld [vmem:[#allocation14 + $0x470] ss:$20 sps:$4 sm:$0xff]  }
 0x4b7   :  { %6975 = vmatpush2.bf16.msra.mxu0 %v8521_v23  ;;  %v8583_v23 = vld [vmem:[#allocation14 + $0xb0] ss:$20 sps:$4 sm:$0xff]  }
 0x4b8   :  { %7016 = vmatpush2.bf16.msra.mxu1 %v8524_v51  ;;  %6976 = vmatprep.subr.bf16.mxu0 %v8529_v52  ;;  %v8585_v51 = vld [vmem:[#allocation14 + $0x1c8] ss:$20 sps:$4 sm:$0xff]  }
 0x4b9   :  { %7017 = vmatprep.subr.bf16.mxu1 %v8532_v54  ;;  %v8586_v52 = vld [vmem:[#allocation14 + $0x448] ss:$20 sps:$4 sm:$0xff]  }
 0x4ba   :  { %v8587_v54 = vld [vmem:[#allocation14 + $0x88] ss:$20 sps:$4 sm:$0xff]  }
 0x4bb   :  { %6977 = vmatpush2.bf16.msra.mxu0 %v8527_v55  ;;  %v8588_v55 = vld [vmem:[#allocation14 + $0x308] ss:$20 sps:$4 sm:$0xff]  }
 0x4bc   :  { %7018 = vmatpush2.bf16.msra.mxu1 %v8530_v25  ;;  %6978 = vmatprep.subr.bf16.mxu0 %v8535_v58  ;;  %v8589_v25 = vld [vmem:[#allocation14 + $0x1a0] ss:$20 sps:$4 sm:$0xff]  }
 0x4bd   :  { %7019 = vmatprep.subr.bf16.mxu1 %v8538_v43  ;;  %v8590_v58 = vld [vmem:[#allocation14 + $0x420] ss:$20 sps:$4 sm:$0xff]  }
 0x4be   :  { %v8591_v43 = vld [vmem:[#allocation14 + $0x60] ss:$20 sps:$4 sm:$0xff]  }
 0x4bf   :  { %6979 = vmatpush2.bf16.msra.mxu0 %v8533_v40  ;;  %v8592_v40 = vld [vmem:[#allocation14 + $0x2e0] ss:$20 sps:$4 sm:$0xff]  }
 0x4c0   :  { %7020 = vmatpush2.bf16.msra.mxu1 %v8536_v0  ;;  %6980 = vmatprep.subr.bf16.mxu0 %v8541_v35  ;;  %v8593_v0 = vld [vmem:[#allocation14 + $0x178] ss:$20 sps:$4 sm:$0xff]  }
 0x4c1   :  { %7021 = vmatprep.subr.bf16.mxu1 %v8544_v56  ;;  %v8594_v35 = vld [vmem:[#allocation14 + $0x3f8] ss:$20 sps:$4 sm:$0xff]  }
 0x4c2   :  { %v8595_v56 = vld [vmem:[#allocation14 + $0x38] ss:$20 sps:$4 sm:$0xff]  }
 0x4c3   :  { %6981 = vmatpush2.bf16.msra.mxu0 %v8539_v53  ;;  %v8596_v53 = vld [vmem:[#allocation14 + $0x2b8] ss:$20 sps:$4 sm:$0xff]  }
 0x4c4   :  { %7022 = vmatpush2.bf16.msra.mxu1 %v8542_v36  ;;  %6982 = vmatprep.subr.bf16.mxu0 %v8547_v27  ;;  %v8597_v36 = vld [vmem:[#allocation14 + $0x150] ss:$20 sps:$4 sm:$0xff]  }
 0x4c5   :  { %7023 = vmatprep.subr.bf16.mxu1 %v8550_v37  ;;  %v8598_v27 = vld [vmem:[#allocation14 + $0x3d0] ss:$20 sps:$4 sm:$0xff]  }
 0x4c6   :  { %v8599_v37 = vld [vmem:[#allocation14 + $0x10] ss:$20 sps:$4 sm:$0xff]  }
 0x4c7   :  { %6983 = vmatpush2.bf16.msra.mxu0 %v8545_v30  ;;  %v8600_v30 = vld [vmem:[#allocation14 + $0x290] ss:$20 sps:$4 sm:$0xff]  }
 0x4c8   :  { %7024 = vmatpush2.bf16.msra.mxu1 %v8548_v31  ;;  %6984 = vmatprep.subr.bf16.mxu0 %v8553_v21  ;;  %v8601_v31 = vld [vmem:[#allocation14 + $0x768] ss:$20 sps:$4 sm:$0xff]  }
 0x4c9   :  { %7025 = vmatprep.subr.bf16.mxu1 %v8556_v49  ;;  %v8602_v21 = vld [vmem:[#allocation14 + $0x9e8] ss:$20 sps:$4 sm:$0xff]  }
 0x4ca   :  { %v8603_v49 = vld [vmem:[#allocation14 + $0x628] ss:$20 sps:$4 sm:$0xff]  }
 0x4cb   :  { %6985 = vmatpush2.bf16.msra.mxu0 %v8551_v9  ;;  %v8604_v9 = vld [vmem:[#allocation14 + $0x8a8] ss:$20 sps:$4 sm:$0xff]  }
 0x4cc   :  { %7026 = vmatpush2.bf16.msra.mxu1 %v8554_v18  ;;  %6986 = vmatprep.subr.bf16.mxu0 %v8559_v33  ;;  %v8605_v18 = vld [vmem:[#allocation14 + $0x740] ss:$20 sps:$4 sm:$0xff]  }
 0x4cd   :  { %7027 = vmatprep.subr.bf16.mxu1 %v8562_v60  ;;  %v8606_v33 = vld [vmem:[#allocation14 + $0x9c0] ss:$20 sps:$4 sm:$0xff]  }
 0x4ce   :  { %v8607_v60 = vld [vmem:[#allocation14 + $0x600] ss:$20 sps:$4 sm:$0xff]  }
 0x4cf   :  { %6987 = vmatpush2.bf16.msra.mxu0 %v8557_v41  ;;  %v8608_v41 = vld [vmem:[#allocation14 + $0x880] ss:$20 sps:$4 sm:$0xff]  }
 0x4d0   :  { %7028 = vmatpush2.bf16.msra.mxu1 %v8560_v17  ;;  %6988 = vmatprep.subr.bf16.mxu0 %v8565_v50  ;;  %v8609_v17 = vld [vmem:[#allocation14 + $0x718] ss:$20 sps:$4 sm:$0xff]  }
 0x4d1   :  { %7029 = vmatprep.subr.bf16.mxu1 %v8568_v34  ;;  %v8610_v50 = vld [vmem:[#allocation14 + $0x998] ss:$20 sps:$4 sm:$0xff]  }
 0x4d2   :  { %v8611_v34 = vld [vmem:[#allocation14 + $0x5d8] ss:$20 sps:$4 sm:$0xff]  }
 0x4d3   :  { %6989 = vmatpush2.bf16.msra.mxu0 %v8563_v13  ;;  %v8613_v13 = vld [vmem:[#allocation14 + $0x6f0] ss:$20 sps:$4 sm:$0xff]  }
 0x4d4   :  { %7030 = vmatpush2.bf16.msra.mxu1 %v8566_v61  ;;  %8081 = vmatprep.subr.bf16.mxu0 %v8569_v1  ;;  %v8615_v61 = vld [vmem:[#allocation14 + $0x5b0] ss:$20 sps:$4 sm:$0xff]   ;;  %v8617_v1 = vld [vmem:[#allocation14 + $0x6c8] ss:$20 sps:$4 sm:$0xff]  }
 0x4d5   :  { %8103 = vmatprep.subr.bf16.mxu1 %v8570_v15  ;;  %v8618_v15 = vld [vmem:[#allocation14 + $0x948] ss:$20 sps:$4 sm:$0xff]  }
 0x4d6   :  { %6991 = vmatmul.mubr.bf16.vlgmr.msra.gmra.mxu0 %v9311_v59  ;;  %v9324_v39 = vpop.f32.mrf.mxu0  ;;  %v9326_v3 = vpop.f32.mrf.mxu1 }
 0x4d7   :  { %7032 = vmatmul.mubr.bf16.vlgmr.msra.gmra.mxu1 %v9313_v20  ;;  %8082 = vmatpush3.bf16.msra.mxu0 %v8571_v32  ;;  %v8620_v32 = vld [vmem:[#allocation14 + $0x808] ss:$20 sps:$4 sm:$0xff]  }
 0x4d8   :  { %7072 = vmatprep.mubr.bf16.mxu0 %v9287_v45  ;;  %8104 = vmatpush3.bf16.msra.mxu1 %v8572_v57  ;;  %v9330_v38 = vpop.f32.mrf.mxu0  ;;  %v9332_v5 = vpop.f32.mrf.mxu1  ;;  %v8580_v45 = vld [vmem:[#allocation14 + $0x358] ss:$20 sps:$4 sm:$0xff]   ;;  %v8621_v57 = vld [vmem:[#allocation14 + $0x6a0] ss:$20 sps:$4 sm:$0xff]  }
 0x4d9   :  { %7112 = vmatprep.mubr.bf16.mxu1 %v9289_v24  ;;  %8083 = vmatprep.subr.bf16.mxu0 %v8573_v62  ;;  %v8584_v24 = vld [vmem:[#allocation14 + $0x330] ss:$20 sps:$4 sm:$0xff]   ;;  %v8622_v62 = vld [vmem:[#allocation14 + $0x920] ss:$20 sps:$4 sm:$0xff]  }
 0x4da   :  { %8105 = vmatprep.subr.bf16.mxu1 %v8574_v6  ;;  %v6750_v19 = vpop.f32.mrf.mxu0  ;;  %v6791_v26 = vpop.f32.mrf.mxu1  ;;  %v8623_v6 = vld [vmem:[#allocation14 + $0x560] ss:$20 sps:$4 sm:$0xff]  }
 0x4db   :  { %8084 = vmatpush3.bf16.msra.mxu0 %v8575_v7  ;;  %v8624_v7 = vld [vmem:[#allocation14 + $0x7e0] ss:$20 sps:$4 sm:$0xff]   ;;  %v8627_v19 = vld [vmem:[#allocation14 + $0x538] ss:$20 sps:$4 sm:$0xff]  }
 0x4dc   :  { %8106 = vmatpush3.bf16.msra.mxu1 %v8576_v63  ;;  %v6751_v16 = vpop.f32.mrf.mxu0  ;;  %v6792_v42 = vpop.f32.mrf.mxu1  ;;  %8085 = vmatprep.subr.bf16.mxu0 %v8577_v2  ;;  %v8625_v63 = vld [vmem:[#allocation14 + $0x678] ss:$20 sps:$4 sm:$0xff]  }
 0x4dd   :  { %8107 = vmatprep.subr.bf16.mxu1 %v8578_v10  ;;  %v8626_v2 = vld [vmem:[#allocation14 + $0x8f8] ss:$20 sps:$4 sm:$0xff]   ;;  %v9339_v10 = vld [vmem:[#allocation16] sm:$0x1f] }
 0x4de   :  { %v8628_v26 = vld [vmem:[#allocation14 + $0x7b8] ss:$20 sps:$4 sm:$0xff]   ;;  %v5026_v16 = vrot.slane %v9339_v10, %v8989_v44  ;;  %v8630_v42 = vld [vmem:[#allocation14 + $0x8d0] ss:$20 sps:$4 sm:$0xff]  }
 0x4df   :  { %8086 = vmatpush3.bf16.msra.mxu0 %v8579_v14  ;;  %v8629_v14 = vld [vmem:[#allocation14 + $0x650] ss:$20 sps:$4 sm:$0xff]  }
 0x4e0   :  { %8108 = vmatpush3.bf16.msra.mxu1 %v8580_v45  ;;  %8087 = vmatprep.subr.bf16.mxu0 %v8581_v29  ;;  %v5030_v45 = vrot.slane %v9339_v10, %v8997_v47  ;;  %v8631_v29 = vld [vmem:[#allocation14 + $0x510] ss:$20 sps:$4 sm:$0xff]  }
 0x4e1   :  { %8109 = vmatprep.subr.bf16.mxu1 %v8582_v4  ;;  %v8632_v4 = vld [vmem:[#allocation14 + $0x790] ss:$20 sps:$4 sm:$0xff]  }
 0x4e3   :  { %8088 = vmatpush3.bf16.msra.mxu0 %v8583_v23  ;;  %v6747_v23 = vadd.f32 %v9324_v39, %v5026_v16 }
 0x4e4   :  { %8110 = vmatpush3.bf16.msra.mxu1 %v8584_v24  ;;  %8089 = vmatprep.subr.bf16.mxu0 %v8585_v51  ;;  %v6749_v24 = vadd.f32 %v9330_v38, %v5030_v45 }
 0x4e5   :  { %8111 = vmatprep.subr.bf16.mxu1 %v8586_v52  ;;  %v6788_v51 = vadd.f32 %v9326_v3, %v6747_v23 }
 0x4e6   :  { %v6790_v47 = vadd.f32 %v9332_v5, %v6749_v24 }
 0x4e7   :  { %8090 = vmatpush3.bf16.msra.mxu0 %v8587_v54 }
 0x4e8   :  { %8112 = vmatpush3.bf16.msra.mxu1 %v8588_v55  ;;  %8091 = vmatprep.subr.bf16.mxu0 %v8589_v25 }
 0x4e9   :  { %8113 = vmatprep.subr.bf16.mxu1 %v8590_v58 }
 0x4eb   :  { %8092 = vmatpush3.bf16.msra.mxu0 %v8591_v43 }
 0x4ec   :  { %8114 = vmatpush3.bf16.msra.mxu1 %v8592_v40  ;;  %8093 = vmatprep.subr.bf16.mxu0 %v8593_v0 }
 0x4ed   :  { %8115 = vmatprep.subr.bf16.mxu1 %v8594_v35 }
 0x4ef   :  { %8094 = vmatpush3.bf16.msra.mxu0 %v8595_v56 }
 0x4f0   :  { %8116 = vmatpush3.bf16.msra.mxu1 %v8596_v53  ;;  %8095 = vmatprep.subr.bf16.mxu0 %v8597_v36 }
 0x4f1   :  { %8117 = vmatprep.subr.bf16.mxu1 %v8598_v27 }
 0x4f3   :  { %8096 = vmatpush3.bf16.msra.mxu0 %v8599_v37 }
 0x4f4   :  { %8118 = vmatpush3.bf16.msra.mxu1 %v8600_v30  ;;  %8125 = vmatprep.subr.bf16.mxu0 %v8601_v31  ;;  %v5034_v31 = vrot.slane %v9339_v10, %v8994_v46 }
 0x4f5   :  { %8147 = vmatprep.subr.bf16.mxu1 %v8602_v21  ;;  %v5038_v21 = vrot.slane %v9339_v10, %v9000_v48 }
 0x4f6   :  { %7073 = vmatmul.mubr.bf16.vlgmr.msra.gmra.mxu0 %v9291_v8  ;;  %v8612_v8 = vld [vmem:[#allocation14 + $0x858] ss:$20 sps:$4 sm:$0xff]  }
 0x4f7   :  { %7113 = vmatmul.mubr.bf16.vlgmr.msra.gmra.mxu1 %v9293_v11  ;;  %8126 = vmatpush3.bf16.msra.mxu0 %v8603_v49  ;;  %v8614_v11 = vld [vmem:[#allocation14 + $0x970] ss:$20 sps:$4 sm:$0xff]  }
 0x4f8   :  { %7152 = vmatprep.mubr.bf16.mxu0 %v9299_v22  ;;  %8148 = vmatpush3.bf16.msra.mxu1 %v8604_v9  ;;  %v8616_v22 = vld [vmem:[#allocation14 + $0x830] ss:$20 sps:$4 sm:$0xff]  }
 0x4f9   :  { %7192 = vmatprep.mubr.bf16.mxu1 %v9302_v12  ;;  %8127 = vmatprep.subr.bf16.mxu0 %v8605_v18  ;;  %v8619_v12 = vld [vmem:[#allocation14 + $0x588] ss:$20 sps:$4 sm:$0xff]  }
 0x4fa   :  { %8149 = vmatprep.subr.bf16.mxu1 %v8606_v33 }
 0x4fb   :  { %8128 = vmatpush3.bf16.msra.mxu0 %v8607_v60 }
 0x4fc   :  { %8150 = vmatpush3.bf16.msra.mxu1 %v8608_v41  ;;  %8129 = vmatprep.subr.bf16.mxu0 %v8609_v17 }
 0x4fd   :  { %8151 = vmatprep.subr.bf16.mxu1 %v8610_v50 }
 0x4ff   :  { %8130 = vmatpush3.bf16.msra.mxu0 %v8611_v34 }
 0x500   :  { %8152 = vmatpush3.bf16.msra.mxu1 %v8612_v8  ;;  %8131 = vmatprep.subr.bf16.mxu0 %v8613_v13 }
 0x501   :  { %8153 = vmatprep.subr.bf16.mxu1 %v8614_v11 }
 0x503   :  { %8132 = vmatpush3.bf16.msra.mxu0 %v8615_v61 }
 0x504   :  { %8154 = vmatpush3.bf16.msra.mxu1 %v8616_v22  ;;  %8133 = vmatprep.subr.bf16.mxu0 %v8617_v1 }
 0x505   :  { %8155 = vmatprep.subr.bf16.mxu1 %v8618_v15 }
 0x507   :  { %8134 = vmatpush3.bf16.msra.mxu0 %v8619_v12 }
 0x508   :  { %8156 = vmatpush3.bf16.msra.mxu1 %v8620_v32  ;;  %8135 = vmatprep.subr.bf16.mxu0 %v8621_v57 }
 0x509   :  { %8157 = vmatprep.subr.bf16.mxu1 %v8622_v62 }
 0x50b   :  { %8136 = vmatpush3.bf16.msra.mxu0 %v8623_v6 }
 0x50c   :  { %8158 = vmatpush3.bf16.msra.mxu1 %v8624_v7  ;;  %8137 = vmatprep.subr.bf16.mxu0 %v8625_v63 }
 0x50d   :  { %8159 = vmatprep.subr.bf16.mxu1 %v8626_v2 }
 0x50f   :  { %8138 = vmatpush3.bf16.msra.mxu0 %v8627_v19  ;;  %v5042_v19 = vrot.slane %v9339_v10, %v9049_v28 }
 0x510   :  { %8160 = vmatpush3.bf16.msra.mxu1 %v8628_v26  ;;  %8139 = vmatprep.subr.bf16.mxu0 %v8629_v14 }
 0x511   :  { %8161 = vmatprep.subr.bf16.mxu1 %v8630_v42 }
 0x513   :  { %8140 = vmatpush3.bf16.msra.mxu0 %v8631_v29 }
 0x514   :  { %8162 = vmatpush3.bf16.msra.mxu1 %v8632_v4 }
 0x516   :  { %v6828_v44 = vpop.f32.mrf.mxu0  ;;  %v6869_v52 = vpop.f32.mrf.mxu1  ;;  %7153 = vmatmul.mubr.bf16.vlgmr.msra.gmra.mxu0 %v9311_v59 }
 0x517   :  { %v6829_v54 = vadd.f32 %v6828_v44, %v6788_v51  ;;  %7193 = vmatmul.mubr.bf16.vlgmr.msra.gmra.mxu1 %v9313_v20 }
 0x518   :  { %v6830_v55 = vpop.f32.mrf.mxu0  ;;  %v6871_v25 = vpop.f32.mrf.mxu1 }
 0x519   :  { %v6870_v58 = vadd.f32 %v6869_v52, %v6829_v54  ;;  %v6831_v39 = vadd.f32 %v6830_v55, %v6790_v47 }
 0x51a   :  { %v6832_v43 = vpop.f32.mrf.mxu0  ;;  %v6873_v40 = vpop.f32.mrf.mxu1 }
 0x51b   :  { %8649 = vtanh.f32 %v6870_v58  ;;  %v6872_v38 = vadd.f32 %v6871_v25, %v6831_v39 }
 0x51c   :  { %v6833_v0 = vpop.f32.mrf.mxu0  ;;  %v6874_v35 = vpop.f32.mrf.mxu1 }
 0x51d   :  { %8651 = vtanh.f32 %v6872_v38 }
 0x528   :  { %v8650_v3 = vpop.eup %8649 }
 0x529   :  { %7205 = vst [vmem:[#allocation17] sm:$0xff] %v8650_v3 }
 0x52a   :  { %v8652_v56 = vpop.eup %8651 }
 0x52b   :  { %7206 = vst [vmem:[#allocation17 + $0x8] sm:$0xff] %v8652_v56 }
 0x556   :  { %v6910_v59 = vpop.f32.mrf.mxu0 }
 0x557   :  { %v6951_v5 = vpop.f32.mrf.mxu1  ;;  %v6911_v49 = vadd.f32 %v6910_v59, %v5034_v31 }
 0x558   :  { %v6912_v53 = vpop.f32.mrf.mxu0 }
 0x559   :  { %v6953_v36 = vpop.f32.mrf.mxu1  ;;  %v6913_v9 = vadd.f32 %v6912_v53, %v5038_v21  ;;  %v6952_v18 = vadd.f32 %v6951_v5, %v6911_v49 }
 0x55a   :  { %v6914_v20 = vpop.f32.mrf.mxu0 }
 0x55b   :  { %v6955_v27 = vpop.f32.mrf.mxu1  ;;  %v6954_v60 = vadd.f32 %v6953_v36, %v6913_v9 }
 0x55c   :  { %v6915_v37 = vpop.f32.mrf.mxu0 }
 0x55d   :  { %v6956_v30 = vpop.f32.mrf.mxu1 }
 0x596   :  { %v6992_v33 = vpop.f32.mrf.mxu0 }
 0x597   :  { %v6993_v41 = vadd.f32 %v6992_v33, %v6952_v18  ;;  %v7033_v17 = vpop.f32.mrf.mxu1 }
 0x598   :  { %v6994_v50 = vpop.f32.mrf.mxu0 }
 0x599   :  { %v7034_v34 = vadd.f32 %v7033_v17, %v6993_v41  ;;  %v6995_v8 = vadd.f32 %v6994_v50, %v6954_v60  ;;  %v7035_v13 = vpop.f32.mrf.mxu1 }
 0x59a   :  { %v6996_v11 = vpop.f32.mrf.mxu0 }
 0x59b   :  { %8653 = vtanh.f32 %v7034_v34  ;;  %v7036_v61 = vadd.f32 %v7035_v13, %v6995_v8  ;;  %v7037_v22 = vpop.f32.mrf.mxu1 }
 0x59c   :  { %v6997_v1 = vpop.f32.mrf.mxu0 }
 0x59d   :  { %8655 = vtanh.f32 %v7036_v61  ;;  %v7038_v46 = vpop.f32.mrf.mxu1 }
 0x5a8   :  { %v8654_v15 = vpop.eup %8653 }
 0x5a9   :  { %7207 = vst [vmem:[#allocation17 + $0x10] sm:$0xff] %v8654_v15 }
 0x5aa   :  { %v8656_v48 = vpop.eup %8655 }
 0x5ab   :  { %7208 = vst [vmem:[#allocation17 + $0x18] sm:$0xff] %v8656_v48 }
 0x5b6   :  { %v8097_v12 = vpop.f32.mrf.mxu0 }
 0x5b7   :  { %v8119_v32 = vpop.f32.mrf.mxu1 }
 0x5b8   :  { %v8098_v57 = vpop.f32.mrf.mxu0 }
 0x5b9   :  { %v8120_v62 = vpop.f32.mrf.mxu1  ;;  %v8099_v26 = vadd.f32 %v8098_v57, %v8097_v12 }
 0x5ba   :  { %v8100_v6 = vpop.f32.mrf.mxu0  ;;  %v8121_v42 = vadd.f32 %v8120_v62, %v8119_v32 }
 0x5bb   :  { %v8122_v7 = vpop.f32.mrf.mxu1  ;;  %v7075_v14 = vadd.f32 %v8099_v26, %v5042_v19 }
 0x5bc   :  { %v8101_v63 = vpop.f32.mrf.mxu0 }
 0x5bd   :  { %v8123_v2 = vpop.f32.mrf.mxu1  ;;  %v7115_v4 = vadd.f32 %v8121_v42, %v7075_v14 }
 0x5d6   :  { %v8141_v16 = vpop.f32.mrf.mxu0 }
 0x5d7   :  { %v8163_v45 = vpop.f32.mrf.mxu1 }
 0x5d8   :  { %v8142_v29 = vpop.f32.mrf.mxu0 }
 0x5d9   :  { %v8143_v23 = vadd.f32 %v8142_v29, %v8141_v16  ;;  %v8164_v24 = vpop.f32.mrf.mxu1 }
 0x5da   :  { %v8144_v51 = vpop.f32.mrf.mxu0  ;;  %v8165_v52 = vadd.f32 %v8164_v24, %v8163_v45 }
 0x5db   :  { %v7155_v44 = vadd.f32 %v8143_v23, %v7115_v4  ;;  %v8166_v47 = vpop.f32.mrf.mxu1 }
 0x5dc   :  { %v8145_v54 = vpop.f32.mrf.mxu0 }
 0x5dd   :  { %v7195_v55 = vadd.f32 %v8165_v52, %v7155_v44  ;;  %v8167_v25 = vpop.f32.mrf.mxu1 }
 0x5df   :  { %8657 = vtanh.f32 %v7195_v55 }
 0x5ec   :  { %v8658_v28 = vpop.eup %8657 }
 0x5ed   :  { %7209 = vst [vmem:[#allocation17 + $0x20] sm:$0xff] %v8658_v28 }
 0x5ee   :  { %8852 = shalt.err (!%p8849_p7)
}
 0x5ef   :  { %7219 = dma.vmem_to_hbm [thread:$0]  %s7217_s8, 640, %s9369_s9, [#allocation4]  }
 0x5f0   :  { %8871 = dma.done.wait [#allocation4], 640  }
 0x5f1   :  { %8872 = vsyncadd [#allocation4], 4294966656 }
 0x5f2   :  { %7223 = vsyncpa [#allocation3], 1 }
 0x5f3   :  { %7224 = vsyncpa [#allocation6], 1 }
 0x5f4   :  { %7225 = vsyncpa [#allocation9], 1 }
 0x5f5   :  { %7226 = vsyncpa [#allocation12], 1 }
 0x5f6   :  { %7227 = vsyncpa [#allocation15], 1 }
 0x5f7   :  { %7228 = vsyncpa [#allocation4], 1 }

</bundles_post_ra>
